<compile_context>
chip_gen: v7x
topology: tpu7x:2x2x1
jax: 0.10.0
libtpu: 0.0.40
codegen_flags: <defaults>
</compile_context>

<pallas_src>
import functools

import jax
import jax.numpy as jnp
from jax import lax
from jax.experimental import pallas as pl
from jax.experimental.pallas import tpu as pltpu


# ---------------------------------------------------------------------------
# Host-side constant builders (all folded to compile-time constants under jit)
# ---------------------------------------------------------------------------

def _tap_shifts(W):
    """Flat lane offset of each 3x3 tap (tap t = (ky)*3 + (kx), oy=ky-1)."""
    return tuple(oy * W + ox for oy in (-1, 0, 1) for ox in (-1, 0, 1))


def _tap_masks(H, W, B):
    """(9, 1, B*H*W) f32 0/1 validity mask per tap for the batch-in-lanes layout.

    Zero where the tap would read outside its own sample's HxW image; this both
    implements the conv zero padding and prevents cross-sample bleed across the
    flattened lane axis.
    """
    HW = H * W
    p = jnp.arange(B * HW, dtype=jnp.int32) % HW
    row, col = p // W, p % W
    masks = []
    for oy in (-1, 0, 1):
        for ox in (-1, 0, 1):
            ok = jnp.full((B * HW,), True)
            if oy == -1:
                ok = ok & (row >= 1)
            elif oy == 1:
                ok = ok & (row <= H - 2)
            if ox == -1:
                ok = ok & (col >= 1)
            elif ox == 1:
                ok = ok & (col <= W - 2)
            masks.append(ok)
    return jnp.stack(masks).astype(jnp.float32).reshape(9, 1, B * HW)


def _sample_mean_mat(B, n):
    """(B*n, B): right-multiplying a (C, B*n) image yields per-sample means."""
    samp = jnp.arange(B * n) // n
    return (samp[:, None] == jnp.arange(B)[None, :]).astype(jnp.float32) / n


def _sample_bcast_mat(B, n):
    """(B, B*n) 0/1: broadcasts one value per sample over its lane block."""
    samp = jnp.arange(B * n) // n
    return (jnp.arange(B)[:, None] == samp[None, :]).astype(jnp.float32)


def _resize_matrix(Hi, Wi, Ho, Wo):
    """(Hi*Wi, Ho*Wo) bilinear (align_corners=False) matrix: out = in_flat @ R."""
    def axis_weights(n_in, n_out):
        scale = n_in / n_out
        d = jnp.maximum((jnp.arange(n_out, dtype=jnp.float32) + 0.5) * scale - 0.5,
                        0.0)
        i0 = jnp.floor(d).astype(jnp.int32)
        i1 = jnp.minimum(i0 + 1, n_in - 1)
        w = d - i0.astype(jnp.float32)
        m = jnp.zeros((n_out, n_in), jnp.float32)
        idx = jnp.arange(n_out)
        m = m.at[idx, i0].add(1.0 - w)
        m = m.at[idx, i1].add(w)
        return m
    Rh = axis_weights(Hi, Ho)                       # (Ho, Hi)
    Rw = axis_weights(Wi, Wo)                       # (Wo, Wi)
    return jnp.einsum('yj,xi->jiyx', Rh, Rw).reshape(Hi * Wi, Ho * Wo)


def _block_diag(R, B):
    K, N = R.shape
    out = jnp.zeros((B * K, B * N), R.dtype)
    for b in range(B):
        out = out.at[b * K:(b + 1) * K, b * N:(b + 1) * N].set(R)
    return out


# ---------------------------------------------------------------------------
# Fused RAM kernel
# ---------------------------------------------------------------------------

def ram_kernel(x0_ref, x1_ref, g_ref,
               gconv_w_ref, gconv_b_ref, gamma_ref, beta_ref,
               smean_ref, gmat_ref, bcast_ref,
               rszg_ref, rsz1_ref,
               res1_w_ref, res1_b_ref, res2_w_ref, res2_b_ref,
               fw1_ref, fw2_ref, fw3_ref, fb_ref,
               mg_ref, mm_ref,
               loc_ref, r1_ref, r2_ref,
               *, shifts_g, shifts_m, eps):
    f32 = jnp.float32
    bf16 = jnp.bfloat16

    def conv3x3(x, w_ref, m_ref, shifts):
        """3x3 'same' conv as 9 accumulating bf16 MXU dots (no im2col buffer).

        out[p] needs x[p + s] for flat tap offset s; pltpu.roll matches np.roll
        (out[i] = x[i - shift]), so shift = (-s) mod L.  Wrapped / out-of-image
        lanes are zeroed by the precomputed tap mask.
        """
        L = x.shape[-1]
        acc = None
        for t, s in enumerate(shifts):
            xs = x if s == 0 else pltpu.roll(x, shift=(-s) % L, axis=1)
            xt = (xs * m_ref[t]).astype(bf16)
            part = jnp.dot(w_ref[t], xt, preferred_element_type=f32)
            acc = part if acc is None else acc + part
        return acc

    # ---- gconv path: conv3x3 + bias -> GroupNorm -> ReLU (glob resolution) --
    g = g_ref[...]                                               # (C, B*Ng)
    a = conv3x3(g, gconv_w_ref, mg_ref, shifts_g) + gconv_b_ref[...]
    # Per-sample per-channel E[x] and E[x^2] via an indicator matmul, then the
    # group average over channels and a per-sample lane broadcast (f32).
    mean_cb = jnp.dot(a, smean_ref[...], preferred_element_type=f32)     # (C,B)
    sq_cb = jnp.dot(a * a, smean_ref[...], preferred_element_type=f32)   # (C,B)
    gmean = jnp.dot(gmat_ref[...], mean_cb, preferred_element_type=f32)  # (C,B)
    gsq = jnp.dot(gmat_ref[...], sq_cb, preferred_element_type=f32)      # (C,B)
    gvar = gsq - gmean * gmean
    scale = gamma_ref[...] * lax.rsqrt(gvar + eps)                       # (C,B)
    shift = beta_ref[...] - gmean * scale                                # (C,B)
    scale_l = jnp.dot(scale, bcast_ref[...], preferred_element_type=f32)
    shift_l = jnp.dot(shift, bcast_ref[...], preferred_element_type=f32)
    gfeat = jnp.maximum(a * scale_l + shift_l, 0.0)                # (C, B*Ng)

    # ---- bilinear resizes as constant interpolation matmuls ----------------
    glob0 = jnp.dot(gfeat.astype(bf16), rszg_ref[...],
                    preferred_element_type=f32)                   # (C, B*HW)
    loc2 = jnp.dot(x1_ref[...].astype(bf16), rsz1_ref[...],
                   preferred_element_type=f32)                    # (C, B*HW)
    loc1 = x0_ref[...]                                            # (C, B*HW)

    # ---- residual gates: two independent K=C tap-loops (no block-diag) -----
    z1 = conv3x3(loc1 - glob0, res1_w_ref, mm_ref, shifts_m) + res1_b_ref[...]
    z2 = conv3x3(loc2 - glob0, res2_w_ref, mm_ref, shifts_m) + res2_b_ref[...]
    r1 = pl.reciprocal(1.0 + jnp.exp(-z1), approx=True)
    r2 = pl.reciprocal(1.0 + jnp.exp(-z2), approx=True)

    # ---- fuse conv: three tap-loops accumulate into one output (no concat) --
    loc = (conv3x3(loc1 * r1, fw1_ref, mm_ref, shifts_m)
           + conv3x3(loc2 * r2, fw2_ref, mm_ref, shifts_m)
           + conv3x3(glob0, fw3_ref, mm_ref, shifts_m)
           + fb_ref[...])

    loc_ref[...] = loc.astype(loc_ref.dtype)
    r1_ref[...] = r1.astype(r1_ref.dtype)
    r2_ref[...] = r2.astype(r2_ref.dtype)


# ---------------------------------------------------------------------------
# RAM module (deterministic synthetic parameters)
# ---------------------------------------------------------------------------

class RAMPallas:
    """Conv weights are stored per-tap: w[t, cout, cin] with t = ky*3 + kx
    (== PyTorch OIHW weight permuted to (ky, kx, cout, cin))."""

    def __init__(self, tar_feat, key):
        C = tar_feat
        self.C = C
        self.groups = C // 2
        ks = jax.random.split(key, 10)
        s = 0.1
        n = jax.random.normal
        self.gconv_w = n(ks[0], (9, C, C), jnp.float32) * s
        self.gconv_b = n(ks[1], (C, 1), jnp.float32) * s
        self.gn_gamma = 1.0 + n(ks[2], (C, 1), jnp.float32) * s
        self.gn_beta = n(ks[3], (C, 1), jnp.float32) * s
        self.res1_w = n(ks[4], (9, C, C), jnp.float32) * s
        self.res1_b = n(ks[5], (C, 1), jnp.float32) * s
        self.res2_w = n(ks[6], (9, C, C), jnp.float32) * s
        self.res2_b = n(ks[7], (C, 1), jnp.float32) * s
        self.fuse_w = n(ks[8], (9, C, 3 * C), jnp.float32) * s
        self.fuse_b = n(ks[9], (C, 1), jnp.float32) * s
        cpg = C // self.groups
        grp = jnp.arange(C) // cpg
        # GroupNorm group-average-over-channels matrix (includes 1/cpg).
        self.gmat = jnp.where(grp[:, None] == grp[None, :],
                              1.0 / cpg, 0.0).astype(jnp.float32)

    def __call__(self, xs, glob_x):
        x0, x1 = xs
        B, C, H, W = x0.shape
        _, _, H1, W1 = x1.shape
        _, _, Hg, Wg = glob_x.shape
        Ng = Hg * Wg
        L = B * H * W

        def to_flat(t):        # (B,C,h,w) -> channel-major, batch in lanes
            return jnp.transpose(t, (1, 0, 2, 3)).reshape(C, -1)

        x0f, x1f, gf = to_flat(x0), to_flat(x1), to_flat(glob_x)

        bf = jnp.bfloat16
        # Host-precomputed constants (constant-folded at compile time).
        smean = _sample_mean_mat(B, Ng)                         # (B*Ng, B)
        bcast = _sample_bcast_mat(B, Ng)                        # (B, B*Ng)
        rszg = _block_diag(_resize_matrix(Hg, Wg, H, W), B).astype(bf)
        rsz1 = _block_diag(_resize_matrix(H1, W1, H, W), B).astype(bf)
        mask_g = _tap_masks(Hg, Wg, B)                          # (9,1,B*Ng)
        mask_m = _tap_masks(H, W, B)                            # (9,1,L)

        fw1 = self.fuse_w[:, :, 0:C].astype(bf)                 # loc1*res1 block
        fw2 = self.fuse_w[:, :, C:2 * C].astype(bf)             # loc2*res2 block
        fw3 = self.fuse_w[:, :, 2 * C:3 * C].astype(bf)         # glob_x0 block

        args = (x0f, x1f, gf,
                self.gconv_w.astype(bf), self.gconv_b, self.gn_gamma,
                self.gn_beta, smean, self.gmat, bcast, rszg, rsz1,
                self.res1_w.astype(bf), self.res1_b,
                self.res2_w.astype(bf), self.res2_b,
                fw1, fw2, fw3, self.fuse_b, mask_g, mask_m)

        kernel = functools.partial(ram_kernel,
                                   shifts_g=_tap_shifts(Wg),
                                   shifts_m=_tap_shifts(W),
                                   eps=1e-5)

        def full_spec(shape):
            nd = len(shape)
            return pl.BlockSpec(tuple(shape), lambda i, _n=nd: (0,) * _n)

        out_sds = jax.ShapeDtypeStruct((C, L), jnp.float32)
        loc_f, r1_f, r2_f = pl.pallas_call(
            kernel,
            out_shape=(out_sds, out_sds, out_sds),
            grid=(1,),
            in_specs=[full_spec(a.shape) for a in args],
            out_specs=tuple(full_spec((C, L)) for _ in range(3)),
            compiler_params=pltpu.CompilerParams(
                dimension_semantics=("arbitrary",),
                vmem_limit_bytes=32 * 1024 * 1024),
        )(*args)

        def unflat(t):
            return t.reshape(C, B, H, W).transpose(1, 0, 2, 3)

        return unflat(loc_f), unflat(r1_f), unflat(r2_f)


# ---------------------------------------------------------------------------
# Pure-JAX reference (numerical cross-check) and bilinear resize glue
# ---------------------------------------------------------------------------

def bilinear_resize_nchw(x, out_h, out_w):
    B, C, Hi, Wi = x.shape
    if (Hi, Wi) == (out_h, out_w):
        return x
    sy, sx = Hi / out_h, Wi / out_w
    dy = jnp.maximum((jnp.arange(out_h, dtype=jnp.float32) + 0.5) * sy - 0.5, 0.0)
    dx = jnp.maximum((jnp.arange(out_w, dtype=jnp.float32) + 0.5) * sx - 0.5, 0.0)
    y0 = jnp.floor(dy).astype(jnp.int32)
    x0 = jnp.floor(dx).astype(jnp.int32)
    y1 = jnp.minimum(y0 + 1, Hi - 1)
    x1 = jnp.minimum(x0 + 1, Wi - 1)
    wy = (dy - y0.astype(jnp.float32))[None, None, :, None]
    wx = (dx - x0.astype(jnp.float32))[None, None, None, :]
    top, bot = x[:, :, y0, :], x[:, :, y1, :]
    rows = top * (1.0 - wy) + bot * wy
    left, right = rows[:, :, :, x0], rows[:, :, :, x1]
    return left * (1.0 - wx) + right * wx


def _ref_conv3x3(x, w_taps, b):
    _, cout, cin = w_taps.shape
    w = jnp.transpose(w_taps.reshape(3, 3, cout, cin), (2, 3, 0, 1))     # OIHW
    y = lax.conv_general_dilated(
        x, w, window_strides=(1, 1), padding=((1, 1), (1, 1)),
        dimension_numbers=("NCHW", "OIHW", "NCHW"),
        precision=lax.Precision.HIGHEST)
    return y + b.reshape(1, cout, 1, 1)


def _ref_forward(ram, xs, glob_x, eps=1e-5):
    x0, x1 = xs
    B, C, H, W = x0.shape
    g = _ref_conv3x3(glob_x, ram.gconv_w, ram.gconv_b)
    gg = g.reshape(B, ram.groups, -1)
    mean = gg.mean(axis=2, keepdims=True)
    var = ((gg - mean) ** 2).mean(axis=2, keepdims=True)
    g = ((gg - mean) / jnp.sqrt(var + eps)).reshape(g.shape)
    g = g * ram.gn_gamma.reshape(1, C, 1, 1) + ram.gn_beta.reshape(1, C, 1, 1)
    g = jnp.maximum(g, 0.0)
    glob_x0 = bilinear_resize_nchw(g, H, W)
    loc_x1 = x0
    loc_x2 = bilinear_resize_nchw(x1, H, W)
    res_x1 = jax.nn.sigmoid(_ref_conv3x3(loc_x1 - glob_x0, ram.res1_w, ram.res1_b))
    res_x2 = jax.nn.sigmoid(_ref_conv3x3(loc_x2 - glob_x0, ram.res2_w, ram.res2_b))
    loc_x = _ref_conv3x3(
        jnp.concatenate([loc_x1 * res_x1, loc_x2 * res_x2, glob_x0], axis=1),
        ram.fuse_w, ram.fuse_b)
    return loc_x, res_x1, res_x2


# ---------------------------------------------------------------------------

if __name__ == "__main__":
    key = jax.random.PRNGKey(0)
    k_x0, k_x1, k_g, k_p = jax.random.split(key, 4)

    B, C = 2, 4
    xs0 = jax.random.normal(k_x0, (B, C, 16, 16), jnp.float32)   # high-res local
    xs1 = jax.random.normal(k_x1, (B, C, 8, 8), jnp.float32)     # low-res local
    glob_x = jax.random.normal(k_g, (B, C, 8, 8), jnp.float32)   # global feature

    ram = RAMPallas(tar_feat=C, key=k_p)
    fwd = jax.jit(lambda a, b, c: ram([a, b], c))
    loc_x, res_x1, res_x2 = fwd(xs0, xs1, glob_x)
    jax.block_until_ready((loc_x, res_x1, res_x2))

    assert loc_x.shape == (B, C, 16, 16)
    assert res_x1.shape == (B, C, 16, 16)
    assert res_x2.shape == (B, C, 16, 16)
    assert bool(jnp.all(jnp.isfinite(loc_x)))
    # approx=True reciprocal may overshoot 1.0 by ~1e-3.
    assert bool(jnp.all((res_x1 > -1e-3) & (res_x1 < 1.0 + 1e-3)))
    assert bool(jnp.all((res_x2 > -1e-3) & (res_x2 < 1.0 + 1e-3)))

    # Cross-check against a pure-JAX/XLA f32 reference (kernel uses bf16 MXU
    # operands, so tolerance is slightly loose).
    ref_loc, ref_r1, ref_r2 = _ref_forward(ram, [xs0, xs1], glob_x)
    for got, ref in ((loc_x, ref_loc), (res_x1, ref_r1), (res_x2, ref_r2)):
        err = float(jnp.max(jnp.abs(got - ref)))
        assert bool(jnp.allclose(got, ref, atol=3e-2, rtol=3e-2)), err

    print("KERNEL_OK")
</pallas_src>

<mosaic_0001>
module attributes {stable_mosaic.version = 11 : i64} {
  func.func private @main(%arg0: i32) attributes {dimension_semantics = [#tpu.dimension_semantics<core_parallel>], iteration_bounds = array<i64: 2>, tpu.core_type = #tpu.core_type<sc_scalar_subcore>, window_params = []} {
    return
  }
}

module attributes {stable_mosaic.version = 11 : i64} {
  func.func private @main(%arg0: i32) attributes {dimension_semantics = [#tpu.dimension_semantics<core_parallel>], iteration_bounds = array<i64: 2>, tpu.core_type = #tpu.core_type<sc_scalar_subcore>, window_params = []} {
    return
  }
}

module attributes {stable_mosaic.version = 11 : i64} {
  func.func @ram_kernel(%arg0: i32, %arg1: memref<4x512xf32, #tpu.memory_space<vmem>>, %arg2: memref<4x128xf32, #tpu.memory_space<vmem>>, %arg3: memref<4x128xf32, #tpu.memory_space<vmem>>, %arg4: memref<9x4x4xbf16, #tpu.memory_space<vmem>>, %arg5: memref<4x1xf32, #tpu.memory_space<vmem>>, %arg6: memref<4x1xf32, #tpu.memory_space<vmem>>, %arg7: memref<4x1xf32, #tpu.memory_space<vmem>>, %arg8: memref<128x2xf32, #tpu.memory_space<vmem>>, %arg9: memref<4x4xf32, #tpu.memory_space<vmem>>, %arg10: memref<2x128xf32, #tpu.memory_space<vmem>>, %arg11: memref<128x512xbf16, #tpu.memory_space<vmem>>, %arg12: memref<128x512xbf16, #tpu.memory_space<vmem>>, %arg13: memref<9x4x4xbf16, #tpu.memory_space<vmem>>, %arg14: memref<4x1xf32, #tpu.memory_space<vmem>>, %arg15: memref<9x4x4xbf16, #tpu.memory_space<vmem>>, %arg16: memref<4x1xf32, #tpu.memory_space<vmem>>, %arg17: memref<9x4x4xbf16, #tpu.memory_space<vmem>>, %arg18: memref<9x4x4xbf16, #tpu.memory_space<vmem>>, %arg19: memref<9x4x4xbf16, #tpu.memory_space<vmem>>, %arg20: memref<4x1xf32, #tpu.memory_space<vmem>>, %arg21: memref<9x1x128xf32, #tpu.memory_space<vmem>>, %arg22: memref<9x1x512xf32, #tpu.memory_space<vmem>>, %arg23: memref<4x512xf32, #tpu.memory_space<vmem>>, %arg24: memref<4x512xf32, #tpu.memory_space<vmem>>, %arg25: memref<4x512xf32, #tpu.memory_space<vmem>>) attributes {dimension_semantics = [#tpu.dimension_semantics<arbitrary>], iteration_bounds = array<i64: 1>, scalar_prefetch = 0 : i64, scratch_operands = 0 : i64, tpu.core_type = #tpu.core_type<tc>, window_params = [{pipeline_mode = #tpu.pipeline_mode<synchronous>, transform_indices = @transform_0, window_bounds = array<i64: 4, 512>}, {pipeline_mode = #tpu.pipeline_mode<synchronous>, transform_indices = @transform_1, window_bounds = array<i64: 4, 128>}, {pipeline_mode = #tpu.pipeline_mode<synchronous>, transform_indices = @transform_2, window_bounds = array<i64: 4, 128>}, {pipeline_mode = #tpu.pipeline_mode<synchronous>, transform_indices = @transform_3, window_bounds = array<i64: 9, 4, 4>}, {pipeline_mode = #tpu.pipeline_mode<synchronous>, transform_indices = @transform_4, window_bounds = array<i64: 4, 1>}, {pipeline_mode = #tpu.pipeline_mode<synchronous>, transform_indices = @transform_5, window_bounds = array<i64: 4, 1>}, {pipeline_mode = #tpu.pipeline_mode<synchronous>, transform_indices = @transform_6, window_bounds = array<i64: 4, 1>}, {pipeline_mode = #tpu.pipeline_mode<synchronous>, transform_indices = @transform_7, window_bounds = array<i64: 128, 2>}, {pipeline_mode = #tpu.pipeline_mode<synchronous>, transform_indices = @transform_8, window_bounds = array<i64: 4, 4>}, {pipeline_mode = #tpu.pipeline_mode<synchronous>, transform_indices = @transform_9, window_bounds = array<i64: 2, 128>}, {pipeline_mode = #tpu.pipeline_mode<synchronous>, transform_indices = @transform_10, window_bounds = array<i64: 128, 512>}, {pipeline_mode = #tpu.pipeline_mode<synchronous>, transform_indices = @transform_11, window_bounds = array<i64: 128, 512>}, {pipeline_mode = #tpu.pipeline_mode<synchronous>, transform_indices = @transform_12, window_bounds = array<i64: 9, 4, 4>}, {pipeline_mode = #tpu.pipeline_mode<synchronous>, transform_indices = @transform_13, window_bounds = array<i64: 4, 1>}, {pipeline_mode = #tpu.pipeline_mode<synchronous>, transform_indices = @transform_14, window_bounds = array<i64: 9, 4, 4>}, {pipeline_mode = #tpu.pipeline_mode<synchronous>, transform_indices = @transform_15, window_bounds = array<i64: 4, 1>}, {pipeline_mode = #tpu.pipeline_mode<synchronous>, transform_indices = @transform_16, window_bounds = array<i64: 9, 4, 4>}, {pipeline_mode = #tpu.pipeline_mode<synchronous>, transform_indices = @transform_17, window_bounds = array<i64: 9, 4, 4>}, {pipeline_mode = #tpu.pipeline_mode<synchronous>, transform_indices = @transform_18, window_bounds = array<i64: 9, 4, 4>}, {pipeline_mode = #tpu.pipeline_mode<synchronous>, transform_indices = @transform_19, window_bounds = array<i64: 4, 1>}, {pipeline_mode = #tpu.pipeline_mode<synchronous>, transform_indices = @transform_20, window_bounds = array<i64: 9, 1, 128>}, {pipeline_mode = #tpu.pipeline_mode<synchronous>, transform_indices = @transform_21, window_bounds = array<i64: 9, 1, 512>}, {pipeline_mode = #tpu.pipeline_mode<synchronous>, transform_indices = @transform_22, window_bounds = array<i64: 4, 512>}, {pipeline_mode = #tpu.pipeline_mode<synchronous>, transform_indices = @transform_23, window_bounds = array<i64: 4, 512>}, {pipeline_mode = #tpu.pipeline_mode<synchronous>, transform_indices = @transform_24, window_bounds = array<i64: 4, 512>}]} {
    %c0 = arith.constant 0 : index
    %c0_0 = arith.constant 0 : index
    %0 = vector.load %arg3[%c0, %c0_0] : memref<4x128xf32, #tpu.memory_space<vmem>>, vector<4x128xf32>
    %c9_i32 = arith.constant 9 : i32
    %1 = tpu.dynamic_rotate %0 by %c9_i32 dim 1 : vector<4x128xf32>, i32 -> vector<4x128xf32>
    %c0_1 = arith.constant 0 : index
    %c0_2 = arith.constant 0 : index
    %c0_3 = arith.constant 0 : index
    %2 = vector.load %arg21[%c0_1, %c0_2, %c0_3] : memref<9x1x128xf32, #tpu.memory_space<vmem>>, vector<1x1x128xf32>
    %3 = vector.shape_cast %2 : vector<1x1x128xf32> to vector<1x128xf32>
    %4 = vector.broadcast %3 : vector<1x128xf32> to vector<4x128xf32>
    %5 = arith.mulf %1, %4 : vector<4x128xf32>
    %6 = arith.truncf %5 : vector<4x128xf32> to vector<4x128xbf16>
    %c0_4 = arith.constant 0 : index
    %c0_5 = arith.constant 0 : index
    %c0_6 = arith.constant 0 : index
    %7 = vector.load %arg4[%c0_4, %c0_5, %c0_6] : memref<9x4x4xbf16, #tpu.memory_space<vmem>>, vector<1x4x4xbf16>
    %8 = vector.shape_cast %7 : vector<1x4x4xbf16> to vector<4x4xbf16>
    %cst = arith.constant dense<0.000000e+00> : vector<4x128xf32>
    %9 = tpu.matmul %8, %6, %cst {dimension_numbers = #tpu.dot_dimension_numbers<[1], [0], [0], [1], [0, 0, 1, 1], [], []>} : vector<4x4xbf16>, vector<4x128xbf16>, vector<4x128xf32> -> vector<4x128xf32>
    %c8_i32 = arith.constant 8 : i32
    %10 = tpu.dynamic_rotate %0 by %c8_i32 dim 1 : vector<4x128xf32>, i32 -> vector<4x128xf32>
    %c1 = arith.constant 1 : index
    %c0_7 = arith.constant 0 : index
    %c0_8 = arith.constant 0 : index
    %11 = vector.load %arg21[%c1, %c0_7, %c0_8] : memref<9x1x128xf32, #tpu.memory_space<vmem>>, vector<1x1x128xf32>
    %12 = vector.shape_cast %11 : vector<1x1x128xf32> to vector<1x128xf32>
    %13 = vector.broadcast %12 : vector<1x128xf32> to vector<4x128xf32>
    %14 = arith.mulf %10, %13 : vector<4x128xf32>
    %15 = arith.truncf %14 : vector<4x128xf32> to vector<4x128xbf16>
    %c1_9 = arith.constant 1 : index
    %c0_10 = arith.constant 0 : index
    %c0_11 = arith.constant 0 : index
    %16 = vector.load %arg4[%c1_9, %c0_10, %c0_11] : memref<9x4x4xbf16, #tpu.memory_space<vmem>>, vector<1x4x4xbf16>
    %17 = vector.shape_cast %16 : vector<1x4x4xbf16> to vector<4x4xbf16>
    %cst_12 = arith.constant dense<0.000000e+00> : vector<4x128xf32>
    %18 = tpu.matmul %17, %15, %cst_12 {dimension_numbers = #tpu.dot_dimension_numbers<[1], [0], [0], [1], [0, 0, 1, 1], [], []>} : vector<4x4xbf16>, vector<4x128xbf16>, vector<4x128xf32> -> vector<4x128xf32>
    %19 = arith.addf %9, %18 : vector<4x128xf32>
    %c7_i32 = arith.constant 7 : i32
    %20 = tpu.dynamic_rotate %0 by %c7_i32 dim 1 : vector<4x128xf32>, i32 -> vector<4x128xf32>
    %c2 = arith.constant 2 : index
    %c0_13 = arith.constant 0 : index
    %c0_14 = arith.constant 0 : index
    %21 = vector.load %arg21[%c2, %c0_13, %c0_14] : memref<9x1x128xf32, #tpu.memory_space<vmem>>, vector<1x1x128xf32>
    %22 = vector.shape_cast %21 : vector<1x1x128xf32> to vector<1x128xf32>
    %23 = vector.broadcast %22 : vector<1x128xf32> to vector<4x128xf32>
    %24 = arith.mulf %20, %23 : vector<4x128xf32>
    %25 = arith.truncf %24 : vector<4x128xf32> to vector<4x128xbf16>
    %c2_15 = arith.constant 2 : index
    %c0_16 = arith.constant 0 : index
    %c0_17 = arith.constant 0 : index
    %26 = vector.load %arg4[%c2_15, %c0_16, %c0_17] : memref<9x4x4xbf16, #tpu.memory_space<vmem>>, vector<1x4x4xbf16>
    %27 = vector.shape_cast %26 : vector<1x4x4xbf16> to vector<4x4xbf16>
    %cst_18 = arith.constant dense<0.000000e+00> : vector<4x128xf32>
    %28 = tpu.matmul %27, %25, %cst_18 {dimension_numbers = #tpu.dot_dimension_numbers<[1], [0], [0], [1], [0, 0, 1, 1], [], []>} : vector<4x4xbf16>, vector<4x128xbf16>, vector<4x128xf32> -> vector<4x128xf32>
    %29 = arith.addf %19, %28 : vector<4x128xf32>
    %c1_i32 = arith.constant 1 : i32
    %30 = tpu.dynamic_rotate %0 by %c1_i32 dim 1 : vector<4x128xf32>, i32 -> vector<4x128xf32>
    %c3 = arith.constant 3 : index
    %c0_19 = arith.constant 0 : index
    %c0_20 = arith.constant 0 : index
    %31 = vector.load %arg21[%c3, %c0_19, %c0_20] : memref<9x1x128xf32, #tpu.memory_space<vmem>>, vector<1x1x128xf32>
    %32 = vector.shape_cast %31 : vector<1x1x128xf32> to vector<1x128xf32>
    %33 = vector.broadcast %32 : vector<1x128xf32> to vector<4x128xf32>
    %34 = arith.mulf %30, %33 : vector<4x128xf32>
    %35 = arith.truncf %34 : vector<4x128xf32> to vector<4x128xbf16>
    %c3_21 = arith.constant 3 : index
    %c0_22 = arith.constant 0 : index
    %c0_23 = arith.constant 0 : index
    %36 = vector.load %arg4[%c3_21, %c0_22, %c0_23] : memref<9x4x4xbf16, #tpu.memory_space<vmem>>, vector<1x4x4xbf16>
    %37 = vector.shape_cast %36 : vector<1x4x4xbf16> to vector<4x4xbf16>
    %cst_24 = arith.constant dense<0.000000e+00> : vector<4x128xf32>
    %38 = tpu.matmul %37, %35, %cst_24 {dimension_numbers = #tpu.dot_dimension_numbers<[1], [0], [0], [1], [0, 0, 1, 1], [], []>} : vector<4x4xbf16>, vector<4x128xbf16>, vector<4x128xf32> -> vector<4x128xf32>
    %39 = arith.addf %29, %38 : vector<4x128xf32>
    %c4 = arith.constant 4 : index
    %c0_25 = arith.constant 0 : index
    %c0_26 = arith.constant 0 : index
    %40 = vector.load %arg21[%c4, %c0_25, %c0_26] : memref<9x1x128xf32, #tpu.memory_space<vmem>>, vector<1x1x128xf32>
    %41 = vector.shape_cast %40 : vector<1x1x128xf32> to vector<1x128xf32>
    %42 = vector.broadcast %41 : vector<1x128xf32> to vector<4x128xf32>
    %43 = arith.mulf %0, %42 : vector<4x128xf32>
    %44 = arith.truncf %43 : vector<4x128xf32> to vector<4x128xbf16>
    %c4_27 = arith.constant 4 : index
    %c0_28 = arith.constant 0 : index
    %c0_29 = arith.constant 0 : index
    %45 = vector.load %arg4[%c4_27, %c0_28, %c0_29] : memref<9x4x4xbf16, #tpu.memory_space<vmem>>, vector<1x4x4xbf16>
    %46 = vector.shape_cast %45 : vector<1x4x4xbf16> to vector<4x4xbf16>
    %cst_30 = arith.constant dense<0.000000e+00> : vector<4x128xf32>
    %47 = tpu.matmul %46, %44, %cst_30 {dimension_numbers = #tpu.dot_dimension_numbers<[1], [0], [0], [1], [0, 0, 1, 1], [], []>} : vector<4x4xbf16>, vector<4x128xbf16>, vector<4x128xf32> -> vector<4x128xf32>
    %48 = arith.addf %39, %47 : vector<4x128xf32>
    %c127_i32 = arith.constant 127 : i32
    %49 = tpu.dynamic_rotate %0 by %c127_i32 dim 1 : vector<4x128xf32>, i32 -> vector<4x128xf32>
    %c5 = arith.constant 5 : index
    %c0_31 = arith.constant 0 : index
    %c0_32 = arith.constant 0 : index
    %50 = vector.load %arg21[%c5, %c0_31, %c0_32] : memref<9x1x128xf32, #tpu.memory_space<vmem>>, vector<1x1x128xf32>
    %51 = vector.shape_cast %50 : vector<1x1x128xf32> to vector<1x128xf32>
    %52 = vector.broadcast %51 : vector<1x128xf32> to vector<4x128xf32>
    %53 = arith.mulf %49, %52 : vector<4x128xf32>
    %54 = arith.truncf %53 : vector<4x128xf32> to vector<4x128xbf16>
    %c5_33 = arith.constant 5 : index
    %c0_34 = arith.constant 0 : index
    %c0_35 = arith.constant 0 : index
    %55 = vector.load %arg4[%c5_33, %c0_34, %c0_35] : memref<9x4x4xbf16, #tpu.memory_space<vmem>>, vector<1x4x4xbf16>
    %56 = vector.shape_cast %55 : vector<1x4x4xbf16> to vector<4x4xbf16>
    %cst_36 = arith.constant dense<0.000000e+00> : vector<4x128xf32>
    %57 = tpu.matmul %56, %54, %cst_36 {dimension_numbers = #tpu.dot_dimension_numbers<[1], [0], [0], [1], [0, 0, 1, 1], [], []>} : vector<4x4xbf16>, vector<4x128xbf16>, vector<4x128xf32> -> vector<4x128xf32>
    %58 = arith.addf %48, %57 : vector<4x128xf32>
    %c121_i32 = arith.constant 121 : i32
    %59 = tpu.dynamic_rotate %0 by %c121_i32 dim 1 : vector<4x128xf32>, i32 -> vector<4x128xf32>
    %c6 = arith.constant 6 : index
    %c0_37 = arith.constant 0 : index
    %c0_38 = arith.constant 0 : index
    %60 = vector.load %arg21[%c6, %c0_37, %c0_38] : memref<9x1x128xf32, #tpu.memory_space<vmem>>, vector<1x1x128xf32>
    %61 = vector.shape_cast %60 : vector<1x1x128xf32> to vector<1x128xf32>
    %62 = vector.broadcast %61 : vector<1x128xf32> to vector<4x128xf32>
    %63 = arith.mulf %59, %62 : vector<4x128xf32>
    %64 = arith.truncf %63 : vector<4x128xf32> to vector<4x128xbf16>
    %c6_39 = arith.constant 6 : index
    %c0_40 = arith.constant 0 : index
    %c0_41 = arith.constant 0 : index
    %65 = vector.load %arg4[%c6_39, %c0_40, %c0_41] : memref<9x4x4xbf16, #tpu.memory_space<vmem>>, vector<1x4x4xbf16>
    %66 = vector.shape_cast %65 : vector<1x4x4xbf16> to vector<4x4xbf16>
    %cst_42 = arith.constant dense<0.000000e+00> : vector<4x128xf32>
    %67 = tpu.matmul %66, %64, %cst_42 {dimension_numbers = #tpu.dot_dimension_numbers<[1], [0], [0], [1], [0, 0, 1, 1], [], []>} : vector<4x4xbf16>, vector<4x128xbf16>, vector<4x128xf32> -> vector<4x128xf32>
    %68 = arith.addf %58, %67 : vector<4x128xf32>
    %c120_i32 = arith.constant 120 : i32
    %69 = tpu.dynamic_rotate %0 by %c120_i32 dim 1 : vector<4x128xf32>, i32 -> vector<4x128xf32>
    %c7 = arith.constant 7 : index
    %c0_43 = arith.constant 0 : index
    %c0_44 = arith.constant 0 : index
    %70 = vector.load %arg21[%c7, %c0_43, %c0_44] : memref<9x1x128xf32, #tpu.memory_space<vmem>>, vector<1x1x128xf32>
    %71 = vector.shape_cast %70 : vector<1x1x128xf32> to vector<1x128xf32>
    %72 = vector.broadcast %71 : vector<1x128xf32> to vector<4x128xf32>
    %73 = arith.mulf %69, %72 : vector<4x128xf32>
    %74 = arith.truncf %73 : vector<4x128xf32> to vector<4x128xbf16>
    %c7_45 = arith.constant 7 : index
    %c0_46 = arith.constant 0 : index
    %c0_47 = arith.constant 0 : index
    %75 = vector.load %arg4[%c7_45, %c0_46, %c0_47] : memref<9x4x4xbf16, #tpu.memory_space<vmem>>, vector<1x4x4xbf16>
    %76 = vector.shape_cast %75 : vector<1x4x4xbf16> to vector<4x4xbf16>
    %cst_48 = arith.constant dense<0.000000e+00> : vector<4x128xf32>
    %77 = tpu.matmul %76, %74, %cst_48 {dimension_numbers = #tpu.dot_dimension_numbers<[1], [0], [0], [1], [0, 0, 1, 1], [], []>} : vector<4x4xbf16>, vector<4x128xbf16>, vector<4x128xf32> -> vector<4x128xf32>
    %78 = arith.addf %68, %77 : vector<4x128xf32>
    %c119_i32 = arith.constant 119 : i32
    %79 = tpu.dynamic_rotate %0 by %c119_i32 dim 1 : vector<4x128xf32>, i32 -> vector<4x128xf32>
    %c8 = arith.constant 8 : index
    %c0_49 = arith.constant 0 : index
    %c0_50 = arith.constant 0 : index
    %80 = vector.load %arg21[%c8, %c0_49, %c0_50] : memref<9x1x128xf32, #tpu.memory_space<vmem>>, vector<1x1x128xf32>
    %81 = vector.shape_cast %80 : vector<1x1x128xf32> to vector<1x128xf32>
    %82 = vector.broadcast %81 : vector<1x128xf32> to vector<4x128xf32>
    %83 = arith.mulf %79, %82 : vector<4x128xf32>
    %84 = arith.truncf %83 : vector<4x128xf32> to vector<4x128xbf16>
    %c8_51 = arith.constant 8 : index
    %c0_52 = arith.constant 0 : index
    %c0_53 = arith.constant 0 : index
    %85 = vector.load %arg4[%c8_51, %c0_52, %c0_53] : memref<9x4x4xbf16, #tpu.memory_space<vmem>>, vector<1x4x4xbf16>
    %86 = vector.shape_cast %85 : vector<1x4x4xbf16> to vector<4x4xbf16>
    %cst_54 = arith.constant dense<0.000000e+00> : vector<4x128xf32>
    %87 = tpu.matmul %86, %84, %cst_54 {dimension_numbers = #tpu.dot_dimension_numbers<[1], [0], [0], [1], [0, 0, 1, 1], [], []>} : vector<4x4xbf16>, vector<4x128xbf16>, vector<4x128xf32> -> vector<4x128xf32>
    %88 = arith.addf %78, %87 : vector<4x128xf32>
    %c0_55 = arith.constant 0 : index
    %c0_56 = arith.constant 0 : index
    %89 = vector.load %arg5[%c0_55, %c0_56] : memref<4x1xf32, #tpu.memory_space<vmem>>, vector<4x1xf32>
    %90 = vector.broadcast %89 : vector<4x1xf32> to vector<4x128xf32>
    %91 = arith.addf %88, %90 : vector<4x128xf32>
    %c0_57 = arith.constant 0 : index
    %c0_58 = arith.constant 0 : index
    %92 = vector.load %arg8[%c0_57, %c0_58] : memref<128x2xf32, #tpu.memory_space<vmem>>, vector<128x2xf32>
    %cst_59 = arith.constant dense<0.000000e+00> : vector<4x2xf32>
    %93 = tpu.matmul %91, %92, %cst_59 {dimension_numbers = #tpu.dot_dimension_numbers<[1], [0], [0], [1], [0, 0, 1, 1], [], []>} : vector<4x128xf32>, vector<128x2xf32>, vector<4x2xf32> -> vector<4x2xf32>
    %94 = arith.mulf %91, %91 : vector<4x128xf32>
    %c0_60 = arith.constant 0 : index
    %c0_61 = arith.constant 0 : index
    %95 = vector.load %arg8[%c0_60, %c0_61] : memref<128x2xf32, #tpu.memory_space<vmem>>, vector<128x2xf32>
    %cst_62 = arith.constant dense<0.000000e+00> : vector<4x2xf32>
    %96 = tpu.matmul %94, %95, %cst_62 {dimension_numbers = #tpu.dot_dimension_numbers<[1], [0], [0], [1], [0, 0, 1, 1], [], []>} : vector<4x128xf32>, vector<128x2xf32>, vector<4x2xf32> -> vector<4x2xf32>
    %c0_63 = arith.constant 0 : index
    %c0_64 = arith.constant 0 : index
    %97 = vector.load %arg9[%c0_63, %c0_64] : memref<4x4xf32, #tpu.memory_space<vmem>>, vector<4x4xf32>
    %cst_65 = arith.constant dense<0.000000e+00> : vector<4x2xf32>
    %98 = tpu.matmul %97, %93, %cst_65 {dimension_numbers = #tpu.dot_dimension_numbers<[1], [0], [0], [1], [0, 0, 1, 1], [], []>} : vector<4x4xf32>, vector<4x2xf32>, vector<4x2xf32> -> vector<4x2xf32>
    %c0_66 = arith.constant 0 : index
    %c0_67 = arith.constant 0 : index
    %99 = vector.load %arg9[%c0_66, %c0_67] : memref<4x4xf32, #tpu.memory_space<vmem>>, vector<4x4xf32>
    %cst_68 = arith.constant dense<0.000000e+00> : vector<4x2xf32>
    %100 = tpu.matmul %99, %96, %cst_68 {dimension_numbers = #tpu.dot_dimension_numbers<[1], [0], [0], [1], [0, 0, 1, 1], [], []>} : vector<4x4xf32>, vector<4x2xf32>, vector<4x2xf32> -> vector<4x2xf32>
    %101 = arith.mulf %98, %98 : vector<4x2xf32>
    %102 = arith.subf %100, %101 : vector<4x2xf32>
    %c0_69 = arith.constant 0 : index
    %c0_70 = arith.constant 0 : index
    %103 = vector.load %arg6[%c0_69, %c0_70] : memref<4x1xf32, #tpu.memory_space<vmem>>, vector<4x1xf32>
    %cst_71 = arith.constant 9.99999974E-6 : f32
    %104 = vector.broadcast %cst_71 : f32 to vector<4x2xf32>
    %105 = arith.addf %102, %104 : vector<4x2xf32>
    %106 = math.rsqrt %105 : vector<4x2xf32>
    %107 = vector.broadcast %103 : vector<4x1xf32> to vector<4x2xf32>
    %108 = arith.mulf %107, %106 : vector<4x2xf32>
    %c0_72 = arith.constant 0 : index
    %c0_73 = arith.constant 0 : index
    %109 = vector.load %arg7[%c0_72, %c0_73] : memref<4x1xf32, #tpu.memory_space<vmem>>, vector<4x1xf32>
    %110 = arith.mulf %98, %108 : vector<4x2xf32>
    %111 = vector.broadcast %109 : vector<4x1xf32> to vector<4x2xf32>
    %112 = arith.subf %111, %110 : vector<4x2xf32>
    %c0_74 = arith.constant 0 : index
    %c0_75 = arith.constant 0 : index
    %113 = vector.load %arg10[%c0_74, %c0_75] : memref<2x128xf32, #tpu.memory_space<vmem>>, vector<2x128xf32>
    %cst_76 = arith.constant dense<0.000000e+00> : vector<4x128xf32>
    %114 = tpu.matmul %108, %113, %cst_76 {dimension_numbers = #tpu.dot_dimension_numbers<[1], [0], [0], [1], [0, 0, 1, 1], [], []>} : vector<4x2xf32>, vector<2x128xf32>, vector<4x128xf32> -> vector<4x128xf32>
    %c0_77 = arith.constant 0 : index
    %c0_78 = arith.constant 0 : index
    %115 = vector.load %arg10[%c0_77, %c0_78] : memref<2x128xf32, #tpu.memory_space<vmem>>, vector<2x128xf32>
    %cst_79 = arith.constant dense<0.000000e+00> : vector<4x128xf32>
    %116 = tpu.matmul %112, %115, %cst_79 {dimension_numbers = #tpu.dot_dimension_numbers<[1], [0], [0], [1], [0, 0, 1, 1], [], []>} : vector<4x2xf32>, vector<2x128xf32>, vector<4x128xf32> -> vector<4x128xf32>
    %117 = arith.mulf %91, %114 : vector<4x128xf32>
    %118 = arith.addf %117, %116 : vector<4x128xf32>
    %cst_80 = arith.constant 0.000000e+00 : f32
    %119 = vector.broadcast %cst_80 : f32 to vector<4x128xf32>
    %120 = arith.maximumf %118, %119 : vector<4x128xf32>
    %121 = arith.truncf %120 : vector<4x128xf32> to vector<4x128xbf16>
    %c0_81 = arith.constant 0 : index
    %c0_82 = arith.constant 0 : index
    %122 = vector.load %arg11[%c0_81, %c0_82] : memref<128x512xbf16, #tpu.memory_space<vmem>>, vector<128x512xbf16>
    %cst_83 = arith.constant dense<0.000000e+00> : vector<4x512xf32>
    %123 = tpu.matmul %121, %122, %cst_83 {dimension_numbers = #tpu.dot_dimension_numbers<[1], [0], [0], [1], [0, 0, 1, 1], [], []>} : vector<4x128xbf16>, vector<128x512xbf16>, vector<4x512xf32> -> vector<4x512xf32>
    %c0_84 = arith.constant 0 : index
    %c0_85 = arith.constant 0 : index
    %124 = vector.load %arg2[%c0_84, %c0_85] : memref<4x128xf32, #tpu.memory_space<vmem>>, vector<4x128xf32>
    %125 = arith.truncf %124 : vector<4x128xf32> to vector<4x128xbf16>
    %c0_86 = arith.constant 0 : index
    %c0_87 = arith.constant 0 : index
    %126 = vector.load %arg12[%c0_86, %c0_87] : memref<128x512xbf16, #tpu.memory_space<vmem>>, vector<128x512xbf16>
    %cst_88 = arith.constant dense<0.000000e+00> : vector<4x512xf32>
    %127 = tpu.matmul %125, %126, %cst_88 {dimension_numbers = #tpu.dot_dimension_numbers<[1], [0], [0], [1], [0, 0, 1, 1], [], []>} : vector<4x128xbf16>, vector<128x512xbf16>, vector<4x512xf32> -> vector<4x512xf32>
    %c0_89 = arith.constant 0 : index
    %c0_90 = arith.constant 0 : index
    %128 = vector.load %arg1[%c0_89, %c0_90] : memref<4x512xf32, #tpu.memory_space<vmem>>, vector<4x512xf32>
    %129 = arith.subf %128, %123 : vector<4x512xf32>
    %c17_i32 = arith.constant 17 : i32
    %130 = tpu.dynamic_rotate %129 by %c17_i32 dim 1 : vector<4x512xf32>, i32 -> vector<4x512xf32>
    %c0_91 = arith.constant 0 : index
    %c0_92 = arith.constant 0 : index
    %c0_93 = arith.constant 0 : index
    %131 = vector.load %arg22[%c0_91, %c0_92, %c0_93] : memref<9x1x512xf32, #tpu.memory_space<vmem>>, vector<1x1x512xf32>
    %132 = vector.shape_cast %131 : vector<1x1x512xf32> to vector<1x512xf32>
    %133 = vector.broadcast %132 : vector<1x512xf32> to vector<4x512xf32>
    %134 = arith.mulf %130, %133 : vector<4x512xf32>
    %135 = arith.truncf %134 : vector<4x512xf32> to vector<4x512xbf16>
    %c0_94 = arith.constant 0 : index
    %c0_95 = arith.constant 0 : index
    %c0_96 = arith.constant 0 : index
    %136 = vector.load %arg13[%c0_94, %c0_95, %c0_96] : memref<9x4x4xbf16, #tpu.memory_space<vmem>>, vector<1x4x4xbf16>
    %137 = vector.shape_cast %136 : vector<1x4x4xbf16> to vector<4x4xbf16>
    %cst_97 = arith.constant dense<0.000000e+00> : vector<4x512xf32>
    %138 = tpu.matmul %137, %135, %cst_97 {dimension_numbers = #tpu.dot_dimension_numbers<[1], [0], [0], [1], [0, 0, 1, 1], [], []>} : vector<4x4xbf16>, vector<4x512xbf16>, vector<4x512xf32> -> vector<4x512xf32>
    %c16_i32 = arith.constant 16 : i32
    %139 = tpu.dynamic_rotate %129 by %c16_i32 dim 1 : vector<4x512xf32>, i32 -> vector<4x512xf32>
    %c1_98 = arith.constant 1 : index
    %c0_99 = arith.constant 0 : index
    %c0_100 = arith.constant 0 : index
    %140 = vector.load %arg22[%c1_98, %c0_99, %c0_100] : memref<9x1x512xf32, #tpu.memory_space<vmem>>, vector<1x1x512xf32>
    %141 = vector.shape_cast %140 : vector<1x1x512xf32> to vector<1x512xf32>
    %142 = vector.broadcast %141 : vector<1x512xf32> to vector<4x512xf32>
    %143 = arith.mulf %139, %142 : vector<4x512xf32>
    %144 = arith.truncf %143 : vector<4x512xf32> to vector<4x512xbf16>
    %c1_101 = arith.constant 1 : index
    %c0_102 = arith.constant 0 : index
    %c0_103 = arith.constant 0 : index
    %145 = vector.load %arg13[%c1_101, %c0_102, %c0_103] : memref<9x4x4xbf16, #tpu.memory_space<vmem>>, vector<1x4x4xbf16>
    %146 = vector.shape_cast %145 : vector<1x4x4xbf16> to vector<4x4xbf16>
    %cst_104 = arith.constant dense<0.000000e+00> : vector<4x512xf32>
    %147 = tpu.matmul %146, %144, %cst_104 {dimension_numbers = #tpu.dot_dimension_numbers<[1], [0], [0], [1], [0, 0, 1, 1], [], []>} : vector<4x4xbf16>, vector<4x512xbf16>, vector<4x512xf32> -> vector<4x512xf32>
    %148 = arith.addf %138, %147 : vector<4x512xf32>
    %c15_i32 = arith.constant 15 : i32
    %149 = tpu.dynamic_rotate %129 by %c15_i32 dim 1 : vector<4x512xf32>, i32 -> vector<4x512xf32>
    %c2_105 = arith.constant 2 : index
    %c0_106 = arith.constant 0 : index
    %c0_107 = arith.constant 0 : index
    %150 = vector.load %arg22[%c2_105, %c0_106, %c0_107] : memref<9x1x512xf32, #tpu.memory_space<vmem>>, vector<1x1x512xf32>
    %151 = vector.shape_cast %150 : vector<1x1x512xf32> to vector<1x512xf32>
    %152 = vector.broadcast %151 : vector<1x512xf32> to vector<4x512xf32>
    %153 = arith.mulf %149, %152 : vector<4x512xf32>
    %154 = arith.truncf %153 : vector<4x512xf32> to vector<4x512xbf16>
    %c2_108 = arith.constant 2 : index
    %c0_109 = arith.constant 0 : index
    %c0_110 = arith.constant 0 : index
    %155 = vector.load %arg13[%c2_108, %c0_109, %c0_110] : memref<9x4x4xbf16, #tpu.memory_space<vmem>>, vector<1x4x4xbf16>
    %156 = vector.shape_cast %155 : vector<1x4x4xbf16> to vector<4x4xbf16>
    %cst_111 = arith.constant dense<0.000000e+00> : vector<4x512xf32>
    %157 = tpu.matmul %156, %154, %cst_111 {dimension_numbers = #tpu.dot_dimension_numbers<[1], [0], [0], [1], [0, 0, 1, 1], [], []>} : vector<4x4xbf16>, vector<4x512xbf16>, vector<4x512xf32> -> vector<4x512xf32>
    %158 = arith.addf %148, %157 : vector<4x512xf32>
    %c1_i32_112 = arith.constant 1 : i32
    %159 = tpu.dynamic_rotate %129 by %c1_i32_112 dim 1 : vector<4x512xf32>, i32 -> vector<4x512xf32>
    %c3_113 = arith.constant 3 : index
    %c0_114 = arith.constant 0 : index
    %c0_115 = arith.constant 0 : index
    %160 = vector.load %arg22[%c3_113, %c0_114, %c0_115] : memref<9x1x512xf32, #tpu.memory_space<vmem>>, vector<1x1x512xf32>
    %161 = vector.shape_cast %160 : vector<1x1x512xf32> to vector<1x512xf32>
    %162 = vector.broadcast %161 : vector<1x512xf32> to vector<4x512xf32>
    %163 = arith.mulf %159, %162 : vector<4x512xf32>
    %164 = arith.truncf %163 : vector<4x512xf32> to vector<4x512xbf16>
    %c3_116 = arith.constant 3 : index
    %c0_117 = arith.constant 0 : index
    %c0_118 = arith.constant 0 : index
    %165 = vector.load %arg13[%c3_116, %c0_117, %c0_118] : memref<9x4x4xbf16, #tpu.memory_space<vmem>>, vector<1x4x4xbf16>
    %166 = vector.shape_cast %165 : vector<1x4x4xbf16> to vector<4x4xbf16>
    %cst_119 = arith.constant dense<0.000000e+00> : vector<4x512xf32>
    %167 = tpu.matmul %166, %164, %cst_119 {dimension_numbers = #tpu.dot_dimension_numbers<[1], [0], [0], [1], [0, 0, 1, 1], [], []>} : vector<4x4xbf16>, vector<4x512xbf16>, vector<4x512xf32> -> vector<4x512xf32>
    %168 = arith.addf %158, %167 : vector<4x512xf32>
    %c4_120 = arith.constant 4 : index
    %c0_121 = arith.constant 0 : index
    %c0_122 = arith.constant 0 : index
    %169 = vector.load %arg22[%c4_120, %c0_121, %c0_122] : memref<9x1x512xf32, #tpu.memory_space<vmem>>, vector<1x1x512xf32>
    %170 = vector.shape_cast %169 : vector<1x1x512xf32> to vector<1x512xf32>
    %171 = vector.broadcast %170 : vector<1x512xf32> to vector<4x512xf32>
    %172 = arith.mulf %129, %171 : vector<4x512xf32>
    %173 = arith.truncf %172 : vector<4x512xf32> to vector<4x512xbf16>
    %c4_123 = arith.constant 4 : index
    %c0_124 = arith.constant 0 : index
    %c0_125 = arith.constant 0 : index
    %174 = vector.load %arg13[%c4_123, %c0_124, %c0_125] : memref<9x4x4xbf16, #tpu.memory_space<vmem>>, vector<1x4x4xbf16>
    %175 = vector.shape_cast %174 : vector<1x4x4xbf16> to vector<4x4xbf16>
    %cst_126 = arith.constant dense<0.000000e+00> : vector<4x512xf32>
    %176 = tpu.matmul %175, %173, %cst_126 {dimension_numbers = #tpu.dot_dimension_numbers<[1], [0], [0], [1], [0, 0, 1, 1], [], []>} : vector<4x4xbf16>, vector<4x512xbf16>, vector<4x512xf32> -> vector<4x512xf32>
    %177 = arith.addf %168, %176 : vector<4x512xf32>
    %c511_i32 = arith.constant 511 : i32
    %178 = tpu.dynamic_rotate %129 by %c511_i32 dim 1 : vector<4x512xf32>, i32 -> vector<4x512xf32>
    %c5_127 = arith.constant 5 : index
    %c0_128 = arith.constant 0 : index
    %c0_129 = arith.constant 0 : index
    %179 = vector.load %arg22[%c5_127, %c0_128, %c0_129] : memref<9x1x512xf32, #tpu.memory_space<vmem>>, vector<1x1x512xf32>
    %180 = vector.shape_cast %179 : vector<1x1x512xf32> to vector<1x512xf32>
    %181 = vector.broadcast %180 : vector<1x512xf32> to vector<4x512xf32>
    %182 = arith.mulf %178, %181 : vector<4x512xf32>
    %183 = arith.truncf %182 : vector<4x512xf32> to vector<4x512xbf16>
    %c5_130 = arith.constant 5 : index
    %c0_131 = arith.constant 0 : index
    %c0_132 = arith.constant 0 : index
    %184 = vector.load %arg13[%c5_130, %c0_131, %c0_132] : memref<9x4x4xbf16, #tpu.memory_space<vmem>>, vector<1x4x4xbf16>
    %185 = vector.shape_cast %184 : vector<1x4x4xbf16> to vector<4x4xbf16>
    %cst_133 = arith.constant dense<0.000000e+00> : vector<4x512xf32>
    %186 = tpu.matmul %185, %183, %cst_133 {dimension_numbers = #tpu.dot_dimension_numbers<[1], [0], [0], [1], [0, 0, 1, 1], [], []>} : vector<4x4xbf16>, vector<4x512xbf16>, vector<4x512xf32> -> vector<4x512xf32>
    %187 = arith.addf %177, %186 : vector<4x512xf32>
    %c497_i32 = arith.constant 497 : i32
    %188 = tpu.dynamic_rotate %129 by %c497_i32 dim 1 : vector<4x512xf32>, i32 -> vector<4x512xf32>
    %c6_134 = arith.constant 6 : index
    %c0_135 = arith.constant 0 : index
    %c0_136 = arith.constant 0 : index
    %189 = vector.load %arg22[%c6_134, %c0_135, %c0_136] : memref<9x1x512xf32, #tpu.memory_space<vmem>>, vector<1x1x512xf32>
    %190 = vector.shape_cast %189 : vector<1x1x512xf32> to vector<1x512xf32>
    %191 = vector.broadcast %190 : vector<1x512xf32> to vector<4x512xf32>
    %192 = arith.mulf %188, %191 : vector<4x512xf32>
    %193 = arith.truncf %192 : vector<4x512xf32> to vector<4x512xbf16>
    %c6_137 = arith.constant 6 : index
    %c0_138 = arith.constant 0 : index
    %c0_139 = arith.constant 0 : index
    %194 = vector.load %arg13[%c6_137, %c0_138, %c0_139] : memref<9x4x4xbf16, #tpu.memory_space<vmem>>, vector<1x4x4xbf16>
    %195 = vector.shape_cast %194 : vector<1x4x4xbf16> to vector<4x4xbf16>
    %cst_140 = arith.constant dense<0.000000e+00> : vector<4x512xf32>
    %196 = tpu.matmul %195, %193, %cst_140 {dimension_numbers = #tpu.dot_dimension_numbers<[1], [0], [0], [1], [0, 0, 1, 1], [], []>} : vector<4x4xbf16>, vector<4x512xbf16>, vector<4x512xf32> -> vector<4x512xf32>
    %197 = arith.addf %187, %196 : vector<4x512xf32>
    %c496_i32 = arith.constant 496 : i32
    %198 = tpu.dynamic_rotate %129 by %c496_i32 dim 1 : vector<4x512xf32>, i32 -> vector<4x512xf32>
    %c7_141 = arith.constant 7 : index
    %c0_142 = arith.constant 0 : index
    %c0_143 = arith.constant 0 : index
    %199 = vector.load %arg22[%c7_141, %c0_142, %c0_143] : memref<9x1x512xf32, #tpu.memory_space<vmem>>, vector<1x1x512xf32>
    %200 = vector.shape_cast %199 : vector<1x1x512xf32> to vector<1x512xf32>
    %201 = vector.broadcast %200 : vector<1x512xf32> to vector<4x512xf32>
    %202 = arith.mulf %198, %201 : vector<4x512xf32>
    %203 = arith.truncf %202 : vector<4x512xf32> to vector<4x512xbf16>
    %c7_144 = arith.constant 7 : index
    %c0_145 = arith.constant 0 : index
    %c0_146 = arith.constant 0 : index
    %204 = vector.load %arg13[%c7_144, %c0_145, %c0_146] : memref<9x4x4xbf16, #tpu.memory_space<vmem>>, vector<1x4x4xbf16>
    %205 = vector.shape_cast %204 : vector<1x4x4xbf16> to vector<4x4xbf16>
    %cst_147 = arith.constant dense<0.000000e+00> : vector<4x512xf32>
    %206 = tpu.matmul %205, %203, %cst_147 {dimension_numbers = #tpu.dot_dimension_numbers<[1], [0], [0], [1], [0, 0, 1, 1], [], []>} : vector<4x4xbf16>, vector<4x512xbf16>, vector<4x512xf32> -> vector<4x512xf32>
    %207 = arith.addf %197, %206 : vector<4x512xf32>
    %c495_i32 = arith.constant 495 : i32
    %208 = tpu.dynamic_rotate %129 by %c495_i32 dim 1 : vector<4x512xf32>, i32 -> vector<4x512xf32>
    %c8_148 = arith.constant 8 : index
    %c0_149 = arith.constant 0 : index
    %c0_150 = arith.constant 0 : index
    %209 = vector.load %arg22[%c8_148, %c0_149, %c0_150] : memref<9x1x512xf32, #tpu.memory_space<vmem>>, vector<1x1x512xf32>
    %210 = vector.shape_cast %209 : vector<1x1x512xf32> to vector<1x512xf32>
    %211 = vector.broadcast %210 : vector<1x512xf32> to vector<4x512xf32>
    %212 = arith.mulf %208, %211 : vector<4x512xf32>
    %213 = arith.truncf %212 : vector<4x512xf32> to vector<4x512xbf16>
    %c8_151 = arith.constant 8 : index
    %c0_152 = arith.constant 0 : index
    %c0_153 = arith.constant 0 : index
    %214 = vector.load %arg13[%c8_151, %c0_152, %c0_153] : memref<9x4x4xbf16, #tpu.memory_space<vmem>>, vector<1x4x4xbf16>
    %215 = vector.shape_cast %214 : vector<1x4x4xbf16> to vector<4x4xbf16>
    %cst_154 = arith.constant dense<0.000000e+00> : vector<4x512xf32>
    %216 = tpu.matmul %215, %213, %cst_154 {dimension_numbers = #tpu.dot_dimension_numbers<[1], [0], [0], [1], [0, 0, 1, 1], [], []>} : vector<4x4xbf16>, vector<4x512xbf16>, vector<4x512xf32> -> vector<4x512xf32>
    %217 = arith.addf %207, %216 : vector<4x512xf32>
    %c0_155 = arith.constant 0 : index
    %c0_156 = arith.constant 0 : index
    %218 = vector.load %arg14[%c0_155, %c0_156] : memref<4x1xf32, #tpu.memory_space<vmem>>, vector<4x1xf32>
    %219 = vector.broadcast %218 : vector<4x1xf32> to vector<4x512xf32>
    %220 = arith.addf %217, %219 : vector<4x512xf32>
    %221 = arith.subf %127, %123 : vector<4x512xf32>
    %c17_i32_157 = arith.constant 17 : i32
    %222 = tpu.dynamic_rotate %221 by %c17_i32_157 dim 1 : vector<4x512xf32>, i32 -> vector<4x512xf32>
    %c0_158 = arith.constant 0 : index
    %c0_159 = arith.constant 0 : index
    %c0_160 = arith.constant 0 : index
    %223 = vector.load %arg22[%c0_158, %c0_159, %c0_160] : memref<9x1x512xf32, #tpu.memory_space<vmem>>, vector<1x1x512xf32>
    %224 = vector.shape_cast %223 : vector<1x1x512xf32> to vector<1x512xf32>
    %225 = vector.broadcast %224 : vector<1x512xf32> to vector<4x512xf32>
    %226 = arith.mulf %222, %225 : vector<4x512xf32>
    %227 = arith.truncf %226 : vector<4x512xf32> to vector<4x512xbf16>
    %c0_161 = arith.constant 0 : index
    %c0_162 = arith.constant 0 : index
    %c0_163 = arith.constant 0 : index
    %228 = vector.load %arg15[%c0_161, %c0_162, %c0_163] : memref<9x4x4xbf16, #tpu.memory_space<vmem>>, vector<1x4x4xbf16>
    %229 = vector.shape_cast %228 : vector<1x4x4xbf16> to vector<4x4xbf16>
    %cst_164 = arith.constant dense<0.000000e+00> : vector<4x512xf32>
    %230 = tpu.matmul %229, %227, %cst_164 {dimension_numbers = #tpu.dot_dimension_numbers<[1], [0], [0], [1], [0, 0, 1, 1], [], []>} : vector<4x4xbf16>, vector<4x512xbf16>, vector<4x512xf32> -> vector<4x512xf32>
    %c16_i32_165 = arith.constant 16 : i32
    %231 = tpu.dynamic_rotate %221 by %c16_i32_165 dim 1 : vector<4x512xf32>, i32 -> vector<4x512xf32>
    %c1_166 = arith.constant 1 : index
    %c0_167 = arith.constant 0 : index
    %c0_168 = arith.constant 0 : index
    %232 = vector.load %arg22[%c1_166, %c0_167, %c0_168] : memref<9x1x512xf32, #tpu.memory_space<vmem>>, vector<1x1x512xf32>
    %233 = vector.shape_cast %232 : vector<1x1x512xf32> to vector<1x512xf32>
    %234 = vector.broadcast %233 : vector<1x512xf32> to vector<4x512xf32>
    %235 = arith.mulf %231, %234 : vector<4x512xf32>
    %236 = arith.truncf %235 : vector<4x512xf32> to vector<4x512xbf16>
    %c1_169 = arith.constant 1 : index
    %c0_170 = arith.constant 0 : index
    %c0_171 = arith.constant 0 : index
    %237 = vector.load %arg15[%c1_169, %c0_170, %c0_171] : memref<9x4x4xbf16, #tpu.memory_space<vmem>>, vector<1x4x4xbf16>
    %238 = vector.shape_cast %237 : vector<1x4x4xbf16> to vector<4x4xbf16>
    %cst_172 = arith.constant dense<0.000000e+00> : vector<4x512xf32>
    %239 = tpu.matmul %238, %236, %cst_172 {dimension_numbers = #tpu.dot_dimension_numbers<[1], [0], [0], [1], [0, 0, 1, 1], [], []>} : vector<4x4xbf16>, vector<4x512xbf16>, vector<4x512xf32> -> vector<4x512xf32>
    %240 = arith.addf %230, %239 : vector<4x512xf32>
    %c15_i32_173 = arith.constant 15 : i32
    %241 = tpu.dynamic_rotate %221 by %c15_i32_173 dim 1 : vector<4x512xf32>, i32 -> vector<4x512xf32>
    %c2_174 = arith.constant 2 : index
    %c0_175 = arith.constant 0 : index
    %c0_176 = arith.constant 0 : index
    %242 = vector.load %arg22[%c2_174, %c0_175, %c0_176] : memref<9x1x512xf32, #tpu.memory_space<vmem>>, vector<1x1x512xf32>
    %243 = vector.shape_cast %242 : vector<1x1x512xf32> to vector<1x512xf32>
    %244 = vector.broadcast %243 : vector<1x512xf32> to vector<4x512xf32>
    %245 = arith.mulf %241, %244 : vector<4x512xf32>
    %246 = arith.truncf %245 : vector<4x512xf32> to vector<4x512xbf16>
    %c2_177 = arith.constant 2 : index
    %c0_178 = arith.constant 0 : index
    %c0_179 = arith.constant 0 : index
    %247 = vector.load %arg15[%c2_177, %c0_178, %c0_179] : memref<9x4x4xbf16, #tpu.memory_space<vmem>>, vector<1x4x4xbf16>
    %248 = vector.shape_cast %247 : vector<1x4x4xbf16> to vector<4x4xbf16>
    %cst_180 = arith.constant dense<0.000000e+00> : vector<4x512xf32>
    %249 = tpu.matmul %248, %246, %cst_180 {dimension_numbers = #tpu.dot_dimension_numbers<[1], [0], [0], [1], [0, 0, 1, 1], [], []>} : vector<4x4xbf16>, vector<4x512xbf16>, vector<4x512xf32> -> vector<4x512xf32>
    %250 = arith.addf %240, %249 : vector<4x512xf32>
    %c1_i32_181 = arith.constant 1 : i32
    %251 = tpu.dynamic_rotate %221 by %c1_i32_181 dim 1 : vector<4x512xf32>, i32 -> vector<4x512xf32>
    %c3_182 = arith.constant 3 : index
    %c0_183 = arith.constant 0 : index
    %c0_184 = arith.constant 0 : index
    %252 = vector.load %arg22[%c3_182, %c0_183, %c0_184] : memref<9x1x512xf32, #tpu.memory_space<vmem>>, vector<1x1x512xf32>
    %253 = vector.shape_cast %252 : vector<1x1x512xf32> to vector<1x512xf32>
    %254 = vector.broadcast %253 : vector<1x512xf32> to vector<4x512xf32>
    %255 = arith.mulf %251, %254 : vector<4x512xf32>
    %256 = arith.truncf %255 : vector<4x512xf32> to vector<4x512xbf16>
    %c3_185 = arith.constant 3 : index
    %c0_186 = arith.constant 0 : index
    %c0_187 = arith.constant 0 : index
    %257 = vector.load %arg15[%c3_185, %c0_186, %c0_187] : memref<9x4x4xbf16, #tpu.memory_space<vmem>>, vector<1x4x4xbf16>
    %258 = vector.shape_cast %257 : vector<1x4x4xbf16> to vector<4x4xbf16>
    %cst_188 = arith.constant dense<0.000000e+00> : vector<4x512xf32>
    %259 = tpu.matmul %258, %256, %cst_188 {dimension_numbers = #tpu.dot_dimension_numbers<[1], [0], [0], [1], [0, 0, 1, 1], [], []>} : vector<4x4xbf16>, vector<4x512xbf16>, vector<4x512xf32> -> vector<4x512xf32>
    %260 = arith.addf %250, %259 : vector<4x512xf32>
    %c4_189 = arith.constant 4 : index
    %c0_190 = arith.constant 0 : index
    %c0_191 = arith.constant 0 : index
    %261 = vector.load %arg22[%c4_189, %c0_190, %c0_191] : memref<9x1x512xf32, #tpu.memory_space<vmem>>, vector<1x1x512xf32>
    %262 = vector.shape_cast %261 : vector<1x1x512xf32> to vector<1x512xf32>
    %263 = vector.broadcast %262 : vector<1x512xf32> to vector<4x512xf32>
    %264 = arith.mulf %221, %263 : vector<4x512xf32>
    %265 = arith.truncf %264 : vector<4x512xf32> to vector<4x512xbf16>
    %c4_192 = arith.constant 4 : index
    %c0_193 = arith.constant 0 : index
    %c0_194 = arith.constant 0 : index
    %266 = vector.load %arg15[%c4_192, %c0_193, %c0_194] : memref<9x4x4xbf16, #tpu.memory_space<vmem>>, vector<1x4x4xbf16>
    %267 = vector.shape_cast %266 : vector<1x4x4xbf16> to vector<4x4xbf16>
    %cst_195 = arith.constant dense<0.000000e+00> : vector<4x512xf32>
    %268 = tpu.matmul %267, %265, %cst_195 {dimension_numbers = #tpu.dot_dimension_numbers<[1], [0], [0], [1], [0, 0, 1, 1], [], []>} : vector<4x4xbf16>, vector<4x512xbf16>, vector<4x512xf32> -> vector<4x512xf32>
    %269 = arith.addf %260, %268 : vector<4x512xf32>
    %c511_i32_196 = arith.constant 511 : i32
    %270 = tpu.dynamic_rotate %221 by %c511_i32_196 dim 1 : vector<4x512xf32>, i32 -> vector<4x512xf32>
    %c5_197 = arith.constant 5 : index
    %c0_198 = arith.constant 0 : index
    %c0_199 = arith.constant 0 : index
    %271 = vector.load %arg22[%c5_197, %c0_198, %c0_199] : memref<9x1x512xf32, #tpu.memory_space<vmem>>, vector<1x1x512xf32>
    %272 = vector.shape_cast %271 : vector<1x1x512xf32> to vector<1x512xf32>
    %273 = vector.broadcast %272 : vector<1x512xf32> to vector<4x512xf32>
    %274 = arith.mulf %270, %273 : vector<4x512xf32>
    %275 = arith.truncf %274 : vector<4x512xf32> to vector<4x512xbf16>
    %c5_200 = arith.constant 5 : index
    %c0_201 = arith.constant 0 : index
    %c0_202 = arith.constant 0 : index
    %276 = vector.load %arg15[%c5_200, %c0_201, %c0_202] : memref<9x4x4xbf16, #tpu.memory_space<vmem>>, vector<1x4x4xbf16>
    %277 = vector.shape_cast %276 : vector<1x4x4xbf16> to vector<4x4xbf16>
    %cst_203 = arith.constant dense<0.000000e+00> : vector<4x512xf32>
    %278 = tpu.matmul %277, %275, %cst_203 {dimension_numbers = #tpu.dot_dimension_numbers<[1], [0], [0], [1], [0, 0, 1, 1], [], []>} : vector<4x4xbf16>, vector<4x512xbf16>, vector<4x512xf32> -> vector<4x512xf32>
    %279 = arith.addf %269, %278 : vector<4x512xf32>
    %c497_i32_204 = arith.constant 497 : i32
    %280 = tpu.dynamic_rotate %221 by %c497_i32_204 dim 1 : vector<4x512xf32>, i32 -> vector<4x512xf32>
    %c6_205 = arith.constant 6 : index
    %c0_206 = arith.constant 0 : index
    %c0_207 = arith.constant 0 : index
    %281 = vector.load %arg22[%c6_205, %c0_206, %c0_207] : memref<9x1x512xf32, #tpu.memory_space<vmem>>, vector<1x1x512xf32>
    %282 = vector.shape_cast %281 : vector<1x1x512xf32> to vector<1x512xf32>
    %283 = vector.broadcast %282 : vector<1x512xf32> to vector<4x512xf32>
    %284 = arith.mulf %280, %283 : vector<4x512xf32>
    %285 = arith.truncf %284 : vector<4x512xf32> to vector<4x512xbf16>
    %c6_208 = arith.constant 6 : index
    %c0_209 = arith.constant 0 : index
    %c0_210 = arith.constant 0 : index
    %286 = vector.load %arg15[%c6_208, %c0_209, %c0_210] : memref<9x4x4xbf16, #tpu.memory_space<vmem>>, vector<1x4x4xbf16>
    %287 = vector.shape_cast %286 : vector<1x4x4xbf16> to vector<4x4xbf16>
    %cst_211 = arith.constant dense<0.000000e+00> : vector<4x512xf32>
    %288 = tpu.matmul %287, %285, %cst_211 {dimension_numbers = #tpu.dot_dimension_numbers<[1], [0], [0], [1], [0, 0, 1, 1], [], []>} : vector<4x4xbf16>, vector<4x512xbf16>, vector<4x512xf32> -> vector<4x512xf32>
    %289 = arith.addf %279, %288 : vector<4x512xf32>
    %c496_i32_212 = arith.constant 496 : i32
    %290 = tpu.dynamic_rotate %221 by %c496_i32_212 dim 1 : vector<4x512xf32>, i32 -> vector<4x512xf32>
    %c7_213 = arith.constant 7 : index
    %c0_214 = arith.constant 0 : index
    %c0_215 = arith.constant 0 : index
    %291 = vector.load %arg22[%c7_213, %c0_214, %c0_215] : memref<9x1x512xf32, #tpu.memory_space<vmem>>, vector<1x1x512xf32>
    %292 = vector.shape_cast %291 : vector<1x1x512xf32> to vector<1x512xf32>
    %293 = vector.broadcast %292 : vector<1x512xf32> to vector<4x512xf32>
    %294 = arith.mulf %290, %293 : vector<4x512xf32>
    %295 = arith.truncf %294 : vector<4x512xf32> to vector<4x512xbf16>
    %c7_216 = arith.constant 7 : index
    %c0_217 = arith.constant 0 : index
    %c0_218 = arith.constant 0 : index
    %296 = vector.load %arg15[%c7_216, %c0_217, %c0_218] : memref<9x4x4xbf16, #tpu.memory_space<vmem>>, vector<1x4x4xbf16>
    %297 = vector.shape_cast %296 : vector<1x4x4xbf16> to vector<4x4xbf16>
    %cst_219 = arith.constant dense<0.000000e+00> : vector<4x512xf32>
    %298 = tpu.matmul %297, %295, %cst_219 {dimension_numbers = #tpu.dot_dimension_numbers<[1], [0], [0], [1], [0, 0, 1, 1], [], []>} : vector<4x4xbf16>, vector<4x512xbf16>, vector<4x512xf32> -> vector<4x512xf32>
    %299 = arith.addf %289, %298 : vector<4x512xf32>
    %c495_i32_220 = arith.constant 495 : i32
    %300 = tpu.dynamic_rotate %221 by %c495_i32_220 dim 1 : vector<4x512xf32>, i32 -> vector<4x512xf32>
    %c8_221 = arith.constant 8 : index
    %c0_222 = arith.constant 0 : index
    %c0_223 = arith.constant 0 : index
    %301 = vector.load %arg22[%c8_221, %c0_222, %c0_223] : memref<9x1x512xf32, #tpu.memory_space<vmem>>, vector<1x1x512xf32>
    %302 = vector.shape_cast %301 : vector<1x1x512xf32> to vector<1x512xf32>
    %303 = vector.broadcast %302 : vector<1x512xf32> to vector<4x512xf32>
    %304 = arith.mulf %300, %303 : vector<4x512xf32>
    %305 = arith.truncf %304 : vector<4x512xf32> to vector<4x512xbf16>
    %c8_224 = arith.constant 8 : index
    %c0_225 = arith.constant 0 : index
    %c0_226 = arith.constant 0 : index
    %306 = vector.load %arg15[%c8_224, %c0_225, %c0_226] : memref<9x4x4xbf16, #tpu.memory_space<vmem>>, vector<1x4x4xbf16>
    %307 = vector.shape_cast %306 : vector<1x4x4xbf16> to vector<4x4xbf16>
    %cst_227 = arith.constant dense<0.000000e+00> : vector<4x512xf32>
    %308 = tpu.matmul %307, %305, %cst_227 {dimension_numbers = #tpu.dot_dimension_numbers<[1], [0], [0], [1], [0, 0, 1, 1], [], []>} : vector<4x4xbf16>, vector<4x512xbf16>, vector<4x512xf32> -> vector<4x512xf32>
    %309 = arith.addf %299, %308 : vector<4x512xf32>
    %c0_228 = arith.constant 0 : index
    %c0_229 = arith.constant 0 : index
    %310 = vector.load %arg16[%c0_228, %c0_229] : memref<4x1xf32, #tpu.memory_space<vmem>>, vector<4x1xf32>
    %311 = vector.broadcast %310 : vector<4x1xf32> to vector<4x512xf32>
    %312 = arith.addf %309, %311 : vector<4x512xf32>
    %cst_230 = arith.constant 0.000000e+00 : f32
    %313 = vector.broadcast %cst_230 : f32 to vector<4x512xf32>
    %314 = arith.subf %313, %220 : vector<4x512xf32>
    %315 = math.exp %314 : vector<4x512xf32>
    %cst_231 = arith.constant 1.000000e+00 : f32
    %316 = vector.broadcast %cst_231 : f32 to vector<4x512xf32>
    %317 = arith.addf %316, %315 : vector<4x512xf32>
    %318 = tpu.reciprocal %317 {approx = true} : vector<4x512xf32> -> vector<4x512xf32>
    %cst_232 = arith.constant 0.000000e+00 : f32
    %319 = vector.broadcast %cst_232 : f32 to vector<4x512xf32>
    %320 = arith.subf %319, %312 : vector<4x512xf32>
    %321 = math.exp %320 : vector<4x512xf32>
    %cst_233 = arith.constant 1.000000e+00 : f32
    %322 = vector.broadcast %cst_233 : f32 to vector<4x512xf32>
    %323 = arith.addf %322, %321 : vector<4x512xf32>
    %324 = tpu.reciprocal %323 {approx = true} : vector<4x512xf32> -> vector<4x512xf32>
    %325 = arith.mulf %128, %318 : vector<4x512xf32>
    %c17_i32_234 = arith.constant 17 : i32
    %326 = tpu.dynamic_rotate %325 by %c17_i32_234 dim 1 : vector<4x512xf32>, i32 -> vector<4x512xf32>
    %c0_235 = arith.constant 0 : index
    %c0_236 = arith.constant 0 : index
    %c0_237 = arith.constant 0 : index
    %327 = vector.load %arg22[%c0_235, %c0_236, %c0_237] : memref<9x1x512xf32, #tpu.memory_space<vmem>>, vector<1x1x512xf32>
    %328 = vector.shape_cast %327 : vector<1x1x512xf32> to vector<1x512xf32>
    %329 = vector.broadcast %328 : vector<1x512xf32> to vector<4x512xf32>
    %330 = arith.mulf %326, %329 : vector<4x512xf32>
    %331 = arith.truncf %330 : vector<4x512xf32> to vector<4x512xbf16>
    %c0_238 = arith.constant 0 : index
    %c0_239 = arith.constant 0 : index
    %c0_240 = arith.constant 0 : index
    %332 = vector.load %arg17[%c0_238, %c0_239, %c0_240] : memref<9x4x4xbf16, #tpu.memory_space<vmem>>, vector<1x4x4xbf16>
    %333 = vector.shape_cast %332 : vector<1x4x4xbf16> to vector<4x4xbf16>
    %cst_241 = arith.constant dense<0.000000e+00> : vector<4x512xf32>
    %334 = tpu.matmul %333, %331, %cst_241 {dimension_numbers = #tpu.dot_dimension_numbers<[1], [0], [0], [1], [0, 0, 1, 1], [], []>} : vector<4x4xbf16>, vector<4x512xbf16>, vector<4x512xf32> -> vector<4x512xf32>
    %c16_i32_242 = arith.constant 16 : i32
    %335 = tpu.dynamic_rotate %325 by %c16_i32_242 dim 1 : vector<4x512xf32>, i32 -> vector<4x512xf32>
    %c1_243 = arith.constant 1 : index
    %c0_244 = arith.constant 0 : index
    %c0_245 = arith.constant 0 : index
    %336 = vector.load %arg22[%c1_243, %c0_244, %c0_245] : memref<9x1x512xf32, #tpu.memory_space<vmem>>, vector<1x1x512xf32>
    %337 = vector.shape_cast %336 : vector<1x1x512xf32> to vector<1x512xf32>
    %338 = vector.broadcast %337 : vector<1x512xf32> to vector<4x512xf32>
    %339 = arith.mulf %335, %338 : vector<4x512xf32>
    %340 = arith.truncf %339 : vector<4x512xf32> to vector<4x512xbf16>
    %c1_246 = arith.constant 1 : index
    %c0_247 = arith.constant 0 : index
    %c0_248 = arith.constant 0 : index
    %341 = vector.load %arg17[%c1_246, %c0_247, %c0_248] : memref<9x4x4xbf16, #tpu.memory_space<vmem>>, vector<1x4x4xbf16>
    %342 = vector.shape_cast %341 : vector<1x4x4xbf16> to vector<4x4xbf16>
    %cst_249 = arith.constant dense<0.000000e+00> : vector<4x512xf32>
    %343 = tpu.matmul %342, %340, %cst_249 {dimension_numbers = #tpu.dot_dimension_numbers<[1], [0], [0], [1], [0, 0, 1, 1], [], []>} : vector<4x4xbf16>, vector<4x512xbf16>, vector<4x512xf32> -> vector<4x512xf32>
    %344 = arith.addf %334, %343 : vector<4x512xf32>
    %c15_i32_250 = arith.constant 15 : i32
    %345 = tpu.dynamic_rotate %325 by %c15_i32_250 dim 1 : vector<4x512xf32>, i32 -> vector<4x512xf32>
    %c2_251 = arith.constant 2 : index
    %c0_252 = arith.constant 0 : index
    %c0_253 = arith.constant 0 : index
    %346 = vector.load %arg22[%c2_251, %c0_252, %c0_253] : memref<9x1x512xf32, #tpu.memory_space<vmem>>, vector<1x1x512xf32>
    %347 = vector.shape_cast %346 : vector<1x1x512xf32> to vector<1x512xf32>
    %348 = vector.broadcast %347 : vector<1x512xf32> to vector<4x512xf32>
    %349 = arith.mulf %345, %348 : vector<4x512xf32>
    %350 = arith.truncf %349 : vector<4x512xf32> to vector<4x512xbf16>
    %c2_254 = arith.constant 2 : index
    %c0_255 = arith.constant 0 : index
    %c0_256 = arith.constant 0 : index
    %351 = vector.load %arg17[%c2_254, %c0_255, %c0_256] : memref<9x4x4xbf16, #tpu.memory_space<vmem>>, vector<1x4x4xbf16>
    %352 = vector.shape_cast %351 : vector<1x4x4xbf16> to vector<4x4xbf16>
    %cst_257 = arith.constant dense<0.000000e+00> : vector<4x512xf32>
    %353 = tpu.matmul %352, %350, %cst_257 {dimension_numbers = #tpu.dot_dimension_numbers<[1], [0], [0], [1], [0, 0, 1, 1], [], []>} : vector<4x4xbf16>, vector<4x512xbf16>, vector<4x512xf32> -> vector<4x512xf32>
    %354 = arith.addf %344, %353 : vector<4x512xf32>
    %c1_i32_258 = arith.constant 1 : i32
    %355 = tpu.dynamic_rotate %325 by %c1_i32_258 dim 1 : vector<4x512xf32>, i32 -> vector<4x512xf32>
    %c3_259 = arith.constant 3 : index
    %c0_260 = arith.constant 0 : index
    %c0_261 = arith.constant 0 : index
    %356 = vector.load %arg22[%c3_259, %c0_260, %c0_261] : memref<9x1x512xf32, #tpu.memory_space<vmem>>, vector<1x1x512xf32>
    %357 = vector.shape_cast %356 : vector<1x1x512xf32> to vector<1x512xf32>
    %358 = vector.broadcast %357 : vector<1x512xf32> to vector<4x512xf32>
    %359 = arith.mulf %355, %358 : vector<4x512xf32>
    %360 = arith.truncf %359 : vector<4x512xf32> to vector<4x512xbf16>
    %c3_262 = arith.constant 3 : index
    %c0_263 = arith.constant 0 : index
    %c0_264 = arith.constant 0 : index
    %361 = vector.load %arg17[%c3_262, %c0_263, %c0_264] : memref<9x4x4xbf16, #tpu.memory_space<vmem>>, vector<1x4x4xbf16>
    %362 = vector.shape_cast %361 : vector<1x4x4xbf16> to vector<4x4xbf16>
    %cst_265 = arith.constant dense<0.000000e+00> : vector<4x512xf32>
    %363 = tpu.matmul %362, %360, %cst_265 {dimension_numbers = #tpu.dot_dimension_numbers<[1], [0], [0], [1], [0, 0, 1, 1], [], []>} : vector<4x4xbf16>, vector<4x512xbf16>, vector<4x512xf32> -> vector<4x512xf32>
    %364 = arith.addf %354, %363 : vector<4x512xf32>
    %c4_266 = arith.constant 4 : index
    %c0_267 = arith.constant 0 : index
    %c0_268 = arith.constant 0 : index
    %365 = vector.load %arg22[%c4_266, %c0_267, %c0_268] : memref<9x1x512xf32, #tpu.memory_space<vmem>>, vector<1x1x512xf32>
    %366 = vector.shape_cast %365 : vector<1x1x512xf32> to vector<1x512xf32>
    %367 = vector.broadcast %366 : vector<1x512xf32> to vector<4x512xf32>
    %368 = arith.mulf %325, %367 : vector<4x512xf32>
    %369 = arith.truncf %368 : vector<4x512xf32> to vector<4x512xbf16>
    %c4_269 = arith.constant 4 : index
    %c0_270 = arith.constant 0 : index
    %c0_271 = arith.constant 0 : index
    %370 = vector.load %arg17[%c4_269, %c0_270, %c0_271] : memref<9x4x4xbf16, #tpu.memory_space<vmem>>, vector<1x4x4xbf16>
    %371 = vector.shape_cast %370 : vector<1x4x4xbf16> to vector<4x4xbf16>
    %cst_272 = arith.constant dense<0.000000e+00> : vector<4x512xf32>
    %372 = tpu.matmul %371, %369, %cst_272 {dimension_numbers = #tpu.dot_dimension_numbers<[1], [0], [0], [1], [0, 0, 1, 1], [], []>} : vector<4x4xbf16>, vector<4x512xbf16>, vector<4x512xf32> -> vector<4x512xf32>
    %373 = arith.addf %364, %372 : vector<4x512xf32>
    %c511_i32_273 = arith.constant 511 : i32
    %374 = tpu.dynamic_rotate %325 by %c511_i32_273 dim 1 : vector<4x512xf32>, i32 -> vector<4x512xf32>
    %c5_274 = arith.constant 5 : index
    %c0_275 = arith.constant 0 : index
    %c0_276 = arith.constant 0 : index
    %375 = vector.load %arg22[%c5_274, %c0_275, %c0_276] : memref<9x1x512xf32, #tpu.memory_space<vmem>>, vector<1x1x512xf32>
    %376 = vector.shape_cast %375 : vector<1x1x512xf32> to vector<1x512xf32>
    %377 = vector.broadcast %376 : vector<1x512xf32> to vector<4x512xf32>
    %378 = arith.mulf %374, %377 : vector<4x512xf32>
    %379 = arith.truncf %378 : vector<4x512xf32> to vector<4x512xbf16>
    %c5_277 = arith.constant 5 : index
    %c0_278 = arith.constant 0 : index
    %c0_279 = arith.constant 0 : index
    %380 = vector.load %arg17[%c5_277, %c0_278, %c0_279] : memref<9x4x4xbf16, #tpu.memory_space<vmem>>, vector<1x4x4xbf16>
    %381 = vector.shape_cast %380 : vector<1x4x4xbf16> to vector<4x4xbf16>
    %cst_280 = arith.constant dense<0.000000e+00> : vector<4x512xf32>
    %382 = tpu.matmul %381, %379, %cst_280 {dimension_numbers = #tpu.dot_dimension_numbers<[1], [0], [0], [1], [0, 0, 1, 1], [], []>} : vector<4x4xbf16>, vector<4x512xbf16>, vector<4x512xf32> -> vector<4x512xf32>
    %383 = arith.addf %373, %382 : vector<4x512xf32>
    %c497_i32_281 = arith.constant 497 : i32
    %384 = tpu.dynamic_rotate %325 by %c497_i32_281 dim 1 : vector<4x512xf32>, i32 -> vector<4x512xf32>
    %c6_282 = arith.constant 6 : index
    %c0_283 = arith.constant 0 : index
    %c0_284 = arith.constant 0 : index
    %385 = vector.load %arg22[%c6_282, %c0_283, %c0_284] : memref<9x1x512xf32, #tpu.memory_space<vmem>>, vector<1x1x512xf32>
    %386 = vector.shape_cast %385 : vector<1x1x512xf32> to vector<1x512xf32>
    %387 = vector.broadcast %386 : vector<1x512xf32> to vector<4x512xf32>
    %388 = arith.mulf %384, %387 : vector<4x512xf32>
    %389 = arith.truncf %388 : vector<4x512xf32> to vector<4x512xbf16>
    %c6_285 = arith.constant 6 : index
    %c0_286 = arith.constant 0 : index
    %c0_287 = arith.constant 0 : index
    %390 = vector.load %arg17[%c6_285, %c0_286, %c0_287] : memref<9x4x4xbf16, #tpu.memory_space<vmem>>, vector<1x4x4xbf16>
    %391 = vector.shape_cast %390 : vector<1x4x4xbf16> to vector<4x4xbf16>
    %cst_288 = arith.constant dense<0.000000e+00> : vector<4x512xf32>
    %392 = tpu.matmul %391, %389, %cst_288 {dimension_numbers = #tpu.dot_dimension_numbers<[1], [0], [0], [1], [0, 0, 1, 1], [], []>} : vector<4x4xbf16>, vector<4x512xbf16>, vector<4x512xf32> -> vector<4x512xf32>
    %393 = arith.addf %383, %392 : vector<4x512xf32>
    %c496_i32_289 = arith.constant 496 : i32
    %394 = tpu.dynamic_rotate %325 by %c496_i32_289 dim 1 : vector<4x512xf32>, i32 -> vector<4x512xf32>
    %c7_290 = arith.constant 7 : index
    %c0_291 = arith.constant 0 : index
    %c0_292 = arith.constant 0 : index
    %395 = vector.load %arg22[%c7_290, %c0_291, %c0_292] : memref<9x1x512xf32, #tpu.memory_space<vmem>>, vector<1x1x512xf32>
    %396 = vector.shape_cast %395 : vector<1x1x512xf32> to vector<1x512xf32>
    %397 = vector.broadcast %396 : vector<1x512xf32> to vector<4x512xf32>
    %398 = arith.mulf %394, %397 : vector<4x512xf32>
    %399 = arith.truncf %398 : vector<4x512xf32> to vector<4x512xbf16>
    %c7_293 = arith.constant 7 : index
    %c0_294 = arith.constant 0 : index
    %c0_295 = arith.constant 0 : index
    %400 = vector.load %arg17[%c7_293, %c0_294, %c0_295] : memref<9x4x4xbf16, #tpu.memory_space<vmem>>, vector<1x4x4xbf16>
    %401 = vector.shape_cast %400 : vector<1x4x4xbf16> to vector<4x4xbf16>
    %cst_296 = arith.constant dense<0.000000e+00> : vector<4x512xf32>
    %402 = tpu.matmul %401, %399, %cst_296 {dimension_numbers = #tpu.dot_dimension_numbers<[1], [0], [0], [1], [0, 0, 1, 1], [], []>} : vector<4x4xbf16>, vector<4x512xbf16>, vector<4x512xf32> -> vector<4x512xf32>
    %403 = arith.addf %393, %402 : vector<4x512xf32>
    %c495_i32_297 = arith.constant 495 : i32
    %404 = tpu.dynamic_rotate %325 by %c495_i32_297 dim 1 : vector<4x512xf32>, i32 -> vector<4x512xf32>
    %c8_298 = arith.constant 8 : index
    %c0_299 = arith.constant 0 : index
    %c0_300 = arith.constant 0 : index
    %405 = vector.load %arg22[%c8_298, %c0_299, %c0_300] : memref<9x1x512xf32, #tpu.memory_space<vmem>>, vector<1x1x512xf32>
    %406 = vector.shape_cast %405 : vector<1x1x512xf32> to vector<1x512xf32>
    %407 = vector.broadcast %406 : vector<1x512xf32> to vector<4x512xf32>
    %408 = arith.mulf %404, %407 : vector<4x512xf32>
    %409 = arith.truncf %408 : vector<4x512xf32> to vector<4x512xbf16>
    %c8_301 = arith.constant 8 : index
    %c0_302 = arith.constant 0 : index
    %c0_303 = arith.constant 0 : index
    %410 = vector.load %arg17[%c8_301, %c0_302, %c0_303] : memref<9x4x4xbf16, #tpu.memory_space<vmem>>, vector<1x4x4xbf16>
    %411 = vector.shape_cast %410 : vector<1x4x4xbf16> to vector<4x4xbf16>
    %cst_304 = arith.constant dense<0.000000e+00> : vector<4x512xf32>
    %412 = tpu.matmul %411, %409, %cst_304 {dimension_numbers = #tpu.dot_dimension_numbers<[1], [0], [0], [1], [0, 0, 1, 1], [], []>} : vector<4x4xbf16>, vector<4x512xbf16>, vector<4x512xf32> -> vector<4x512xf32>
    %413 = arith.addf %403, %412 : vector<4x512xf32>
    %414 = arith.mulf %127, %324 : vector<4x512xf32>
    %c17_i32_305 = arith.constant 17 : i32
    %415 = tpu.dynamic_rotate %414 by %c17_i32_305 dim 1 : vector<4x512xf32>, i32 -> vector<4x512xf32>
    %c0_306 = arith.constant 0 : index
    %c0_307 = arith.constant 0 : index
    %c0_308 = arith.constant 0 : index
    %416 = vector.load %arg22[%c0_306, %c0_307, %c0_308] : memref<9x1x512xf32, #tpu.memory_space<vmem>>, vector<1x1x512xf32>
    %417 = vector.shape_cast %416 : vector<1x1x512xf32> to vector<1x512xf32>
    %418 = vector.broadcast %417 : vector<1x512xf32> to vector<4x512xf32>
    %419 = arith.mulf %415, %418 : vector<4x512xf32>
    %420 = arith.truncf %419 : vector<4x512xf32> to vector<4x512xbf16>
    %c0_309 = arith.constant 0 : index
    %c0_310 = arith.constant 0 : index
    %c0_311 = arith.constant 0 : index
    %421 = vector.load %arg18[%c0_309, %c0_310, %c0_311] : memref<9x4x4xbf16, #tpu.memory_space<vmem>>, vector<1x4x4xbf16>
    %422 = vector.shape_cast %421 : vector<1x4x4xbf16> to vector<4x4xbf16>
    %cst_312 = arith.constant dense<0.000000e+00> : vector<4x512xf32>
    %423 = tpu.matmul %422, %420, %cst_312 {dimension_numbers = #tpu.dot_dimension_numbers<[1], [0], [0], [1], [0, 0, 1, 1], [], []>} : vector<4x4xbf16>, vector<4x512xbf16>, vector<4x512xf32> -> vector<4x512xf32>
    %c16_i32_313 = arith.constant 16 : i32
    %424 = tpu.dynamic_rotate %414 by %c16_i32_313 dim 1 : vector<4x512xf32>, i32 -> vector<4x512xf32>
    %c1_314 = arith.constant 1 : index
    %c0_315 = arith.constant 0 : index
    %c0_316 = arith.constant 0 : index
    %425 = vector.load %arg22[%c1_314, %c0_315, %c0_316] : memref<9x1x512xf32, #tpu.memory_space<vmem>>, vector<1x1x512xf32>
    %426 = vector.shape_cast %425 : vector<1x1x512xf32> to vector<1x512xf32>
    %427 = vector.broadcast %426 : vector<1x512xf32> to vector<4x512xf32>
    %428 = arith.mulf %424, %427 : vector<4x512xf32>
    %429 = arith.truncf %428 : vector<4x512xf32> to vector<4x512xbf16>
    %c1_317 = arith.constant 1 : index
    %c0_318 = arith.constant 0 : index
    %c0_319 = arith.constant 0 : index
    %430 = vector.load %arg18[%c1_317, %c0_318, %c0_319] : memref<9x4x4xbf16, #tpu.memory_space<vmem>>, vector<1x4x4xbf16>
    %431 = vector.shape_cast %430 : vector<1x4x4xbf16> to vector<4x4xbf16>
    %cst_320 = arith.constant dense<0.000000e+00> : vector<4x512xf32>
    %432 = tpu.matmul %431, %429, %cst_320 {dimension_numbers = #tpu.dot_dimension_numbers<[1], [0], [0], [1], [0, 0, 1, 1], [], []>} : vector<4x4xbf16>, vector<4x512xbf16>, vector<4x512xf32> -> vector<4x512xf32>
    %433 = arith.addf %423, %432 : vector<4x512xf32>
    %c15_i32_321 = arith.constant 15 : i32
    %434 = tpu.dynamic_rotate %414 by %c15_i32_321 dim 1 : vector<4x512xf32>, i32 -> vector<4x512xf32>
    %c2_322 = arith.constant 2 : index
    %c0_323 = arith.constant 0 : index
    %c0_324 = arith.constant 0 : index
    %435 = vector.load %arg22[%c2_322, %c0_323, %c0_324] : memref<9x1x512xf32, #tpu.memory_space<vmem>>, vector<1x1x512xf32>
    %436 = vector.shape_cast %435 : vector<1x1x512xf32> to vector<1x512xf32>
    %437 = vector.broadcast %436 : vector<1x512xf32> to vector<4x512xf32>
    %438 = arith.mulf %434, %437 : vector<4x512xf32>
    %439 = arith.truncf %438 : vector<4x512xf32> to vector<4x512xbf16>
    %c2_325 = arith.constant 2 : index
    %c0_326 = arith.constant 0 : index
    %c0_327 = arith.constant 0 : index
    %440 = vector.load %arg18[%c2_325, %c0_326, %c0_327] : memref<9x4x4xbf16, #tpu.memory_space<vmem>>, vector<1x4x4xbf16>
    %441 = vector.shape_cast %440 : vector<1x4x4xbf16> to vector<4x4xbf16>
    %cst_328 = arith.constant dense<0.000000e+00> : vector<4x512xf32>
    %442 = tpu.matmul %441, %439, %cst_328 {dimension_numbers = #tpu.dot_dimension_numbers<[1], [0], [0], [1], [0, 0, 1, 1], [], []>} : vector<4x4xbf16>, vector<4x512xbf16>, vector<4x512xf32> -> vector<4x512xf32>
    %443 = arith.addf %433, %442 : vector<4x512xf32>
    %c1_i32_329 = arith.constant 1 : i32
    %444 = tpu.dynamic_rotate %414 by %c1_i32_329 dim 1 : vector<4x512xf32>, i32 -> vector<4x512xf32>
    %c3_330 = arith.constant 3 : index
    %c0_331 = arith.constant 0 : index
    %c0_332 = arith.constant 0 : index
    %445 = vector.load %arg22[%c3_330, %c0_331, %c0_332] : memref<9x1x512xf32, #tpu.memory_space<vmem>>, vector<1x1x512xf32>
    %446 = vector.shape_cast %445 : vector<1x1x512xf32> to vector<1x512xf32>
    %447 = vector.broadcast %446 : vector<1x512xf32> to vector<4x512xf32>
    %448 = arith.mulf %444, %447 : vector<4x512xf32>
    %449 = arith.truncf %448 : vector<4x512xf32> to vector<4x512xbf16>
    %c3_333 = arith.constant 3 : index
    %c0_334 = arith.constant 0 : index
    %c0_335 = arith.constant 0 : index
    %450 = vector.load %arg18[%c3_333, %c0_334, %c0_335] : memref<9x4x4xbf16, #tpu.memory_space<vmem>>, vector<1x4x4xbf16>
    %451 = vector.shape_cast %450 : vector<1x4x4xbf16> to vector<4x4xbf16>
    %cst_336 = arith.constant dense<0.000000e+00> : vector<4x512xf32>
    %452 = tpu.matmul %451, %449, %cst_336 {dimension_numbers = #tpu.dot_dimension_numbers<[1], [0], [0], [1], [0, 0, 1, 1], [], []>} : vector<4x4xbf16>, vector<4x512xbf16>, vector<4x512xf32> -> vector<4x512xf32>
    %453 = arith.addf %443, %452 : vector<4x512xf32>
    %c4_337 = arith.constant 4 : index
    %c0_338 = arith.constant 0 : index
    %c0_339 = arith.constant 0 : index
    %454 = vector.load %arg22[%c4_337, %c0_338, %c0_339] : memref<9x1x512xf32, #tpu.memory_space<vmem>>, vector<1x1x512xf32>
    %455 = vector.shape_cast %454 : vector<1x1x512xf32> to vector<1x512xf32>
    %456 = vector.broadcast %455 : vector<1x512xf32> to vector<4x512xf32>
    %457 = arith.mulf %414, %456 : vector<4x512xf32>
    %458 = arith.truncf %457 : vector<4x512xf32> to vector<4x512xbf16>
    %c4_340 = arith.constant 4 : index
    %c0_341 = arith.constant 0 : index
    %c0_342 = arith.constant 0 : index
    %459 = vector.load %arg18[%c4_340, %c0_341, %c0_342] : memref<9x4x4xbf16, #tpu.memory_space<vmem>>, vector<1x4x4xbf16>
    %460 = vector.shape_cast %459 : vector<1x4x4xbf16> to vector<4x4xbf16>
    %cst_343 = arith.constant dense<0.000000e+00> : vector<4x512xf32>
    %461 = tpu.matmul %460, %458, %cst_343 {dimension_numbers = #tpu.dot_dimension_numbers<[1], [0], [0], [1], [0, 0, 1, 1], [], []>} : vector<4x4xbf16>, vector<4x512xbf16>, vector<4x512xf32> -> vector<4x512xf32>
    %462 = arith.addf %453, %461 : vector<4x512xf32>
    %c511_i32_344 = arith.constant 511 : i32
    %463 = tpu.dynamic_rotate %414 by %c511_i32_344 dim 1 : vector<4x512xf32>, i32 -> vector<4x512xf32>
    %c5_345 = arith.constant 5 : index
    %c0_346 = arith.constant 0 : index
    %c0_347 = arith.constant 0 : index
    %464 = vector.load %arg22[%c5_345, %c0_346, %c0_347] : memref<9x1x512xf32, #tpu.memory_space<vmem>>, vector<1x1x512xf32>
    %465 = vector.shape_cast %464 : vector<1x1x512xf32> to vector<1x512xf32>
    %466 = vector.broadcast %465 : vector<1x512xf32> to vector<4x512xf32>
    %467 = arith.mulf %463, %466 : vector<4x512xf32>
    %468 = arith.truncf %467 : vector<4x512xf32> to vector<4x512xbf16>
    %c5_348 = arith.constant 5 : index
    %c0_349 = arith.constant 0 : index
    %c0_350 = arith.constant 0 : index
    %469 = vector.load %arg18[%c5_348, %c0_349, %c0_350] : memref<9x4x4xbf16, #tpu.memory_space<vmem>>, vector<1x4x4xbf16>
    %470 = vector.shape_cast %469 : vector<1x4x4xbf16> to vector<4x4xbf16>
    %cst_351 = arith.constant dense<0.000000e+00> : vector<4x512xf32>
    %471 = tpu.matmul %470, %468, %cst_351 {dimension_numbers = #tpu.dot_dimension_numbers<[1], [0], [0], [1], [0, 0, 1, 1], [], []>} : vector<4x4xbf16>, vector<4x512xbf16>, vector<4x512xf32> -> vector<4x512xf32>
    %472 = arith.addf %462, %471 : vector<4x512xf32>
    %c497_i32_352 = arith.constant 497 : i32
    %473 = tpu.dynamic_rotate %414 by %c497_i32_352 dim 1 : vector<4x512xf32>, i32 -> vector<4x512xf32>
    %c6_353 = arith.constant 6 : index
    %c0_354 = arith.constant 0 : index
    %c0_355 = arith.constant 0 : index
    %474 = vector.load %arg22[%c6_353, %c0_354, %c0_355] : memref<9x1x512xf32, #tpu.memory_space<vmem>>, vector<1x1x512xf32>
    %475 = vector.shape_cast %474 : vector<1x1x512xf32> to vector<1x512xf32>
    %476 = vector.broadcast %475 : vector<1x512xf32> to vector<4x512xf32>
    %477 = arith.mulf %473, %476 : vector<4x512xf32>
    %478 = arith.truncf %477 : vector<4x512xf32> to vector<4x512xbf16>
    %c6_356 = arith.constant 6 : index
    %c0_357 = arith.constant 0 : index
    %c0_358 = arith.constant 0 : index
    %479 = vector.load %arg18[%c6_356, %c0_357, %c0_358] : memref<9x4x4xbf16, #tpu.memory_space<vmem>>, vector<1x4x4xbf16>
    %480 = vector.shape_cast %479 : vector<1x4x4xbf16> to vector<4x4xbf16>
    %cst_359 = arith.constant dense<0.000000e+00> : vector<4x512xf32>
    %481 = tpu.matmul %480, %478, %cst_359 {dimension_numbers = #tpu.dot_dimension_numbers<[1], [0], [0], [1], [0, 0, 1, 1], [], []>} : vector<4x4xbf16>, vector<4x512xbf16>, vector<4x512xf32> -> vector<4x512xf32>
    %482 = arith.addf %472, %481 : vector<4x512xf32>
    %c496_i32_360 = arith.constant 496 : i32
    %483 = tpu.dynamic_rotate %414 by %c496_i32_360 dim 1 : vector<4x512xf32>, i32 -> vector<4x512xf32>
    %c7_361 = arith.constant 7 : index
    %c0_362 = arith.constant 0 : index
    %c0_363 = arith.constant 0 : index
    %484 = vector.load %arg22[%c7_361, %c0_362, %c0_363] : memref<9x1x512xf32, #tpu.memory_space<vmem>>, vector<1x1x512xf32>
    %485 = vector.shape_cast %484 : vector<1x1x512xf32> to vector<1x512xf32>
    %486 = vector.broadcast %485 : vector<1x512xf32> to vector<4x512xf32>
    %487 = arith.mulf %483, %486 : vector<4x512xf32>
    %488 = arith.truncf %487 : vector<4x512xf32> to vector<4x512xbf16>
    %c7_364 = arith.constant 7 : index
    %c0_365 = arith.constant 0 : index
    %c0_366 = arith.constant 0 : index
    %489 = vector.load %arg18[%c7_364, %c0_365, %c0_366] : memref<9x4x4xbf16, #tpu.memory_space<vmem>>, vector<1x4x4xbf16>
    %490 = vector.shape_cast %489 : vector<1x4x4xbf16> to vector<4x4xbf16>
    %cst_367 = arith.constant dense<0.000000e+00> : vector<4x512xf32>
    %491 = tpu.matmul %490, %488, %cst_367 {dimension_numbers = #tpu.dot_dimension_numbers<[1], [0], [0], [1], [0, 0, 1, 1], [], []>} : vector<4x4xbf16>, vector<4x512xbf16>, vector<4x512xf32> -> vector<4x512xf32>
    %492 = arith.addf %482, %491 : vector<4x512xf32>
    %c495_i32_368 = arith.constant 495 : i32
    %493 = tpu.dynamic_rotate %414 by %c495_i32_368 dim 1 : vector<4x512xf32>, i32 -> vector<4x512xf32>
    %c8_369 = arith.constant 8 : index
    %c0_370 = arith.constant 0 : index
    %c0_371 = arith.constant 0 : index
    %494 = vector.load %arg22[%c8_369, %c0_370, %c0_371] : memref<9x1x512xf32, #tpu.memory_space<vmem>>, vector<1x1x512xf32>
    %495 = vector.shape_cast %494 : vector<1x1x512xf32> to vector<1x512xf32>
    %496 = vector.broadcast %495 : vector<1x512xf32> to vector<4x512xf32>
    %497 = arith.mulf %493, %496 : vector<4x512xf32>
    %498 = arith.truncf %497 : vector<4x512xf32> to vector<4x512xbf16>
    %c8_372 = arith.constant 8 : index
    %c0_373 = arith.constant 0 : index
    %c0_374 = arith.constant 0 : index
    %499 = vector.load %arg18[%c8_372, %c0_373, %c0_374] : memref<9x4x4xbf16, #tpu.memory_space<vmem>>, vector<1x4x4xbf16>
    %500 = vector.shape_cast %499 : vector<1x4x4xbf16> to vector<4x4xbf16>
    %cst_375 = arith.constant dense<0.000000e+00> : vector<4x512xf32>
    %501 = tpu.matmul %500, %498, %cst_375 {dimension_numbers = #tpu.dot_dimension_numbers<[1], [0], [0], [1], [0, 0, 1, 1], [], []>} : vector<4x4xbf16>, vector<4x512xbf16>, vector<4x512xf32> -> vector<4x512xf32>
    %502 = arith.addf %492, %501 : vector<4x512xf32>
    %503 = arith.addf %413, %502 : vector<4x512xf32>
    %c17_i32_376 = arith.constant 17 : i32
    %504 = tpu.dynamic_rotate %123 by %c17_i32_376 dim 1 : vector<4x512xf32>, i32 -> vector<4x512xf32>
    %c0_377 = arith.constant 0 : index
    %c0_378 = arith.constant 0 : index
    %c0_379 = arith.constant 0 : index
    %505 = vector.load %arg22[%c0_377, %c0_378, %c0_379] : memref<9x1x512xf32, #tpu.memory_space<vmem>>, vector<1x1x512xf32>
    %506 = vector.shape_cast %505 : vector<1x1x512xf32> to vector<1x512xf32>
    %507 = vector.broadcast %506 : vector<1x512xf32> to vector<4x512xf32>
    %508 = arith.mulf %504, %507 : vector<4x512xf32>
    %509 = arith.truncf %508 : vector<4x512xf32> to vector<4x512xbf16>
    %c0_380 = arith.constant 0 : index
    %c0_381 = arith.constant 0 : index
    %c0_382 = arith.constant 0 : index
    %510 = vector.load %arg19[%c0_380, %c0_381, %c0_382] : memref<9x4x4xbf16, #tpu.memory_space<vmem>>, vector<1x4x4xbf16>
    %511 = vector.shape_cast %510 : vector<1x4x4xbf16> to vector<4x4xbf16>
    %cst_383 = arith.constant dense<0.000000e+00> : vector<4x512xf32>
    %512 = tpu.matmul %511, %509, %cst_383 {dimension_numbers = #tpu.dot_dimension_numbers<[1], [0], [0], [1], [0, 0, 1, 1], [], []>} : vector<4x4xbf16>, vector<4x512xbf16>, vector<4x512xf32> -> vector<4x512xf32>
    %c16_i32_384 = arith.constant 16 : i32
    %513 = tpu.dynamic_rotate %123 by %c16_i32_384 dim 1 : vector<4x512xf32>, i32 -> vector<4x512xf32>
    %c1_385 = arith.constant 1 : index
    %c0_386 = arith.constant 0 : index
    %c0_387 = arith.constant 0 : index
    %514 = vector.load %arg22[%c1_385, %c0_386, %c0_387] : memref<9x1x512xf32, #tpu.memory_space<vmem>>, vector<1x1x512xf32>
    %515 = vector.shape_cast %514 : vector<1x1x512xf32> to vector<1x512xf32>
    %516 = vector.broadcast %515 : vector<1x512xf32> to vector<4x512xf32>
    %517 = arith.mulf %513, %516 : vector<4x512xf32>
    %518 = arith.truncf %517 : vector<4x512xf32> to vector<4x512xbf16>
    %c1_388 = arith.constant 1 : index
    %c0_389 = arith.constant 0 : index
    %c0_390 = arith.constant 0 : index
    %519 = vector.load %arg19[%c1_388, %c0_389, %c0_390] : memref<9x4x4xbf16, #tpu.memory_space<vmem>>, vector<1x4x4xbf16>
    %520 = vector.shape_cast %519 : vector<1x4x4xbf16> to vector<4x4xbf16>
    %cst_391 = arith.constant dense<0.000000e+00> : vector<4x512xf32>
    %521 = tpu.matmul %520, %518, %cst_391 {dimension_numbers = #tpu.dot_dimension_numbers<[1], [0], [0], [1], [0, 0, 1, 1], [], []>} : vector<4x4xbf16>, vector<4x512xbf16>, vector<4x512xf32> -> vector<4x512xf32>
    %522 = arith.addf %512, %521 : vector<4x512xf32>
    %c15_i32_392 = arith.constant 15 : i32
    %523 = tpu.dynamic_rotate %123 by %c15_i32_392 dim 1 : vector<4x512xf32>, i32 -> vector<4x512xf32>
    %c2_393 = arith.constant 2 : index
    %c0_394 = arith.constant 0 : index
    %c0_395 = arith.constant 0 : index
    %524 = vector.load %arg22[%c2_393, %c0_394, %c0_395] : memref<9x1x512xf32, #tpu.memory_space<vmem>>, vector<1x1x512xf32>
    %525 = vector.shape_cast %524 : vector<1x1x512xf32> to vector<1x512xf32>
    %526 = vector.broadcast %525 : vector<1x512xf32> to vector<4x512xf32>
    %527 = arith.mulf %523, %526 : vector<4x512xf32>
    %528 = arith.truncf %527 : vector<4x512xf32> to vector<4x512xbf16>
    %c2_396 = arith.constant 2 : index
    %c0_397 = arith.constant 0 : index
    %c0_398 = arith.constant 0 : index
    %529 = vector.load %arg19[%c2_396, %c0_397, %c0_398] : memref<9x4x4xbf16, #tpu.memory_space<vmem>>, vector<1x4x4xbf16>
    %530 = vector.shape_cast %529 : vector<1x4x4xbf16> to vector<4x4xbf16>
    %cst_399 = arith.constant dense<0.000000e+00> : vector<4x512xf32>
    %531 = tpu.matmul %530, %528, %cst_399 {dimension_numbers = #tpu.dot_dimension_numbers<[1], [0], [0], [1], [0, 0, 1, 1], [], []>} : vector<4x4xbf16>, vector<4x512xbf16>, vector<4x512xf32> -> vector<4x512xf32>
    %532 = arith.addf %522, %531 : vector<4x512xf32>
    %c1_i32_400 = arith.constant 1 : i32
    %533 = tpu.dynamic_rotate %123 by %c1_i32_400 dim 1 : vector<4x512xf32>, i32 -> vector<4x512xf32>
    %c3_401 = arith.constant 3 : index
    %c0_402 = arith.constant 0 : index
    %c0_403 = arith.constant 0 : index
    %534 = vector.load %arg22[%c3_401, %c0_402, %c0_403] : memref<9x1x512xf32, #tpu.memory_space<vmem>>, vector<1x1x512xf32>
    %535 = vector.shape_cast %534 : vector<1x1x512xf32> to vector<1x512xf32>
    %536 = vector.broadcast %535 : vector<1x512xf32> to vector<4x512xf32>
    %537 = arith.mulf %533, %536 : vector<4x512xf32>
    %538 = arith.truncf %537 : vector<4x512xf32> to vector<4x512xbf16>
    %c3_404 = arith.constant 3 : index
    %c0_405 = arith.constant 0 : index
    %c0_406 = arith.constant 0 : index
    %539 = vector.load %arg19[%c3_404, %c0_405, %c0_406] : memref<9x4x4xbf16, #tpu.memory_space<vmem>>, vector<1x4x4xbf16>
    %540 = vector.shape_cast %539 : vector<1x4x4xbf16> to vector<4x4xbf16>
    %cst_407 = arith.constant dense<0.000000e+00> : vector<4x512xf32>
    %541 = tpu.matmul %540, %538, %cst_407 {dimension_numbers = #tpu.dot_dimension_numbers<[1], [0], [0], [1], [0, 0, 1, 1], [], []>} : vector<4x4xbf16>, vector<4x512xbf16>, vector<4x512xf32> -> vector<4x512xf32>
    %542 = arith.addf %532, %541 : vector<4x512xf32>
    %c4_408 = arith.constant 4 : index
    %c0_409 = arith.constant 0 : index
    %c0_410 = arith.constant 0 : index
    %543 = vector.load %arg22[%c4_408, %c0_409, %c0_410] : memref<9x1x512xf32, #tpu.memory_space<vmem>>, vector<1x1x512xf32>
    %544 = vector.shape_cast %543 : vector<1x1x512xf32> to vector<1x512xf32>
    %545 = vector.broadcast %544 : vector<1x512xf32> to vector<4x512xf32>
    %546 = arith.mulf %123, %545 : vector<4x512xf32>
    %547 = arith.truncf %546 : vector<4x512xf32> to vector<4x512xbf16>
    %c4_411 = arith.constant 4 : index
    %c0_412 = arith.constant 0 : index
    %c0_413 = arith.constant 0 : index
    %548 = vector.load %arg19[%c4_411, %c0_412, %c0_413] : memref<9x4x4xbf16, #tpu.memory_space<vmem>>, vector<1x4x4xbf16>
    %549 = vector.shape_cast %548 : vector<1x4x4xbf16> to vector<4x4xbf16>
    %cst_414 = arith.constant dense<0.000000e+00> : vector<4x512xf32>
    %550 = tpu.matmul %549, %547, %cst_414 {dimension_numbers = #tpu.dot_dimension_numbers<[1], [0], [0], [1], [0, 0, 1, 1], [], []>} : vector<4x4xbf16>, vector<4x512xbf16>, vector<4x512xf32> -> vector<4x512xf32>
    %551 = arith.addf %542, %550 : vector<4x512xf32>
    %c511_i32_415 = arith.constant 511 : i32
    %552 = tpu.dynamic_rotate %123 by %c511_i32_415 dim 1 : vector<4x512xf32>, i32 -> vector<4x512xf32>
    %c5_416 = arith.constant 5 : index
    %c0_417 = arith.constant 0 : index
    %c0_418 = arith.constant 0 : index
    %553 = vector.load %arg22[%c5_416, %c0_417, %c0_418] : memref<9x1x512xf32, #tpu.memory_space<vmem>>, vector<1x1x512xf32>
    %554 = vector.shape_cast %553 : vector<1x1x512xf32> to vector<1x512xf32>
    %555 = vector.broadcast %554 : vector<1x512xf32> to vector<4x512xf32>
    %556 = arith.mulf %552, %555 : vector<4x512xf32>
    %557 = arith.truncf %556 : vector<4x512xf32> to vector<4x512xbf16>
    %c5_419 = arith.constant 5 : index
    %c0_420 = arith.constant 0 : index
    %c0_421 = arith.constant 0 : index
    %558 = vector.load %arg19[%c5_419, %c0_420, %c0_421] : memref<9x4x4xbf16, #tpu.memory_space<vmem>>, vector<1x4x4xbf16>
    %559 = vector.shape_cast %558 : vector<1x4x4xbf16> to vector<4x4xbf16>
    %cst_422 = arith.constant dense<0.000000e+00> : vector<4x512xf32>
    %560 = tpu.matmul %559, %557, %cst_422 {dimension_numbers = #tpu.dot_dimension_numbers<[1], [0], [0], [1], [0, 0, 1, 1], [], []>} : vector<4x4xbf16>, vector<4x512xbf16>, vector<4x512xf32> -> vector<4x512xf32>
    %561 = arith.addf %551, %560 : vector<4x512xf32>
    %c497_i32_423 = arith.constant 497 : i32
    %562 = tpu.dynamic_rotate %123 by %c497_i32_423 dim 1 : vector<4x512xf32>, i32 -> vector<4x512xf32>
    %c6_424 = arith.constant 6 : index
    %c0_425 = arith.constant 0 : index
    %c0_426 = arith.constant 0 : index
    %563 = vector.load %arg22[%c6_424, %c0_425, %c0_426] : memref<9x1x512xf32, #tpu.memory_space<vmem>>, vector<1x1x512xf32>
    %564 = vector.shape_cast %563 : vector<1x1x512xf32> to vector<1x512xf32>
    %565 = vector.broadcast %564 : vector<1x512xf32> to vector<4x512xf32>
    %566 = arith.mulf %562, %565 : vector<4x512xf32>
    %567 = arith.truncf %566 : vector<4x512xf32> to vector<4x512xbf16>
    %c6_427 = arith.constant 6 : index
    %c0_428 = arith.constant 0 : index
    %c0_429 = arith.constant 0 : index
    %568 = vector.load %arg19[%c6_427, %c0_428, %c0_429] : memref<9x4x4xbf16, #tpu.memory_space<vmem>>, vector<1x4x4xbf16>
    %569 = vector.shape_cast %568 : vector<1x4x4xbf16> to vector<4x4xbf16>
    %cst_430 = arith.constant dense<0.000000e+00> : vector<4x512xf32>
    %570 = tpu.matmul %569, %567, %cst_430 {dimension_numbers = #tpu.dot_dimension_numbers<[1], [0], [0], [1], [0, 0, 1, 1], [], []>} : vector<4x4xbf16>, vector<4x512xbf16>, vector<4x512xf32> -> vector<4x512xf32>
    %571 = arith.addf %561, %570 : vector<4x512xf32>
    %c496_i32_431 = arith.constant 496 : i32
    %572 = tpu.dynamic_rotate %123 by %c496_i32_431 dim 1 : vector<4x512xf32>, i32 -> vector<4x512xf32>
    %c7_432 = arith.constant 7 : index
    %c0_433 = arith.constant 0 : index
    %c0_434 = arith.constant 0 : index
    %573 = vector.load %arg22[%c7_432, %c0_433, %c0_434] : memref<9x1x512xf32, #tpu.memory_space<vmem>>, vector<1x1x512xf32>
    %574 = vector.shape_cast %573 : vector<1x1x512xf32> to vector<1x512xf32>
    %575 = vector.broadcast %574 : vector<1x512xf32> to vector<4x512xf32>
    %576 = arith.mulf %572, %575 : vector<4x512xf32>
    %577 = arith.truncf %576 : vector<4x512xf32> to vector<4x512xbf16>
    %c7_435 = arith.constant 7 : index
    %c0_436 = arith.constant 0 : index
    %c0_437 = arith.constant 0 : index
    %578 = vector.load %arg19[%c7_435, %c0_436, %c0_437] : memref<9x4x4xbf16, #tpu.memory_space<vmem>>, vector<1x4x4xbf16>
    %579 = vector.shape_cast %578 : vector<1x4x4xbf16> to vector<4x4xbf16>
    %cst_438 = arith.constant dense<0.000000e+00> : vector<4x512xf32>
    %580 = tpu.matmul %579, %577, %cst_438 {dimension_numbers = #tpu.dot_dimension_numbers<[1], [0], [0], [1], [0, 0, 1, 1], [], []>} : vector<4x4xbf16>, vector<4x512xbf16>, vector<4x512xf32> -> vector<4x512xf32>
    %581 = arith.addf %571, %580 : vector<4x512xf32>
    %c495_i32_439 = arith.constant 495 : i32
    %582 = tpu.dynamic_rotate %123 by %c495_i32_439 dim 1 : vector<4x512xf32>, i32 -> vector<4x512xf32>
    %c8_440 = arith.constant 8 : index
    %c0_441 = arith.constant 0 : index
    %c0_442 = arith.constant 0 : index
    %583 = vector.load %arg22[%c8_440, %c0_441, %c0_442] : memref<9x1x512xf32, #tpu.memory_space<vmem>>, vector<1x1x512xf32>
    %584 = vector.shape_cast %583 : vector<1x1x512xf32> to vector<1x512xf32>
    %585 = vector.broadcast %584 : vector<1x512xf32> to vector<4x512xf32>
    %586 = arith.mulf %582, %585 : vector<4x512xf32>
    %587 = arith.truncf %586 : vector<4x512xf32> to vector<4x512xbf16>
    %c8_443 = arith.constant 8 : index
    %c0_444 = arith.constant 0 : index
    %c0_445 = arith.constant 0 : index
    %588 = vector.load %arg19[%c8_443, %c0_444, %c0_445] : memref<9x4x4xbf16, #tpu.memory_space<vmem>>, vector<1x4x4xbf16>
    %589 = vector.shape_cast %588 : vector<1x4x4xbf16> to vector<4x4xbf16>
    %cst_446 = arith.constant dense<0.000000e+00> : vector<4x512xf32>
    %590 = tpu.matmul %589, %587, %cst_446 {dimension_numbers = #tpu.dot_dimension_numbers<[1], [0], [0], [1], [0, 0, 1, 1], [], []>} : vector<4x4xbf16>, vector<4x512xbf16>, vector<4x512xf32> -> vector<4x512xf32>
    %591 = arith.addf %581, %590 : vector<4x512xf32>
    %592 = arith.addf %503, %591 : vector<4x512xf32>
    %c0_447 = arith.constant 0 : index
    %c0_448 = arith.constant 0 : index
    %593 = vector.load %arg20[%c0_447, %c0_448] : memref<4x1xf32, #tpu.memory_space<vmem>>, vector<4x1xf32>
    %594 = vector.broadcast %593 : vector<4x1xf32> to vector<4x512xf32>
    %595 = arith.addf %592, %594 : vector<4x512xf32>
    %c0_449 = arith.constant 0 : index
    %c0_450 = arith.constant 0 : index
    %596 = vector.load %arg23[%c0_449, %c0_450] : memref<4x512xf32, #tpu.memory_space<vmem>>, vector<4x512xf32>
    tpu.vector_store %arg23[%c0_449, %c0_450], %595 {strides = array<i32>} : memref<4x512xf32, #tpu.memory_space<vmem>>, vector<4x512xf32>,
    %c0_451 = arith.constant 0 : index
    %c0_452 = arith.constant 0 : index
    %597 = vector.load %arg24[%c0_451, %c0_452] : memref<4x512xf32, #tpu.memory_space<vmem>>, vector<4x512xf32>
    tpu.vector_store %arg24[%c0_451, %c0_452], %318 {strides = array<i32>} : memref<4x512xf32, #tpu.memory_space<vmem>>, vector<4x512xf32>,
    %c0_453 = arith.constant 0 : index
    %c0_454 = arith.constant 0 : index
    %598 = vector.load %arg25[%c0_453, %c0_454] : memref<4x512xf32, #tpu.memory_space<vmem>>, vector<4x512xf32>
    tpu.vector_store %arg25[%c0_453, %c0_454], %324 {strides = array<i32>} : memref<4x512xf32, #tpu.memory_space<vmem>>, vector<4x512xf32>,
    return
  }
  func.func @transform_0(%arg0: i32) -> (i32, i32) {
    %c0_i32 = arith.constant 0 : i32
    %c0_i32_0 = arith.constant 0 : i32
    %c0_i32_1 = arith.constant 0 : i32
    return %c0_i32, %c0_i32_0 : i32, i32
  }
  func.func @transform_1(%arg0: i32) -> (i32, i32) {
    %c0_i32 = arith.constant 0 : i32
    %c0_i32_0 = arith.constant 0 : i32
    %c0_i32_1 = arith.constant 0 : i32
    return %c0_i32, %c0_i32_0 : i32, i32
  }
  func.func @transform_2(%arg0: i32) -> (i32, i32) {
    %c0_i32 = arith.constant 0 : i32
    %c0_i32_0 = arith.constant 0 : i32
    %c0_i32_1 = arith.constant 0 : i32
    return %c0_i32, %c0_i32_0 : i32, i32
  }
  func.func @transform_3(%arg0: i32) -> (i32, i32, i32) {
    %c0_i32 = arith.constant 0 : i32
    %c0_i32_0 = arith.constant 0 : i32
    %c0_i32_1 = arith.constant 0 : i32
    %c0_i32_2 = arith.constant 0 : i32
    return %c0_i32, %c0_i32_0, %c0_i32_1 : i32, i32, i32
  }
  func.func @transform_4(%arg0: i32) -> (i32, i32) {
    %c0_i32 = arith.constant 0 : i32
    %c0_i32_0 = arith.constant 0 : i32
    %c0_i32_1 = arith.constant 0 : i32
    return %c0_i32, %c0_i32_0 : i32, i32
  }
  func.func @transform_5(%arg0: i32) -> (i32, i32) {
    %c0_i32 = arith.constant 0 : i32
    %c0_i32_0 = arith.constant 0 : i32
    %c0_i32_1 = arith.constant 0 : i32
    return %c0_i32, %c0_i32_0 : i32, i32
  }
  func.func @transform_6(%arg0: i32) -> (i32, i32) {
    %c0_i32 = arith.constant 0 : i32
    %c0_i32_0 = arith.constant 0 : i32
    %c0_i32_1 = arith.constant 0 : i32
    return %c0_i32, %c0_i32_0 : i32, i32
  }
  func.func @transform_7(%arg0: i32) -> (i32, i32) {
    %c0_i32 = arith.constant 0 : i32
    %c0_i32_0 = arith.constant 0 : i32
    %c0_i32_1 = arith.constant 0 : i32
    return %c0_i32, %c0_i32_0 : i32, i32
  }
  func.func @transform_8(%arg0: i32) -> (i32, i32) {
    %c0_i32 = arith.constant 0 : i32
    %c0_i32_0 = arith.constant 0 : i32
    %c0_i32_1 = arith.constant 0 : i32
    return %c0_i32, %c0_i32_0 : i32, i32
  }
  func.func @transform_9(%arg0: i32) -> (i32, i32) {
    %c0_i32 = arith.constant 0 : i32
    %c0_i32_0 = arith.constant 0 : i32
    %c0_i32_1 = arith.constant 0 : i32
    return %c0_i32, %c0_i32_0 : i32, i32
  }
  func.func @transform_10(%arg0: i32) -> (i32, i32) {
    %c0_i32 = arith.constant 0 : i32
    %c0_i32_0 = arith.constant 0 : i32
    %c0_i32_1 = arith.constant 0 : i32
    return %c0_i32, %c0_i32_0 : i32, i32
  }
  func.func @transform_11(%arg0: i32) -> (i32, i32) {
    %c0_i32 = arith.constant 0 : i32
    %c0_i32_0 = arith.constant 0 : i32
    %c0_i32_1 = arith.constant 0 : i32
    return %c0_i32, %c0_i32_0 : i32, i32
  }
  func.func @transform_12(%arg0: i32) -> (i32, i32, i32) {
    %c0_i32 = arith.constant 0 : i32
    %c0_i32_0 = arith.constant 0 : i32
    %c0_i32_1 = arith.constant 0 : i32
    %c0_i32_2 = arith.constant 0 : i32
    return %c0_i32, %c0_i32_0, %c0_i32_1 : i32, i32, i32
  }
  func.func @transform_13(%arg0: i32) -> (i32, i32) {
    %c0_i32 = arith.constant 0 : i32
    %c0_i32_0 = arith.constant 0 : i32
    %c0_i32_1 = arith.constant 0 : i32
    return %c0_i32, %c0_i32_0 : i32, i32
  }
  func.func @transform_14(%arg0: i32) -> (i32, i32, i32) {
    %c0_i32 = arith.constant 0 : i32
    %c0_i32_0 = arith.constant 0 : i32
    %c0_i32_1 = arith.constant 0 : i32
    %c0_i32_2 = arith.constant 0 : i32
    return %c0_i32, %c0_i32_0, %c0_i32_1 : i32, i32, i32
  }
  func.func @transform_15(%arg0: i32) -> (i32, i32) {
    %c0_i32 = arith.constant 0 : i32
    %c0_i32_0 = arith.constant 0 : i32
    %c0_i32_1 = arith.constant 0 : i32
    return %c0_i32, %c0_i32_0 : i32, i32
  }
  func.func @transform_16(%arg0: i32) -> (i32, i32, i32) {
    %c0_i32 = arith.constant 0 : i32
    %c0_i32_0 = arith.constant 0 : i32
    %c0_i32_1 = arith.constant 0 : i32
    %c0_i32_2 = arith.constant 0 : i32
    return %c0_i32, %c0_i32_0, %c0_i32_1 : i32, i32, i32
  }
  func.func @transform_17(%arg0: i32) -> (i32, i32, i32) {
    %c0_i32 = arith.constant 0 : i32
    %c0_i32_0 = arith.constant 0 : i32
    %c0_i32_1 = arith.constant 0 : i32
    %c0_i32_2 = arith.constant 0 : i32
    return %c0_i32, %c0_i32_0, %c0_i32_1 : i32, i32, i32
  }
  func.func @transform_18(%arg0: i32) -> (i32, i32, i32) {
    %c0_i32 = arith.constant 0 : i32
    %c0_i32_0 = arith.constant 0 : i32
    %c0_i32_1 = arith.constant 0 : i32
    %c0_i32_2 = arith.constant 0 : i32
    return %c0_i32, %c0_i32_0, %c0_i32_1 : i32, i32, i32
  }
  func.func @transform_19(%arg0: i32) -> (i32, i32) {
    %c0_i32 = arith.constant 0 : i32
    %c0_i32_0 = arith.constant 0 : i32
    %c0_i32_1 = arith.constant 0 : i32
    return %c0_i32, %c0_i32_0 : i32, i32
  }
  func.func @transform_20(%arg0: i32) -> (i32, i32, i32) {
    %c0_i32 = arith.constant 0 : i32
    %c0_i32_0 = arith.constant 0 : i32
    %c0_i32_1 = arith.constant 0 : i32
    %c0_i32_2 = arith.constant 0 : i32
    return %c0_i32, %c0_i32_0, %c0_i32_1 : i32, i32, i32
  }
  func.func @transform_21(%arg0: i32) -> (i32, i32, i32) {
    %c0_i32 = arith.constant 0 : i32
    %c0_i32_0 = arith.constant 0 : i32
    %c0_i32_1 = arith.constant 0 : i32
    %c0_i32_2 = arith.constant 0 : i32
    return %c0_i32, %c0_i32_0, %c0_i32_1 : i32, i32, i32
  }
  func.func @transform_22(%arg0: i32) -> (i32, i32) {
    %c0_i32 = arith.constant 0 : i32
    %c0_i32_0 = arith.constant 0 : i32
    %c0_i32_1 = arith.constant 0 : i32
    return %c0_i32, %c0_i32_0 : i32, i32
  }
  func.func @transform_23(%arg0: i32) -> (i32, i32) {
    %c0_i32 = arith.constant 0 : i32
    %c0_i32_0 = arith.constant 0 : i32
    %c0_i32_1 = arith.constant 0 : i32
    return %c0_i32, %c0_i32_0 : i32, i32
  }
  func.func @transform_24(%arg0: i32) -> (i32, i32) {
    %c0_i32 = arith.constant 0 : i32
    %c0_i32_0 = arith.constant 0 : i32
    %c0_i32_1 = arith.constant 0 : i32
    return %c0_i32, %c0_i32_0 : i32, i32
  }
}

</mosaic_0001>

<bundles_post_ra>
// kernel: _lambda_.1
= control target key start
LH: loop header
LB: loop body
LE: loop exit
PB: predicated region body
PF: predicated region fallthrough
CT: control target
= control target key end

     0   :  { %v8210_v1 = vmov 0.0   ;;  %vm8211_vm0 = vmmov 0   ;;  %s8212_s28 = smov 8   ;;  %s8215_s29 = smov 1   ;;  %v10390_v2 = vmov 0   ;;  %vm106_vm1 = vcmask 1041408   ;;  %s10362_s2 = inlined_call_operand.vmem [shape: f32[4,128], index: 2, kind: input, shape index: {}]   ;;  %s10363_s4 = inlined_call_operand.vmem [shape: f32[4,1], index: 4, kind: input, shape index: {}]   ;;  %s10364_s20 = inlined_call_operand.vmem [shape: f32[9,1,128], index: 20, kind: input, shape index: {}]   ;;  %s10365_s3 = inlined_call_operand.vmem [shape: bf16[9,4,4], index: 3, kind: input, shape index: {}]   ;;  %s10366_s7 = inlined_call_operand.vmem [shape: f32[128,2], index: 7, kind: input, shape index: {}]   ;;  %s10367_s5 = inlined_call_operand.vmem [shape: f32[4,1], index: 5, kind: input, shape index: {}]   ;;  %s10368_s6 = inlined_call_operand.vmem [shape: f32[4,1], index: 6, kind: input, shape index: {}]   ;;  %s10369_s8 = inlined_call_operand.vmem [shape: f32[4,4], index: 8, kind: input, shape index: {}]   ;;  %s10370_s9 = inlined_call_operand.vmem [shape: f32[2,128], index: 9, kind: input, shape index: {}]   ;;  %s10371_s10 = inlined_call_operand.vmem [shape: bf16[128,512], index: 10, kind: input, shape index: {}, may-alias: {10,11}]   ;;  %s10372_s11 = inlined_call_operand.vmem [shape: bf16[128,512], index: 11, kind: input, shape index: {}, may-alias: {10,11}]   ;;  %s10373_s1 = inlined_call_operand.vmem [shape: f32[4,128], index: 1, kind: input, shape index: {}]   ;;  %s10374_s0 = inlined_call_operand.vmem [shape: f32[4,512], index: 0, kind: input, shape index: {}]   ;;  %s10375_s21 = inlined_call_operand.vmem [shape: f32[9,1,512], index: 21, kind: input, shape index: {}]   ;;  %s10376_s13 = inlined_call_operand.vmem [shape: f32[4,1], index: 13, kind: input, shape index: {}]   ;;  %s10377_s15 = inlined_call_operand.vmem [shape: f32[4,1], index: 15, kind: input, shape index: {}]   ;;  %s10378_s12 = inlined_call_operand.vmem [shape: bf16[9,4,4], index: 12, kind: input, shape index: {}]   ;;  %s10379_s14 = inlined_call_operand.vmem [shape: bf16[9,4,4], index: 14, kind: input, shape index: {}]   ;;  %s10380_s23 = inlined_call_operand.vmem [shape: f32[4,512], index: 23, kind: output, shape index: {1}]   ;;  %s10381_s24 = inlined_call_operand.vmem [shape: f32[4,512], index: 24, kind: output, shape index: {2}]   ;;  %s10382_s16 = inlined_call_operand.vmem [shape: bf16[9,4,4], index: 16, kind: input, shape index: {}]   ;;  %s10383_s19 = inlined_call_operand.vmem [shape: f32[4,1], index: 19, kind: input, shape index: {}]   ;;  %s10384_s17 = inlined_call_operand.vmem [shape: bf16[9,4,4], index: 17, kind: input, shape index: {}]   ;;  %s10385_s18 = inlined_call_operand.vmem [shape: bf16[9,4,4], index: 18, kind: input, shape index: {}]   ;;  %s10386_s22 = inlined_call_operand.vmem [shape: f32[4,512], index: 22, kind: output, shape index: {0}]  }
   0x1   :  { %10412 = sst [smem:[#allocation13_spill]] %s10362_s2  ;;  %7866 = vmatprep.subr.bf16.mxu0 %v8210_v1  ;;  %7868 = vmatprep.mubr.msk.bf16.mxu0 %vm8211_vm0, %v8210_v1  ;;  %s8216_s2 = smov 127   ;;  %vm102_vm2 = vcmask 31744   ;;  %v8221_v60 = vmov 0.0|0.0   ;;  %vm789_vm3 = vcmask 1043456   ;;  %vm956_vm4 = vcmask 15360  }
   0x2   :  { %10413 = sst [smem:[#allocation14_spill]] %s10363_s4  ;;  %s10421_s27 = sld [smem:[#allocation13_spill]]  ;;  %7872 = vmatprep.subr.bf16.mxu1 %v8210_v1  ;;  %7874 = vmatprep.mubr.msk.bf16.mxu1 %vm8211_vm0, %v8210_v1 }
   0x3   :  { %10414 = sst [smem:[#allocation15_spill]] %s10364_s20  ;;  %s8214_s20 = smov 9   ;;  %8076 = vset.pattern.permute.xlu0 %v10390_v2  ;;  %8077 = vset.pattern.permute.xlu1 %v10390_v2 }
   0x4   :  { %10415 = sst [smem:[#allocation16_spill]] %s10365_s3  ;;  %s8218_s30 = smov 120  }
   0x5   :  { %10416 = sst [smem:[#allocation17_spill]] %s10366_s7  ;;  %s8219_s3 = smov 119  }
   0x6   :  { %10417 = sst [smem:[#allocation18_spill]] %s10367_s5  ;;  %s10422_s7 = sld [smem:[#allocation14_spill]] }
   0x7   :  { %10418 = sst [smem:[#allocation19_spill]] %s10368_s6  ;;  %s8213_s6 = smov 7  }
   0x8   :  { %10419 = sst [smem:[#allocation20_spill]] %s10369_s8  ;;  %v75_v0 = vld [vmem:[%s10421_s27] sm:$0xf]  ;;  %s8217_s8 = smov 121  }
   0x9   :  { %10420 = sst [smem:[#allocation21_spill]] %s10370_s9  ;;  %88 = vrot.lane.b32.xlu0 %v75_v0, %s8212_s28  ;;  %196 = vrot.lane.b32.xlu1 %v75_v0, %s8213_s6  ;;  %s10423_s26 = sld [smem:[#allocation15_spill]] }
   0xa   :  { %s10424_s4 = sld [smem:[#allocation16_spill]]  ;;  %s10425_s6 = sld [smem:[#allocation17_spill]] }
   0xb   :  { %s10426_s9 = sld [smem:[#allocation18_spill]]  ;;  %s10427_s27 = sld [smem:[#allocation19_spill]] }
   0xc   :  { %v621_v3 = vld [vmem:[%s10422_s7] sm:$0xf]  ;;  %s8227_s25 = smov 111  }
   0xd   :  { %76 = vrot.lane.b32.xlu0 %v75_v0, %s8214_s20  ;;  %257 = vrot.lane.b32.xlu1 %v75_v0, %s8215_s29 }
   0xf   :  { %v7474_v4 = vld [vmem:[%s10423_s26 + $0x1] ss:$0 sm:$0xff]  ;;  %v7479_v5 = vld [vmem:[%s10423_s26 + $0x2] ss:$0 sm:$0xff]  ;;  %v7472_v10 = vld [vmem:[%s10423_s26] ss:$0 sm:$0xff] }
  0x10   :  { %v7483_v11 = vld [vmem:[%s10423_s26 + $0x3] ss:$0 sm:$0xff]  ;;  %v7487_v16 = vld [vmem:[%s10423_s26 + $0x4] ss:$0 sm:$0xff]  ;;  %v7491_v25 = vld [vmem:[%s10423_s26 + $0x5] ss:$0 sm:$0xff] }
  0x11   :  { %377 = vrot.lane.b32.xlu0 %v75_v0, %s8216_s2  ;;  %438 = vrot.lane.b32.xlu1 %v75_v0, %s8217_s8  ;;  %v7475_v20 = vld [vmem:[%s10424_s4 + $0x2] sm:$0x3]  ;;  %v326_v24 = vmul.f32 %v7487_v16, %v75_v0  ;;  %v87_v28 = vld [vmem:[%s10424_s4] sm:$0x3]  ;;  %s8223_s8 = smov 17  }
  0x12   :  { %v7495_v32 = vld [vmem:[%s10423_s26 + $0x6] ss:$0 sm:$0xff]  ;;  %v7480_v34 = vld [vmem:[%s10424_s4 + $0x4] sm:$0x3]  ;;  %v7499_v38 = vld [vmem:[%s10423_s26 + $0x7] ss:$0 sm:$0xff] }
  0x13   :  { %v327_v31 = vpack.c.bf16 %v326_v24, %v326_v24  ;;  %v7484_v40 = vld [vmem:[%s10424_s4 + $0x6] sm:$0x3]  ;;  %v7503_v44 = vld [vmem:[%s10423_s26 + $0x8] ss:$0 sm:$0xff]  ;;  %v7492_v50 = vld [vmem:[%s10424_s4 + $0xa] sm:$0x3] }
  0x14   :  { %v7488_v46 = vld [vmem:[%s10424_s4 + $0x8] sm:$0x3]  ;;  %v7496_v53 = vld [vmem:[%s10424_s4 + $0xc] sm:$0x3]  ;;  %v7500_v55 = vld [vmem:[%s10424_s4 + $0xe] sm:$0x3] }
  0x15   :  { %499 = vrot.lane.b32.xlu0 %v75_v0, %s8218_s30  ;;  %560 = vrot.lane.b32.xlu1 %v75_v0, %s8219_s3  ;;  %v334_v36 = vsel %vm106_vm1, %v327_v31, 0  ;;  %v7504_v56 = vld [vmem:[%s10424_s4 + $0x10] sm:$0x3]  ;;  %v628_v57 = vld [vmem:[%s10425_s6] sm:$0xff]  ;;  %s10428_s26 = sld [smem:[#allocation20_spill]]  ;;  %s10429_s30 = sld [smem:[#allocation21_spill]] }
  0x16   :  { %v629_v58 = vld [vmem:[%s10425_s6 + $0x8] sm:$0xff]  ;;  %v630_v61 = vld [vmem:[%s10425_s6 + $0x10] sm:$0xff]  ;;  %v631_v62 = vld [vmem:[%s10425_s6 + $0x18] sm:$0xff]  ;;  %s8222_s4 = smov 16   ;;  %s8225_s3 = smov 113  }
  0x17   :  { %v8011_v59 = vpack.c.bf16 %v629_v58, %v628_v57  ;;  %v8014_v63 = vpack.c.bf16 %v631_v62, %v630_v61  ;;  %v632_v0 = vld [vmem:[%s10425_s6 + $0x20] sm:$0xff] }
  0x19   :  { %624 = vperm.xlu0 %8076, %v621_v3   ;;  %v633_v3 = vld [vmem:[%s10425_s6 + $0x28] sm:$0xff] }
  0x7b   :  { %v89_v6 = vpop.permute.xlu0 %88  ;;  %v197_v7 = vpop.permute.xlu1 %196 }
  0x7c   :  { %v98_v8 = vmul.f32 %v7474_v4, %v89_v6  ;;  %v206_v9 = vmul.f32 %v7479_v5, %v197_v7  ;;  %v8017_v4 = vpack.c.bf16 %v633_v3, %v632_v0  ;;  %v634_v5 = vld [vmem:[%s10425_s6 + $0x30] sm:$0xff]  ;;  %v635_v6 = vld [vmem:[%s10425_s6 + $0x38] sm:$0xff] }
  0x7d   :  { %v8020_v7 = vpack.c.bf16 %v635_v6, %v634_v5  ;;  %v938_v5 = vld [vmem:[%s10426_s9] sm:$0xf] }
  0x7e   :  { %v99_v12 = vpack.c.bf16 %v98_v8, %v98_v8  ;;  %v207_v13 = vpack.c.bf16 %v206_v9, %v206_v9  ;;  %v636_v8 = vld [vmem:[%s10425_s6 + $0x40] sm:$0xff]  ;;  %v637_v9 = vld [vmem:[%s10425_s6 + $0x48] sm:$0xff]  ;;  %943 = vperm.xlu1 %8077, %v938_v5  }
  0x7f   :  { %v77_v14 = vpop.permute.xlu0 %76  ;;  %v258_v15 = vpop.permute.xlu1 %257  ;;  %v947_v6 = vld [vmem:[%s10427_s27] sm:$0xf] }
  0x80   :  { %v85_v17 = vmul.f32 %v7472_v10, %v77_v14  ;;  %v108_v18 = vsel %vm106_vm1, %v99_v12, 0  ;;  %v267_v19 = vmul.f32 %v7483_v11, %v258_v15  ;;  %v214_v23 = vsel %vm106_vm1, %v207_v13, 0  ;;  %v638_v11 = vld [vmem:[%s10425_s6 + $0x50] sm:$0xff]  ;;  %v639_v12 = vld [vmem:[%s10425_s6 + $0x58] sm:$0xff]  ;;  %v640_v14 = vld [vmem:[%s10425_s6 + $0x60] sm:$0xff] }
  0x81   :  { %7867 = vmatpush3.bf16.msra.mxu0 %v108_v18  ;;  %v8023_v10 = vpack.c.bf16 %v637_v9, %v636_v8  ;;  %v8026_v13 = vpack.c.bf16 %v639_v12, %v638_v11  ;;  %v641_v15 = vld [vmem:[%s10425_s6 + $0x68] sm:$0xff]  ;;  %v643_v18 = vld [vmem:[%s10425_s6 + $0x78] sm:$0xff]  ;;  %v955_v12 = vld [vmem:[%s10429_s30] sm:$0x3]  ;;  %s8224_s30 = smov 15  }
  0x82   :  { %v86_v21 = vpack.c.bf16 %v85_v17, %v85_v17  ;;  %v268_v22 = vpack.c.bf16 %v267_v19, %v267_v19  ;;  %7878 = vmatprep.subr.bf16.mxu0 %v8210_v1  ;;  %v8029_v16 = vpack.c.bf16 %v641_v15, %v640_v14  ;;  %v642_v17 = vld [vmem:[%s10425_s6 + $0x70] sm:$0xff]  ;;  %951 = vperm.xlu1 %8077, %v947_v6   ;;  %v8083_v14 = vld [vmem:[%s10371_s10 + $0xc] ss:$16 sps:$4 sm:$0xff]   ;;  %v8129_v6 = vld [vmem:[%s10372_s11 + $0x8] ss:$16 sps:$4 sm:$0xff]   ;;  %s8226_s6 = smov 112  }
  0x83   :  { %v378_v26 = vpop.permute.xlu0 %377  ;;  %v439_v33 = vpop.permute.xlu1 %438  ;;  %v8032_v19 = vpack.c.bf16 %v643_v18, %v642_v17  ;;  %v8126_v5 = vld [vmem:[%s10372_s11] ss:$16 sps:$4 sm:$0xff]  }
  0x84   :  { %7869 = vmatmul.mubr.msk.bf16.vlgmr.msra.gmra.mrb[0].mxu0 %vm102_vm2, %v7475_v20  ;;  %v154_v27 = vsel %vm106_vm1, %v86_v21, 0  ;;  %v275_v29 = vsel %vm106_vm1, %v268_v22, 0  ;;  %v387_v30 = vmul.f32 %v7491_v25, %v378_v26  ;;  %v448_v37 = vmul.f32 %v7495_v32, %v439_v33 }
  0x85   :  { %7873 = vmatpush3.bf16.msra.mxu1 %v154_v27  ;;  %7879 = vmatpush3.bf16.msra.mxu0 %v214_v23 }
  0x86   :  { %7880 = vmatprep.mubr.msk.bf16.mxu0 %vm8211_vm0, %v8210_v1  ;;  %7884 = vmatprep.subr.bf16.mxu1 %v8210_v1  ;;  %v388_v35 = vpack.c.bf16 %v387_v30, %v387_v30  ;;  %v449_v41 = vpack.c.bf16 %v448_v37, %v448_v37 }
  0x87   :  { %7890 = vmatprep.subr.bf16.mxu0 %v8210_v1  ;;  %v500_v39 = vpop.permute.xlu0 %499  ;;  %v561_v45 = vpop.permute.xlu1 %560 }
  0x88   :  { %7875 = vmatmul.mubr.msk.bf16.vlgmr.msra.gmra.mrb[0].mxu1 %vm102_vm2, %v87_v28  ;;  %v395_v42 = vsel %vm106_vm1, %v388_v35, 0  ;;  %v509_v43 = vmul.f32 %v7499_v38, %v500_v39  ;;  %v456_v48 = vsel %vm106_vm1, %v449_v41, 0  ;;  %v570_v49 = vmul.f32 %v7503_v44, %v561_v45 }
  0x89   :  { %7885 = vmatpush3.bf16.msra.mxu1 %v275_v29  ;;  %7886 = vmatprep.mubr.msk.bf16.mxu1 %vm8211_vm0, %v8210_v1 }
  0x8a   :  { %7896 = vmatprep.subr.bf16.mxu1 %v8210_v1  ;;  %v510_v47 = vpack.c.bf16 %v509_v43, %v509_v43  ;;  %v571_v51 = vpack.c.bf16 %v570_v49, %v570_v49 }
  0x8c   :  { %7881 = vmatmul.mubr.msk.bf16.vlgmr.msra.gmra.mrb[4].mxu0 %vm102_vm2, %v7480_v34  ;;  %v517_v52 = vsel %vm106_vm1, %v510_v47, 0  ;;  %v578_v54 = vsel %vm106_vm1, %v571_v51, 0 }
  0x8d   :  { %7891 = vmatpush3.bf16.msra.mxu0 %v334_v36  ;;  %7892 = vmatprep.mubr.msk.bf16.mxu0 %vm8211_vm0, %v8210_v1 }
  0x8e   :  { %7902 = vmatprep.subr.bf16.mxu0 %v8210_v1 }
  0x90   :  { %7887 = vmatmul.mubr.msk.bf16.vlgmr.msra.gmra.mrb[4].mxu1 %vm102_vm2, %v7484_v40 }
  0x91   :  { %7897 = vmatpush3.bf16.msra.mxu1 %v395_v42  ;;  %7898 = vmatprep.mubr.msk.bf16.mxu1 %vm8211_vm0, %v8210_v1 }
  0x92   :  { %7908 = vmatprep.subr.bf16.mxu1 %v8210_v1 }
  0x94   :  { %7893 = vmatmul.mubr.msk.bf16.vlgmr.msra.gmra.mrb[8].mxu0 %vm102_vm2, %v7488_v46 }
  0x95   :  { %7903 = vmatpush3.bf16.msra.mxu0 %v456_v48  ;;  %7904 = vmatprep.mubr.msk.bf16.mxu0 %vm8211_vm0, %v8210_v1 }
  0x96   :  { %7914 = vmatprep.subr.bf16.mxu0 %v8210_v1 }
  0x98   :  { %7899 = vmatmul.mubr.msk.bf16.vlgmr.msra.gmra.mrb[8].mxu1 %vm102_vm2, %v7492_v50 }
  0x99   :  { %7909 = vmatpush3.bf16.msra.mxu1 %v517_v52  ;;  %7910 = vmatprep.mubr.msk.bf16.mxu1 %vm8211_vm0, %v8210_v1 }
  0x9a   :  { %8010 = vmatprep.subr.bf16.mxu1 %v8221_v60 }
  0x9c   :  { %7905 = vmatmul.mubr.msk.bf16.vlgmr.msra.gmra.mrb[12].mxu0 %vm102_vm2, %v7496_v53 }
  0x9d   :  { %7915 = vmatpush3.bf16.msra.mxu0 %v578_v54  ;;  %7916 = vmatprep.mubr.msk.bf16.mxu0 %vm8211_vm0, %v8210_v1 }
  0x9e   :  { %8034 = vmatprep.subr.bf16.mxu0 %v8221_v60 }
  0xa0   :  { %7911 = vmatmul.mubr.msk.bf16.vlgmr.msra.gmra.mrb[12].mxu1 %vm102_vm2, %v7500_v55 }
  0xa1   :  { %7952 = vmatprep.mubr.msk.f32.mxu1 %vm8211_vm0, %v8210_v1  ;;  %8012 = vmatpush3.bf16.msra.mxu1 %v8011_v59 }
  0xa2   :  { %8013 = vmatprep.subr.bf16.mxu1 %v8221_v60 }
  0xa4   :  { %7917 = vmatmul.mubr.msk.bf16.vlgmr.msra.gmra.mrb[16].mxu0 %vm102_vm2, %v7504_v56 }
  0xa5   :  { %7987 = vmatprep.mubr.msk.f32.mxu0 %vm8211_vm0, %v8210_v1  ;;  %8036 = vmatpush3.bf16.msra.mxu0 %v8011_v59 }
  0xa6   :  { %8037 = vmatprep.subr.bf16.mxu0 %v8221_v60  ;;  %8015 = vmatpush3.bf16.msra.mxu1 %v8014_v63 }
  0xa7   :  { %8016 = vmatprep.subr.bf16.mxu1 %v8221_v60 }
  0xa9   :  { %8039 = vmatpush3.bf16.msra.mxu0 %v8014_v63 }
  0xaa   :  { %8040 = vmatprep.subr.bf16.mxu0 %v8221_v60  ;;  %8018 = vmatpush3.bf16.msra.mxu1 %v8017_v4 }
  0xab   :  { %8019 = vmatprep.subr.bf16.mxu1 %v8221_v60 }
  0xad   :  { %8042 = vmatpush3.bf16.msra.mxu0 %v8017_v4 }
  0xae   :  { %8043 = vmatprep.subr.bf16.mxu0 %v8221_v60  ;;  %8021 = vmatpush3.bf16.msra.mxu1 %v8020_v7 }
  0xaf   :  { %8022 = vmatprep.subr.bf16.mxu1 %v8221_v60 }
  0xb1   :  { %8045 = vmatpush3.bf16.msra.mxu0 %v8020_v7  ;;  %v785_v7 = vld [vmem:[%s10428_s26] sm:$0xf] }
  0xb2   :  { %8046 = vmatprep.subr.bf16.mxu0 %v8221_v60  ;;  %8024 = vmatpush3.bf16.msra.mxu1 %v8023_v10 }
  0xb3   :  { %8025 = vmatprep.subr.bf16.mxu1 %v8221_v60 }
  0xb5   :  { %8048 = vmatpush3.bf16.msra.mxu0 %v8023_v10 }
  0xb6   :  { %8049 = vmatprep.subr.bf16.mxu0 %v8221_v60  ;;  %8027 = vmatpush3.bf16.msra.mxu1 %v8026_v13 }
  0xb7   :  { %8028 = vmatprep.subr.bf16.mxu1 %v8221_v60 }
  0xb9   :  { %8051 = vmatpush3.bf16.msra.mxu0 %v8026_v13  ;;  %v8080_v13 = vld [vmem:[%s10371_s10 + $0x4] ss:$16 sps:$4 sm:$0xff]  }
  0xba   :  { %8052 = vmatprep.subr.bf16.mxu0 %v8221_v60  ;;  %8030 = vmatpush3.bf16.msra.mxu1 %v8029_v16 }
  0xbb   :  { %8031 = vmatprep.subr.bf16.mxu1 %v8221_v60 }
  0xbd   :  { %8054 = vmatpush3.bf16.msra.mxu0 %v8029_v16 }
  0xbe   :  { %8055 = vmatprep.subr.bf16.mxu0 %v8221_v60  ;;  %8033 = vmatpush3.bf16.msra.mxu1 %v8032_v19  ;;  %v625_v60 = vpop.permute.xlu0 %624 }
  0xbf   :  { %7990 = vmatprep.subr.mxu1 %v8210_v1 }
  0xc1   :  { %8057 = vmatpush3.bf16.msra.mxu0 %v8032_v19 }
  0xc2   :  { %8000 = vmatprep.subr.mxu0 %v8210_v1 }
 0x157   :  { %v144_v20 = vpop.f32.mrb[0].mxu0 }
 0x158   :  { %v7870_v21 = vpop.f32.mrb[1].mxu0 }
 0x159   :  { %v147_v22 = vpop.f32.mrb[2].mxu0  ;;  %v944_v21 = vpop.permute.xlu1 %943 }
 0x15a   :  { %v7871_v23 = vpop.f32.mrb[3].mxu0 }
 0x15b   :  { %v190_v24 = vpop.f32.mrb[0].mxu1  ;;  %v8078_v23 = vld [vmem:[%s10371_s10] ss:$16 sps:$4 sm:$0xff]  }
 0x15c   :  { %v191_v25 = vadd.f32 %v190_v24, %v144_v20  ;;  %v7876_v26 = vpop.f32.mrb[1].mxu1 }
 0x15d   :  { %v193_v27 = vpop.f32.mrb[2].mxu1 }
 0x15e   :  { %v7877_v28 = vpop.f32.mrb[3].mxu1  ;;  %v952_v27 = vpop.permute.xlu1 %951 }
 0x15f   :  { %v250_v29 = vpop.f32.mrb[4].mxu0  ;;  %v8081_v28 = vld [vmem:[%s10371_s10 + $0x8] ss:$16 sps:$4 sm:$0xff]  }
 0x160   :  { %v256_v30 = vadd.f32 %v250_v29, %v191_v25  ;;  %v7882_v31 = vpop.f32.mrb[5].mxu0  ;;  %v8086_v25 = vld [vmem:[%s10371_s10 + $0x24] ss:$16 sps:$4 sm:$0xff]   ;;  %v8084_v29 = vld [vmem:[%s10371_s10 + $0x20] ss:$16 sps:$4 sm:$0xff]  }
 0x161   :  { %v253_v32 = vpop.f32.mrb[6].mxu0  ;;  %v8089_v31 = vld [vmem:[%s10371_s10 + $0x2c] ss:$16 sps:$4 sm:$0xff]  }
 0x162   :  { %v7883_v33 = vpop.f32.mrb[7].mxu0  ;;  %v8092_v32 = vld [vmem:[%s10371_s10 + $0x44] ss:$16 sps:$4 sm:$0xff]  }
 0x163   :  { %v311_v34 = vpop.f32.mrb[4].mxu1  ;;  %v8087_v33 = vld [vmem:[%s10371_s10 + $0x28] ss:$16 sps:$4 sm:$0xff]  }
 0x164   :  { %v317_v35 = vadd.f32 %v311_v34, %v256_v30  ;;  %v7888_v36 = vpop.f32.mrb[5].mxu1  ;;  %v8090_v34 = vld [vmem:[%s10371_s10 + $0x40] ss:$16 sps:$4 sm:$0xff]  }
 0x165   :  { %v314_v37 = vpop.f32.mrb[6].mxu1  ;;  %v8098_v36 = vld [vmem:[%s10371_s10 + $0x64] ss:$16 sps:$4 sm:$0xff]  }
 0x166   :  { %v7889_v38 = vpop.f32.mrb[7].mxu1  ;;  %v8093_v37 = vld [vmem:[%s10371_s10 + $0x48] ss:$16 sps:$4 sm:$0xff]  }
 0x167   :  { %v370_v39 = vpop.f32.mrb[8].mxu0  ;;  %v8096_v38 = vld [vmem:[%s10371_s10 + $0x60] ss:$16 sps:$4 sm:$0xff]  }
 0x168   :  { %v376_v40 = vadd.f32 %v370_v39, %v317_v35  ;;  %v7894_v41 = vpop.f32.mrb[9].mxu0  ;;  %v8095_v35 = vld [vmem:[%s10371_s10 + $0x4c] ss:$16 sps:$4 sm:$0xff]  }
 0x169   :  { %v373_v42 = vpop.f32.mrb[10].mxu0  ;;  %v8101_v39 = vld [vmem:[%s10371_s10 + $0x6c] ss:$16 sps:$4 sm:$0xff]   ;;  %v8099_v41 = vld [vmem:[%s10371_s10 + $0x68] ss:$16 sps:$4 sm:$0xff]  }
 0x16a   :  { %v7895_v43 = vpop.f32.mrb[11].mxu0  ;;  %v8102_v42 = vld [vmem:[%s10371_s10 + $0x80] ss:$16 sps:$4 sm:$0xff]  }
 0x16b   :  { %v431_v44 = vpop.f32.mrb[8].mxu1  ;;  %v8107_v43 = vld [vmem:[%s10371_s10 + $0x8c] ss:$16 sps:$4 sm:$0xff]  }
 0x16c   :  { %v437_v45 = vadd.f32 %v431_v44, %v376_v40  ;;  %v7900_v46 = vpop.f32.mrb[9].mxu1  ;;  %v8104_v40 = vld [vmem:[%s10371_s10 + $0x84] ss:$16 sps:$4 sm:$0xff]  }
 0x16d   :  { %v434_v47 = vpop.f32.mrb[10].mxu1  ;;  %v8110_v44 = vld [vmem:[%s10371_s10 + $0xa4] ss:$16 sps:$4 sm:$0xff]   ;;  %v8108_v46 = vld [vmem:[%s10371_s10 + $0xa0] ss:$16 sps:$4 sm:$0xff]  }
 0x16e   :  { %v7901_v48 = vpop.f32.mrb[11].mxu1  ;;  %v8113_v47 = vld [vmem:[%s10371_s10 + $0xac] ss:$16 sps:$4 sm:$0xff]  }
 0x16f   :  { %v492_v49 = vpop.f32.mrb[12].mxu0  ;;  %v8111_v48 = vld [vmem:[%s10371_s10 + $0xa8] ss:$16 sps:$4 sm:$0xff]  }
 0x170   :  { %v498_v50 = vadd.f32 %v492_v49, %v437_v45  ;;  %v7906_v51 = vpop.f32.mrb[13].mxu0  ;;  %v8105_v45 = vld [vmem:[%s10371_s10 + $0x88] ss:$16 sps:$4 sm:$0xff]   ;;  %v8116_v49 = vld [vmem:[%s10371_s10 + $0xc4] ss:$16 sps:$4 sm:$0xff]  }
 0x171   :  { %v495_v52 = vpop.f32.mrb[14].mxu0  ;;  %v8114_v51 = vld [vmem:[%s10371_s10 + $0xc0] ss:$16 sps:$4 sm:$0xff]  }
 0x172   :  { %v7907_v53 = vpop.f32.mrb[15].mxu0  ;;  %v8117_v52 = vld [vmem:[%s10371_s10 + $0xc8] ss:$16 sps:$4 sm:$0xff]  }
 0x173   :  { %v553_v54 = vpop.f32.mrb[12].mxu1  ;;  %v8122_v53 = vld [vmem:[%s10371_s10 + $0xe4] ss:$16 sps:$4 sm:$0xff]  }
 0x174   :  { %v559_v55 = vadd.f32 %v553_v54, %v498_v50  ;;  %v7912_v56 = vpop.f32.mrb[13].mxu1  ;;  %v8119_v50 = vld [vmem:[%s10371_s10 + $0xcc] ss:$16 sps:$4 sm:$0xff]  }
 0x175   :  { %v556_v57 = vpop.f32.mrb[14].mxu1  ;;  %v8125_v54 = vld [vmem:[%s10371_s10 + $0xec] ss:$16 sps:$4 sm:$0xff]   ;;  %v8123_v56 = vld [vmem:[%s10371_s10 + $0xe8] ss:$16 sps:$4 sm:$0xff]  }
 0x176   :  { %v7913_v58 = vpop.f32.mrb[15].mxu1  ;;  %v8128_v57 = vld [vmem:[%s10372_s11 + $0x4] ss:$16 sps:$4 sm:$0xff]  }
 0x177   :  { %v614_v59 = vpop.f32.mrb[16].mxu0  ;;  %v8131_v58 = vld [vmem:[%s10372_s11 + $0xc] ss:$16 sps:$4 sm:$0xff]  }
 0x178   :  { %v620_v61 = vadd.f32 %v614_v59, %v559_v55  ;;  %v7918_v62 = vpop.f32.mrb[17].mxu0  ;;  %v8120_v55 = vld [vmem:[%s10371_s10 + $0xe0] ss:$16 sps:$4 sm:$0xff]  }
 0x179   :  { %v617_v63 = vpop.f32.mrb[18].mxu0 }
 0x17a   :  { %v8516_v0 = vadd.f32 %v625_v60, %v620_v61  ;;  %v7919_v3 = vpop.f32.mrb[19].mxu0 }
 0x17c   :  { %v714_v4 = vmul.f32 %v8516_v0, %v8516_v0  ;;  %7953 = vmatmul.mubr.f32.vlgmr.msra.gmra.mrb[16].mxu1 %v8516_v0 }
 0x17d   :  { %7992 = vmatprep.mubr.msk.f32.mxu1 %vm8211_vm0, %v8210_v1 }
 0x17e   :  { %7988 = vmatmul.mubr.f32.vlgmr.msra.gmra.mrb[20].mxu0 %v714_v4 }
 0x17f   :  { %8002 = vmatprep.mubr.msk.f32.mxu0 %vm8211_vm0, %v8210_v1  ;;  %8001 = vmatpush3.msk.msra.mxu0 %vm106_vm1, %v955_v12 }
 0x180   :  { %1302 = vmatprep.subr.bf16.mxu0 %v8080_v13  ;;  %v8138_v13 = vld [vmem:[%s10372_s11 + $0x40] ss:$16 sps:$4 sm:$0xff]  }
 0x24f   :  { %v710_v8 = vpop.f32.mrb[16].mxu1 }
 0x250   :  { %v7954_v9 = vpop.f32.mrb[17].mxu1  ;;  %7991 = vmatpush3.msk.msra.mxu1 %vm789_vm3, %v710_v8  ;;  %v8134_v8 = vld [vmem:[%s10372_s11 + $0x24] ss:$16 sps:$4 sm:$0xff]  }
 0x251   :  { %v781_v10 = vpop.f32.mrb[20].mxu0  ;;  %7993 = vmatmul.mubr.msk.f32.vlgmr.msra.gmra.mrb[18].mxu1 %vm102_vm2, %v785_v7  ;;  %7995 = vmatprep.subr.mxu1 %v8210_v1  ;;  %v8132_v9 = vld [vmem:[%s10372_s11 + $0x20] ss:$16 sps:$4 sm:$0xff]  }
 0x252   :  { %v7989_v11 = vpop.f32.mrb[21].mxu0  ;;  %7996 = vmatpush3.msk.msra.mxu1 %vm789_vm3, %v781_v10  ;;  %7997 = vmatprep.mubr.msk.f32.mxu1 %vm8211_vm0, %v8210_v1  ;;  %v8135_v10 = vld [vmem:[%s10372_s11 + $0x28] ss:$16 sps:$4 sm:$0xff]  }
 0x253   :  { %8005 = vmatprep.subr.mxu1 %v8210_v1  ;;  %v8140_v11 = vld [vmem:[%s10372_s11 + $0x44] ss:$16 sps:$4 sm:$0xff]  }
 0x255   :  { %7998 = vmatmul.mubr.msk.f32.vlgmr.msra.gmra.mrb[20].mxu1 %vm102_vm2, %v785_v7 }
 0x256   :  { %8007 = vmatprep.mubr.msk.f32.mxu1 %vm8211_vm0, %v8210_v1  ;;  %8006 = vmatpush3.msk.msra.mxu1 %vm106_vm1, %v955_v12  ;;  %v8143_v12 = vld [vmem:[%s10372_s11 + $0x4c] ss:$16 sps:$4 sm:$0xff]  }
 0x257   :  { %1343 = vmatprep.subr.bf16.mxu1 %v8083_v14  ;;  %v8141_v14 = vld [vmem:[%s10372_s11 + $0x48] ss:$16 sps:$4 sm:$0xff]  }
 0x324   :  { %v859_v15 = vpop.f32.mrb[18].mxu1 }
 0x325   :  { %v7994_v1 = vpop.f32.mrb[19].mxu1  ;;  %v936_v16 = vmul.f32 %v859_v15, %v859_v15 }
 0x326   :  { %v8149_v1 = vld [vmem:[%s10372_s11 + $0x6c] ss:$16 sps:$4 sm:$0xff]  }
 0x328   :  { %v932_v17 = vpop.f32.mrb[20].mxu1 }
 0x329   :  { %v937_v18 = vsub.f32 %v932_v17, %v936_v16  ;;  %v7999_v19 = vpop.f32.mrb[21].mxu1  ;;  %v8144_v16 = vld [vmem:[%s10372_s11 + $0x60] ss:$16 sps:$4 sm:$0xff]   ;;  %v8147_v17 = vld [vmem:[%s10372_s11 + $0x68] ss:$16 sps:$4 sm:$0xff]  }
 0x32a   :  { %v8155_v19 = vld [vmem:[%s10372_s11 + $0x8c] ss:$16 sps:$4 sm:$0xff]  }
 0x32b   :  { %v939_v20 = vadd.f32 1e-05, %v937_v18  ;;  %v8152_v18 = vld [vmem:[%s10372_s11 + $0x84] ss:$16 sps:$4 sm:$0xff]  }
 0x32d   :  { %8174 = vrsqrt.f32 %v939_v20  ;;  %v8150_v20 = vld [vmem:[%s10372_s11 + $0x80] ss:$16 sps:$4 sm:$0xff]  }
 0x337   :  { %v8175_v22 = vpop.eup %8174 }
 0x338   :  { %v946_v24 = vmul.f32 %v8175_v22, %v944_v21  ;;  %v8153_v21 = vld [vmem:[%s10372_s11 + $0x88] ss:$16 sps:$4 sm:$0xff]   ;;  %v8158_v22 = vld [vmem:[%s10372_s11 + $0xa4] ss:$16 sps:$4 sm:$0xff]  }
 0x33a   :  { %v948_v26 = vmul.f32 %v946_v24, %v859_v15  ;;  %8003 = vmatmul.mubr.msk.f32.vlgmr.msra.gmra.mrb[22].mxu0 %vm956_vm4, %v946_v24  ;;  %v8146_v15 = vld [vmem:[%s10372_s11 + $0x64] ss:$16 sps:$4 sm:$0xff]   ;;  %v8156_v24 = vld [vmem:[%s10372_s11 + $0xa0] ss:$16 sps:$4 sm:$0xff]  }
 0x33b   :  { %1303 = vmatpush1.bf16.msra.mxu0 %v8078_v23  ;;  %1334 = vmatprep.mubr.bf16.mxu0 %v10390_v2  ;;  %v8161_v23 = vld [vmem:[%s10372_s11 + $0xac] ss:$16 sps:$4 sm:$0xff]  }
 0x33c   :  { %v954_v30 = vsub.f32 %v952_v27, %v948_v26  ;;  %1304 = vmatprep.subr.bf16.mxu0 %v8086_v25  ;;  %v8159_v25 = vld [vmem:[%s10372_s11 + $0xa8] ss:$16 sps:$4 sm:$0xff]   ;;  %v8164_v26 = vld [vmem:[%s10372_s11 + $0xc4] ss:$16 sps:$4 sm:$0xff]   ;;  %v8167_v27 = vld [vmem:[%s10372_s11 + $0xcc] ss:$16 sps:$4 sm:$0xff]  }
 0x33e   :  { %8008 = vmatmul.mubr.msk.f32.vlgmr.msra.gmra.mrb[22].mxu1 %vm956_vm4, %v954_v30  ;;  %v8170_v30 = vld [vmem:[%s10372_s11 + $0xe4] ss:$16 sps:$4 sm:$0xff]  }
 0x33f   :  { %1344 = vmatpush1.bf16.msra.mxu1 %v8081_v28  ;;  %1305 = vmatpush1.bf16.msra.mxu0 %v8084_v29  ;;  %v8162_v28 = vld [vmem:[%s10372_s11 + $0xc0] ss:$16 sps:$4 sm:$0xff]   ;;  %v8165_v29 = vld [vmem:[%s10372_s11 + $0xc8] ss:$16 sps:$4 sm:$0xff]  }
 0x340   :  { %1345 = vmatprep.subr.bf16.mxu1 %v8089_v31  ;;  %1306 = vmatprep.subr.bf16.mxu0 %v8092_v32  ;;  %v8173_v31 = vld [vmem:[%s10372_s11 + $0xec] ss:$16 sps:$4 sm:$0xff]   ;;  %v8168_v32 = vld [vmem:[%s10372_s11 + $0xe0] ss:$16 sps:$4 sm:$0xff]  }
 0x341   :  { %1375 = vmatprep.mubr.bf16.mxu1 %v10390_v2 }
 0x343   :  { %1346 = vmatpush1.bf16.msra.mxu1 %v8087_v33  ;;  %1307 = vmatpush1.bf16.msra.mxu0 %v8090_v34  ;;  %v8171_v33 = vld [vmem:[%s10372_s11 + $0xe8] ss:$16 sps:$4 sm:$0xff]   ;;  %v1384_v34 = vld [vmem:[%s10373_s1] sm:$0xf] }
 0x344   :  { %1347 = vmatprep.subr.bf16.mxu1 %v8095_v35  ;;  %1308 = vmatprep.subr.bf16.mxu0 %v8098_v36  ;;  %v1385_v35 = vpack.c.bf16 %v1384_v34, %v1384_v34 }
 0x347   :  { %1348 = vmatpush1.bf16.msra.mxu1 %v8093_v37  ;;  %1309 = vmatpush1.bf16.msra.mxu0 %v8096_v38 }
 0x348   :  { %1349 = vmatprep.subr.bf16.mxu1 %v8101_v39  ;;  %1310 = vmatprep.subr.bf16.mxu0 %v8104_v40  ;;  %v1660_v39 = vld [vmem:[%s10374_s0] sm:$0xff] }
 0x34b   :  { %1350 = vmatpush1.bf16.msra.mxu1 %v8099_v41  ;;  %1311 = vmatpush1.bf16.msra.mxu0 %v8102_v42 }
 0x34c   :  { %1351 = vmatprep.subr.bf16.mxu1 %v8107_v43  ;;  %1312 = vmatprep.subr.bf16.mxu0 %v8110_v44 }
 0x34f   :  { %1352 = vmatpush1.bf16.msra.mxu1 %v8105_v45  ;;  %1313 = vmatpush1.bf16.msra.mxu0 %v8108_v46  ;;  %v1661_v45 = vld [vmem:[%s10374_s0 + $0x8] sm:$0xff] }
 0x350   :  { %1353 = vmatprep.subr.bf16.mxu1 %v8113_v47  ;;  %1314 = vmatprep.subr.bf16.mxu0 %v8116_v49 }
 0x353   :  { %1354 = vmatpush1.bf16.msra.mxu1 %v8111_v48  ;;  %1315 = vmatpush1.bf16.msra.mxu0 %v8114_v51 }
 0x354   :  { %1355 = vmatprep.subr.bf16.mxu1 %v8119_v50  ;;  %1316 = vmatprep.subr.bf16.mxu0 %v8122_v53 }
 0x357   :  { %1356 = vmatpush1.bf16.msra.mxu1 %v8117_v52  ;;  %1317 = vmatpush1.bf16.msra.mxu0 %v8120_v55 }
 0x358   :  { %1357 = vmatprep.subr.bf16.mxu1 %v8125_v54  ;;  %1578 = vmatprep.subr.bf16.mxu0 %v8128_v57 }
 0x35b   :  { %1358 = vmatpush1.bf16.msra.mxu1 %v8123_v56 }
 0x35c   :  { %1619 = vmatprep.subr.bf16.mxu1 %v8131_v58 }
 0x40d   :  { %v1029_v59 = vpop.f32.mrb[22].mxu0 }
 0x40e   :  { %v8004_v60 = vpop.f32.mrb[23].mxu0  ;;  %v1106_v61 = vmul.f32 %v1029_v59, %v8516_v0  ;;  %v8137_v0 = vld [vmem:[%s10372_s11 + $0x2c] ss:$16 sps:$4 sm:$0xff]  }
 0x411   :  { %v1102_v62 = vpop.f32.mrb[22].mxu1 }
 0x412   :  { %v1107_v63 = vadd.f32 %v1106_v61, %v1102_v62  ;;  %v8009_v3 = vpop.f32.mrb[23].mxu1 }
 0x413   :  { %v1686_v3 = vlaneseq }
 0x414   :  { %v1108_v4 = vmax.f32 %v1107_v63, 0.0 }
 0x416   :  { %v1109_v7 = vpack.c.bf16 %v1108_v4, %v1108_v4  ;;  %v1696_v4 = vshrl.u32 %v1686_v3, 7 }
 0x418   :  { %1335 = vmatmul.mubr.bf16.vlgmr.msra.gmra.mrb[24].mxu0 %v1109_v7  ;;  %1376 = vmatmul.mubr.bf16.vlgmr.msra.gmra.mrb[24].mxu1 %v1109_v7  ;;  %v8902_v7 = vsub.s32 1, %v1696_v4 }
 0x419   :  { %1579 = vmatpush1.bf16.msra.mxu0 %v8126_v5  ;;  %1620 = vmatpush1.bf16.msra.mxu1 %v8129_v6  ;;  %v8895_v5 = vand.u32 127, %v1686_v3  ;;  %v7578_v6 = vld [vmem:[%s10375_s21 + $0x4] sm:$0xf] }
 0x41a   :  { %1580 = vmatprep.subr.bf16.mxu0 %v8134_v8  ;;  %1621 = vmatprep.subr.bf16.mxu1 %v8137_v0  ;;  %v8908_v0 = vrot.slane %v7578_v6, %v8902_v7 }
 0x41b   :  { %1610 = vmatprep.mubr.bf16.mxu0 %v10390_v2  ;;  %1651 = vmatprep.mubr.bf16.mxu1 %v10390_v2  ;;  %vm1732_vm5 = vcmp.lt.s32.totalorder %v8895_v5, 16  ;;  %vm1688_vm6 = vcmp.lt.s32.totalorder %v8895_v5, 17  ;;  %vm1972_vm7 = vcmp.lt.s32.totalorder %v8895_v5, 15  ;;  %vm2119_vm8 = vcmp.lt.s32.totalorder %v8895_v5, 1 }
 0x41c   :  { %vm2408_vm9 = vcmp.lt.s32.totalorder %v8895_v5, 127  ;;  %vm2555_vm10 = vcmp.lt.s32.totalorder %v8895_v5, 113  ;;  %vm2702_vm11 = vcmp.lt.s32.totalorder %v8895_v5, 112  ;;  %vm2849_vm12 = vcmp.lt.s32.totalorder %v8895_v5, 111 }
 0x41d   :  { %1581 = vmatpush1.bf16.msra.mxu0 %v8132_v9  ;;  %1622 = vmatpush1.bf16.msra.mxu1 %v8135_v10  ;;  %v8910_v9 = vsub.s32 2, %v1696_v4 }
 0x41e   :  { %1582 = vmatprep.subr.bf16.mxu0 %v8140_v11  ;;  %1623 = vmatprep.subr.bf16.mxu1 %v8143_v12  ;;  %v8917_v12 = vsub.s32 0, %v1696_v4 }
 0x41f   :  { %v8915_v11 = vrot.slane %v7578_v6, %v8910_v9 }
 0x421   :  { %1583 = vmatpush1.bf16.msra.mxu0 %v8138_v13  ;;  %1624 = vmatpush1.bf16.msra.mxu1 %v8141_v14  ;;  %v8919_v13 = vsub.s32 3, %v1696_v4 }
 0x422   :  { %1584 = vmatprep.subr.bf16.mxu0 %v8146_v15  ;;  %1625 = vmatprep.subr.bf16.mxu1 %v8149_v1 }
 0x425   :  { %1585 = vmatpush1.bf16.msra.mxu0 %v8144_v16  ;;  %1626 = vmatpush1.bf16.msra.mxu1 %v8147_v17  ;;  %v8927_v16 = vrot.slane %v7578_v6, %v8917_v12  ;;  %v8930_v17 = vrot.slane %v7578_v6, %v8919_v13 }
 0x426   :  { %1586 = vmatprep.subr.bf16.mxu0 %v8152_v18  ;;  %1627 = vmatprep.subr.bf16.mxu1 %v8155_v19  ;;  %v1693_v18 = vld [vmem:[%s10375_s21] sm:$0xf] }
 0x429   :  { %1587 = vmatpush1.bf16.msra.mxu0 %v8150_v20  ;;  %1628 = vmatpush1.bf16.msra.mxu1 %v8153_v21 }
 0x42a   :  { %1588 = vmatprep.subr.bf16.mxu0 %v8158_v22  ;;  %1629 = vmatprep.subr.bf16.mxu1 %v8161_v23 }
 0x42d   :  { %1589 = vmatpush1.bf16.msra.mxu0 %v8156_v24  ;;  %1630 = vmatpush1.bf16.msra.mxu1 %v8159_v25  ;;  %v8945_v25 = vrot.slane %v1693_v18, %v8902_v7 }
 0x42e   :  { %1590 = vmatprep.subr.bf16.mxu0 %v8164_v26  ;;  %1631 = vmatprep.subr.bf16.mxu1 %v8167_v27 }
 0x431   :  { %1591 = vmatpush1.bf16.msra.mxu0 %v8162_v28  ;;  %1632 = vmatpush1.bf16.msra.mxu1 %v8165_v29 }
 0x432   :  { %1592 = vmatprep.subr.bf16.mxu0 %v8170_v30  ;;  %1633 = vmatprep.subr.bf16.mxu1 %v8173_v31 }
 0x435   :  { %1593 = vmatpush1.bf16.msra.mxu0 %v8168_v32  ;;  %1634 = vmatpush1.bf16.msra.mxu1 %v8171_v33  ;;  %v8956_v33 = vrot.slane %v1693_v18, %v8910_v9 }
 0x438   :  { %1611 = vmatmul.mubr.bf16.vlgmr.msra.gmra.mrb[28].mxu0 %v1385_v35  ;;  %1652 = vmatmul.mubr.bf16.vlgmr.msra.gmra.mrb[28].mxu1 %v1385_v35  ;;  %v2988_v35 = vld [vmem:[%s10376_s13] sm:$0xf] }
 0x439   :  { %1817 = vmatprep.mubr.bf16.mxu0 %v10390_v2  ;;  %1858 = vmatprep.mubr.bf16.mxu1 %v10390_v2 }
 0x4eb   :  { %v8749_v36 = vpop.f32.mrb[24].mxu0  ;;  %v8751_v37 = vpop.f32.mrb[24].mxu1 }
 0x4ec   :  { %10430 = vst [vmem:[#allocation2_spill] sm:$0xff] %v8751_v37  ;;  %v8753_v38 = vpop.f32.mrb[25].mxu0  ;;  %v8758_v40 = vpop.f32.mrb[25].mxu1 }
 0x4ed   :  { %10431 = vst [vmem:[#allocation3_spill] sm:$0xff] %v8753_v38  ;;  %10432 = vst [vmem:[#allocation4_spill] sm:$0xff] %v8758_v40  ;;  %v1666_v41 = vcombine.low %v8749_v36, %v8753_v38  ;;  %v1667_v42 = vcombine.low %v8751_v37, %v8758_v40  ;;  %v1340_v43 = vpop.f32.mrb[26].mxu0  ;;  %v1381_v44 = vpop.f32.mrb[26].mxu1 }
 0x4ee   :  { %v1341_v46 = vpop.f32.mrb[27].mxu0  ;;  %v1382_v47 = vpop.f32.mrb[27].mxu1 }
 0x4ef   :  { %v8767_v48 = vsub.f32 %v1660_v39, %v1666_v41  ;;  %v8769_v49 = vsub.f32 %v1661_v45, %v1667_v42  ;;  %v8964_v39 = vrot.slane %v1693_v18, %v8917_v12  ;;  %v8973_v45 = vrot.slane %v1693_v18, %v8919_v13  ;;  %v7588_v46 = vld [vmem:[%s10375_s21 + $0x8] sm:$0xf] }
 0x4f0   :  { %v8992_v4 = vrot.slane %v7588_v46, %v8902_v7 }
 0x4f1   :  { %1724 = vrot.lane.b32.xlu0 %v8767_v48, %s8222_s4  ;;  %v1674_v50 = vcombine.high %v8767_v48, %v8767_v48  ;;  %v1675_v51 = vcombine.high %v8769_v49, %v8769_v49 }
 0x4f3   :  { %1726 = vrot.lane.b32.xlu1 %v1674_v50, %s8222_s4 }
 0x4f5   :  { %1728 = vrot.lane.b32.xlu0 %v8769_v49, %s8222_s4 }
 0x4f7   :  { %1730 = vrot.lane.b32.xlu1 %v1675_v51, %s8222_s4 }
 0x4f9   :  { %1678 = vrot.lane.b32.xlu0 %v8767_v48, %s8223_s8 }
 0x4fb   :  { %1680 = vrot.lane.b32.xlu1 %v1674_v50, %s8223_s8 }
 0x4fd   :  { %1682 = vrot.lane.b32.xlu0 %v8769_v49, %s8223_s8 }
 0x4ff   :  { %1684 = vrot.lane.b32.xlu1 %v1675_v51, %s8223_s8 }
 0x501   :  { %1964 = vrot.lane.b32.xlu0 %v8767_v48, %s8224_s30 }
 0x503   :  { %1966 = vrot.lane.b32.xlu1 %v1674_v50, %s8224_s30 }
 0x505   :  { %1968 = vrot.lane.b32.xlu0 %v8769_v49, %s8224_s30 }
 0x507   :  { %1970 = vrot.lane.b32.xlu1 %v1675_v51, %s8224_s30 }
 0x509   :  { %2111 = vrot.lane.b32.xlu0 %v8767_v48, %s8215_s29 }
 0x50b   :  { %v8795_v52 = vpop.f32.mrb[28].mxu0  ;;  %v8797_v53 = vpop.f32.mrb[28].mxu1  ;;  %2113 = vrot.lane.b32.xlu1 %v1674_v50, %s8215_s29 }
 0x50c   :  { %v8802_v54 = vsub.f32 %v8795_v52, %v8749_v36  ;;  %v8806_v55 = vsub.f32 %v8797_v53, %v8751_v37  ;;  %v8808_v56 = vpop.f32.mrb[29].mxu0  ;;  %v8810_v57 = vpop.f32.mrb[29].mxu1 }
 0x50d   :  { %v8814_v58 = vsub.f32 %v8808_v56, %v8753_v38  ;;  %v8818_v59 = vsub.f32 %v8810_v57, %v8758_v40  ;;  %2115 = vrot.lane.b32.xlu0 %v8769_v49, %s8215_s29  ;;  %v1616_v60 = vpop.f32.mrb[30].mxu0  ;;  %v1657_v61 = vpop.f32.mrb[30].mxu1 }
 0x50e   :  { %v1617_v62 = vpop.f32.mrb[31].mxu0  ;;  %v1658_v63 = vpop.f32.mrb[31].mxu1 }
 0x50f   :  { %2117 = vrot.lane.b32.xlu1 %v1675_v51, %s8215_s29 }
 0x511   :  { %2400 = vrot.lane.b32.xlu0 %v8767_v48, %s8216_s2 }
 0x513   :  { %2402 = vrot.lane.b32.xlu1 %v1674_v50, %s8216_s2 }
 0x515   :  { %2404 = vrot.lane.b32.xlu0 %v8769_v49, %s8216_s2 }
 0x517   :  { %2406 = vrot.lane.b32.xlu1 %v1675_v51, %s8216_s2 }
 0x519   :  { %2547 = vrot.lane.b32.xlu0 %v8767_v48, %s8225_s3 }
 0x51b   :  { %2549 = vrot.lane.b32.xlu1 %v1674_v50, %s8225_s3 }
 0x51d   :  { %2551 = vrot.lane.b32.xlu0 %v8769_v49, %s8225_s3 }
 0x51f   :  { %2553 = vrot.lane.b32.xlu1 %v1675_v51, %s8225_s3 }
 0x521   :  { %2694 = vrot.lane.b32.xlu0 %v8767_v48, %s8226_s6 }
 0x523   :  { %2696 = vrot.lane.b32.xlu1 %v1674_v50, %s8226_s6 }
 0x525   :  { %2698 = vrot.lane.b32.xlu0 %v8769_v49, %s8226_s6 }
 0x527   :  { %2700 = vrot.lane.b32.xlu1 %v1675_v51, %s8226_s6 }
 0x529   :  { %2841 = vrot.lane.b32.xlu0 %v8767_v48, %s8227_s25 }
 0x52b   :  { %2843 = vrot.lane.b32.xlu1 %v1674_v50, %s8227_s25  ;;  %v4088_v50 = vld [vmem:[%s10377_s15] sm:$0xf] }
 0x52d   :  { %2845 = vrot.lane.b32.xlu0 %v8769_v49, %s8227_s25 }
 0x52f   :  { %2847 = vrot.lane.b32.xlu1 %v1675_v51, %s8227_s25  ;;  %v7579_v51 = vld [vmem:[%s10378_s12 + $0x2] sm:$0x3] }
 0x531   :  { %3023 = vrot.lane.b32.xlu0 %v8802_v54, %s8222_s4 }
 0x533   :  { %3025 = vrot.lane.b32.xlu1 %v8814_v58, %s8222_s4 }
 0x535   :  { %3027 = vrot.lane.b32.xlu0 %v8806_v55, %s8222_s4 }
 0x537   :  { %3029 = vrot.lane.b32.xlu1 %v8818_v59, %s8222_s4 }
 0x539   :  { %3002 = vrot.lane.b32.xlu0 %v8802_v54, %s8223_s8 }
 0x53b   :  { %3004 = vrot.lane.b32.xlu1 %v8814_v58, %s8223_s8 }
 0x53d   :  { %3006 = vrot.lane.b32.xlu0 %v8806_v55, %s8223_s8 }
 0x53f   :  { %3008 = vrot.lane.b32.xlu1 %v8818_v59, %s8223_s8 }
 0x541   :  { %3239 = vrot.lane.b32.xlu0 %v8802_v54, %s8224_s30 }
 0x543   :  { %3241 = vrot.lane.b32.xlu1 %v8814_v58, %s8224_s30 }
 0x545   :  { %3243 = vrot.lane.b32.xlu0 %v8806_v55, %s8224_s30 }
 0x547   :  { %3245 = vrot.lane.b32.xlu1 %v8818_v59, %s8224_s30 }
 0x549   :  { %3362 = vrot.lane.b32.xlu0 %v8802_v54, %s8215_s29 }
 0x54b   :  { %3364 = vrot.lane.b32.xlu1 %v8814_v58, %s8215_s29 }
 0x54d   :  { %3366 = vrot.lane.b32.xlu0 %v8806_v55, %s8215_s29 }
 0x54f   :  { %3368 = vrot.lane.b32.xlu1 %v8818_v59, %s8215_s29 }
 0x551   :  { %3596 = vrot.lane.b32.xlu0 %v8802_v54, %s8216_s2 }
 0x553   :  { %3598 = vrot.lane.b32.xlu1 %v8814_v58, %s8216_s2 }
 0x555   :  { %3600 = vrot.lane.b32.xlu0 %v8806_v55, %s8216_s2 }
 0x557   :  { %3602 = vrot.lane.b32.xlu1 %v8818_v59, %s8216_s2 }
 0x559   :  { %3719 = vrot.lane.b32.xlu0 %v8802_v54, %s8225_s3 }
 0x55b   :  { %3721 = vrot.lane.b32.xlu1 %v8814_v58, %s8225_s3 }
 0x55d   :  { %3723 = vrot.lane.b32.xlu0 %v8806_v55, %s8225_s3 }
 0x55f   :  { %3725 = vrot.lane.b32.xlu1 %v8818_v59, %s8225_s3 }
 0x561   :  { %3842 = vrot.lane.b32.xlu0 %v8802_v54, %s8226_s6 }
 0x563   :  { %v1725_v8 = vpop.permute.xlu0 %1724  ;;  %3844 = vrot.lane.b32.xlu1 %v8814_v58, %s8226_s6 }
 0x565   :  { %3846 = vrot.lane.b32.xlu0 %v8806_v55, %s8226_s6  ;;  %v1727_v10 = vpop.permute.xlu1 %1726 }
 0x566   :  { %v1735_v14 = vsel %vm1732_vm5, %v1725_v8, %v1727_v10 }
 0x567   :  { %v1761_v15 = vmul.f32 %v8908_v0, %v1735_v14  ;;  %v1729_v1 = vpop.permute.xlu0 %1728  ;;  %3848 = vrot.lane.b32.xlu1 %v8818_v59, %s8226_s6 }
 0x568   :  { %v1734_v19 = vsel %vm1732_vm5, %v1727_v10, %v1729_v1 }
 0x569   :  { %v1765_v20 = vpack.c.bf16 %v1761_v15, %v1761_v15  ;;  %v1762_v21 = vmul.f32 %v8915_v11, %v1734_v19  ;;  %3965 = vrot.lane.b32.xlu0 %v8802_v54, %s8227_s25  ;;  %v1731_v22 = vpop.permute.xlu1 %1730  ;;  %v7600_v15 = vld [vmem:[%s10375_s21 + $0x10] sm:$0xf] }
 0x56a   :  { %v1733_v23 = vsel %vm1732_vm5, %v1729_v1, %v1731_v22  ;;  %v1736_v24 = vsel %vm1732_vm5, %v1731_v22, %v1725_v8  ;;  %v9011_v22 = vrot.slane %v7588_v46, %v8917_v12 }
 0x56b   :  { %v1766_v26 = vpack.c.bf16 %v1762_v21, %v1762_v21  ;;  %v1760_v27 = vmul.f32 %v8927_v16, %v1736_v24  ;;  %v1763_v28 = vmul.f32 %v8930_v17, %v1733_v23  ;;  %v1679_v29 = vpop.permute.xlu0 %1678  ;;  %3967 = vrot.lane.b32.xlu1 %v8814_v58, %s8227_s25  ;;  %7580 = vmatprep.subr.msk.bf16.mxu0 %vm106_vm1, %v1765_v20 }
 0x56c   :  { %v9004_v20 = vrot.slane %v7588_v46, %v8910_v9  ;;  %v9014_v23 = vrot.slane %v7600_v15, %v8917_v12  ;;  %v9017_v24 = vrot.slane %v7600_v15, %v8902_v7 }
 0x56d   :  { %v1764_v30 = vpack.c.bf16 %v1760_v27, %v1760_v27  ;;  %v1767_v31 = vpack.c.bf16 %v1763_v28, %v1763_v28  ;;  %3969 = vrot.lane.b32.xlu0 %v8806_v55, %s8227_s25  ;;  %v1681_v32 = vpop.permute.xlu1 %1680  ;;  %v1780_v44 = vsel %vm106_vm1, %v1766_v26, 0 }
 0x56e   :  { %v1691_v34 = vsel %vm1688_vm6, %v1679_v29, %v1681_v32  ;;  %10433 = vst [vmem:[#allocation5_spill] sm:$0xff] %v9014_v23  ;;  %10434 = vst [vmem:[#allocation6_spill] sm:$0xff] %v9017_v24 }
 0x56f   :  { %v1716_v41 = vmul.f32 %v8945_v25, %v1691_v34  ;;  %v1683_v42 = vpop.permute.xlu0 %1682  ;;  %3971 = vrot.lane.b32.xlu1 %v8818_v59, %s8227_s25  ;;  %7582 = vmatprep.subr.msk.bf16.mxu1 %vm106_vm1, %v1767_v31  ;;  %v1774_v43 = vsel %vm106_vm1, %v1764_v30, 0  ;;  %v9024_v30 = vrot.slane %v7588_v46, %v8919_v13  ;;  %v7594_v31 = vld [vmem:[%s10375_s21 + $0xc] sm:$0xf]  ;;  %v1723_v34 = vld [vmem:[%s10378_s12] sm:$0x3]  ;;  %v9043_v46 = vcombine.low %v9014_v23, %v9017_v24 }
 0x570   :  { %v1690_v47 = vsel %vm1688_vm6, %v1681_v32, %v1683_v42  ;;  %1786 = vmatpush1.bf16.msra.mxu0 %v1774_v43  ;;  %1827 = vmatpush1.bf16.msra.mxu1 %v1780_v44 }
 0x571   :  { %v1720_v60 = vpack.c.bf16 %v1716_v41, %v1716_v41  ;;  %v1717_v61 = vmul.f32 %v8956_v33, %v1690_v47  ;;  %2991 = vperm.xlu0 %8076, %v2988_v35   ;;  %v1685_v62 = vpop.permute.xlu1 %1684  ;;  %v9035_v35 = vrot.slane %v7600_v15, %v8910_v9  ;;  %v9038_v41 = vrot.slane %v7600_v15, %v8919_v13 }
 0x572   :  { %v1689_v63 = vsel %vm1688_vm6, %v1683_v42, %v1685_v62  ;;  %v1692_v3 = vsel %vm1688_vm6, %v1685_v62, %v1679_v29  ;;  %10437 = vst [vmem:[#allocation9_spill] sm:$0xff] %v9043_v46 }
 0x573   :  { %v1721_v6 = vpack.c.bf16 %v1717_v61, %v1717_v61  ;;  %v1715_v8 = vmul.f32 %v8964_v39, %v1692_v3  ;;  %v1718_v10 = vmul.f32 %v8973_v45, %v1689_v63  ;;  %v1965_v14 = vpop.permute.xlu0 %1964  ;;  %4091 = vperm.xlu1 %8077, %v4088_v50   ;;  %7581 = vmatmul.mubr.msk.bf16.vlgmr.msra.gmra.mrb[32].mxu0 %vm102_vm2, %v7579_v51 }
 0x574   :  { %7583 = vmatmul.mubr.msk.bf16.vlgmr.msra.gmra.mrb[32].mxu1 %vm102_vm2, %v7579_v51  ;;  %7584 = vmatprep.subr.msk.bf16.mxu0 %vm106_vm1, %v1720_v60  ;;  %10435 = vst [vmem:[#allocation7_spill] sm:$0xff] %v9035_v35  ;;  %10436 = vst [vmem:[#allocation8_spill] sm:$0xff] %v9038_v41  ;;  %v9050_v51 = vrot.slane %v7594_v31, %v8902_v7  ;;  %v9054_v60 = vcombine.low %v9035_v35, %v9038_v41 }
 0x575   :  { %v1719_v1 = vpack.c.bf16 %v1715_v8, %v1715_v8  ;;  %v1722_v18 = vpack.c.bf16 %v1718_v10, %v1718_v10  ;;  %v1967_v19 = vpop.permute.xlu1 %1966  ;;  %1914 = vmatprep.mubr.bf16.mxu0 %v10390_v2  ;;  %1955 = vmatprep.mubr.bf16.mxu1 %v10390_v2  ;;  %v1877_v29 = vsel %vm106_vm1, %v1721_v6, 0 }
 0x576   :  { %v1975_v21 = vsel %vm1972_vm7, %v1965_v14, %v1967_v19  ;;  %10438 = vst [vmem:[#allocation10_spill] sm:$0xff] %v9054_v60 }
 0x577   :  { %v2001_v26 = vmul.f32 %v8992_v4, %v1975_v21  ;;  %v1969_v27 = vpop.permute.xlu0 %1968  ;;  %7586 = vmatprep.subr.msk.bf16.mxu1 %vm106_vm1, %v1722_v18  ;;  %v1871_v28 = vsel %vm106_vm1, %v1719_v1, 0  ;;  %v9070_v1 = vrot.slane %v7594_v31, %v8917_v12  ;;  %v2285_v18 = vmul.f32 %v9043_v46, %v8767_v48  ;;  %v7589_v48 = vld [vmem:[%s10378_s12 + $0x4] sm:$0x3] }
 0x578   :  { %v1974_v32 = vsel %vm1972_vm7, %v1967_v19, %v1969_v27  ;;  %1883 = vmatpush1.bf16.msra.mxu0 %v1871_v28  ;;  %1924 = vmatpush1.bf16.msra.mxu1 %v1877_v29  ;;  %v9076_v19 = vmul.f32 %v9054_v60, %v8769_v49  ;;  %v9083_v29 = vrot.slane %v7594_v31, %v8919_v13 }
 0x579   :  { %v2005_v42 = vpack.c.bf16 %v2001_v26, %v2001_v26  ;;  %v2002_v43 = vmul.f32 %v9004_v20, %v1974_v32  ;;  %v1971_v44 = vpop.permute.xlu1 %1970 }
 0x57a   :  { %v1973_v47 = vsel %vm1972_vm7, %v1969_v27, %v1971_v44  ;;  %v1976_v50 = vsel %vm1972_vm7, %v1971_v44, %v1965_v14  ;;  %v9064_v14 = vrot.slane %v7594_v31, %v8910_v9  ;;  %v2289_v44 = vcombine.high %v2285_v18, %v2285_v18 }
 0x57b   :  { %v2006_v61 = vpack.c.bf16 %v2002_v43, %v2002_v43  ;;  %v2000_v62 = vmul.f32 %v9011_v22, %v1976_v50  ;;  %v2003_v63 = vmul.f32 %v9024_v30, %v1973_v47  ;;  %v2112_v3 = vpop.permute.xlu0 %2111  ;;  %7585 = vmatmul.mubr.msk.bf16.vlgmr.msra.gmra.mrb[36].mxu0 %vm102_vm2, %v1723_v34  ;;  %7590 = vmatprep.subr.msk.bf16.mxu0 %vm106_vm1, %v2005_v42 }
 0x57c   :  { %7587 = vmatmul.mubr.msk.bf16.vlgmr.msra.gmra.mrb[36].mxu1 %vm102_vm2, %v1723_v34  ;;  %2057 = vmatprep.mubr.bf16.mxu0 %v10390_v2  ;;  %v2290_v47 = vcombine.high %v9076_v19, %v9076_v19 }
 0x57d   :  { %v2004_v6 = vpack.c.bf16 %v2000_v62, %v2000_v62  ;;  %v2007_v8 = vpack.c.bf16 %v2003_v63, %v2003_v63  ;;  %v2114_v10 = vpop.permute.xlu1 %2113  ;;  %2098 = vmatprep.mubr.bf16.mxu1 %v10390_v2  ;;  %v2020_v28 = vsel %vm106_vm1, %v2006_v61, 0 }
 0x57e   :  { %v2122_v15 = vsel %vm2119_vm8, %v2112_v3, %v2114_v10 }
 0x57f   :  { %v2148_v21 = vmul.f32 %v9050_v51, %v2122_v15  ;;  %v2116_v26 = vpop.permute.xlu0 %2115  ;;  %7592 = vmatprep.subr.msk.bf16.mxu1 %vm106_vm1, %v2007_v8  ;;  %v2014_v27 = vsel %vm106_vm1, %v2004_v6, 0 }
 0x580   :  { %v2121_v32 = vsel %vm2119_vm8, %v2114_v10, %v2116_v26  ;;  %2026 = vmatpush1.bf16.msra.mxu0 %v2014_v27  ;;  %2067 = vmatpush1.bf16.msra.mxu1 %v2020_v28  ;;  %v2293_v27 = vpack.c.bf16 %v2285_v18, %v2285_v18  ;;  %v2295_v28 = vpack.c.bf16 %v9076_v19, %v9076_v19 }
 0x581   :  { %v2152_v49 = vpack.c.bf16 %v2148_v21, %v2148_v21  ;;  %v2149_v34 = vmul.f32 %v9064_v14, %v2121_v32  ;;  %v2118_v42 = vpop.permute.xlu1 %2117  ;;  %v2294_v21 = vpack.c.bf16 %v2289_v44, %v2289_v44 }
 0x582   :  { %v2120_v43 = vsel %vm2119_vm8, %v2116_v26, %v2118_v42  ;;  %v2123_v31 = vsel %vm2119_vm8, %v2118_v42, %v2112_v3  ;;  %v7606_v3 = vld [vmem:[%s10375_s21 + $0x14] sm:$0xf]  ;;  %v2296_v26 = vpack.c.bf16 %v2290_v47, %v2290_v47 }
 0x583   :  { %v2153_v50 = vpack.c.bf16 %v2149_v34, %v2149_v34  ;;  %v2147_v61 = vmul.f32 %v9070_v1, %v2123_v31  ;;  %v2150_v62 = vmul.f32 %v9083_v29, %v2120_v43  ;;  %v2401_v63 = vpop.permute.xlu0 %2400  ;;  %7591 = vmatmul.mubr.msk.bf16.vlgmr.msra.gmra.mrb[40].mxu0 %vm102_vm2, %v7589_v48  ;;  %7596 = vmatprep.subr.msk.bf16.mxu0 %vm106_vm1, %v2152_v49  ;;  %v7595_v31 = vld [vmem:[%s10378_s12 + $0x6] sm:$0x3] }
 0x584   :  { %7593 = vmatmul.mubr.msk.bf16.vlgmr.msra.gmra.mrb[40].mxu1 %vm102_vm2, %v7589_v48  ;;  %2204 = vmatprep.mubr.bf16.mxu0 %v10390_v2  ;;  %v9108_v15 = vrot.slane %v7606_v3, %v8902_v7  ;;  %v9114_v32 = vrot.slane %v7606_v3, %v8917_v12  ;;  %v9120_v42 = vrot.slane %v7606_v3, %v8919_v13 }
 0x585   :  { %v2151_v6 = vpack.c.bf16 %v2147_v61, %v2147_v61  ;;  %v2154_v8 = vpack.c.bf16 %v2150_v62, %v2150_v62  ;;  %v2403_v10 = vpop.permute.xlu1 %2402  ;;  %2245 = vmatprep.mubr.bf16.mxu1 %v10390_v2  ;;  %v2167_v34 = vsel %vm106_vm1, %v2153_v50, 0  ;;  %v9127_v19 = vrot.slane %v7606_v3, %v8910_v9 }
 0x586   :  { %v2411_v43 = vsel %vm2408_vm9, %v2401_v63, %v2403_v10 }
 0x587   :  { %v2405_v48 = vpop.permute.xlu0 %2404  ;;  %7598 = vmatprep.subr.msk.bf16.mxu1 %vm106_vm1, %v2154_v8  ;;  %v2161_v49 = vsel %vm106_vm1, %v2151_v6, 0  ;;  %v2436_v62 = vmul.f32 %v9114_v32, %v2411_v43 }
 0x588   :  { %v2410_v18 = vsel %vm2408_vm9, %v2403_v10, %v2405_v48  ;;  %2173 = vmatpush1.bf16.msra.mxu0 %v2161_v49  ;;  %2214 = vmatpush1.bf16.msra.mxu1 %v2167_v34  ;;  %v2303_v10 = vsel %vm106_vm1, %v2293_v27, 0 }
 0x589   :  { %v2437_v44 = vmul.f32 %v9108_v15, %v2410_v18  ;;  %7602 = vmatprep.subr.msk.bf16.mxu0 %vm106_vm1, %v2294_v21  ;;  %7604 = vmatprep.subr.msk.bf16.mxu1 %vm106_vm1, %v2296_v26  ;;  %v2407_v47 = vpop.permute.xlu1 %2406  ;;  %v2309_v26 = vsel %vm106_vm1, %v2295_v28, 0  ;;  %v2440_v34 = vpack.c.bf16 %v2436_v62, %v2436_v62 }
 0x58a   :  { %v2409_v50 = vsel %vm2408_vm9, %v2405_v48, %v2407_v47  ;;  %v2412_v61 = vsel %vm2408_vm9, %v2407_v47, %v2401_v63  ;;  %v7612_v63 = vld [vmem:[%s10375_s21 + $0x18] sm:$0xf] }
 0x58b   :  { %v2441_v3 = vpack.c.bf16 %v2437_v44, %v2437_v44  ;;  %v2439_v6 = vmul.f32 %v9120_v42, %v2412_v61  ;;  %v2548_v8 = vpop.permute.xlu0 %2547  ;;  %7597 = vmatmul.mubr.msk.bf16.vlgmr.msra.gmra.mrb[44].mxu0 %vm102_vm2, %v7595_v31  ;;  %v2438_v21 = vmul.f32 %v9127_v19, %v2409_v50  ;;  %v9152_v27 = vrot.slane %v7612_v63, %v8902_v7  ;;  %v7601_v61 = vld [vmem:[%s10378_s12 + $0x8] sm:$0x3] }
 0x58c   :  { %7599 = vmatmul.mubr.msk.bf16.vlgmr.msra.gmra.mrb[44].mxu1 %vm102_vm2, %v7595_v31  ;;  %2315 = vmatpush1.bf16.msra.mxu0 %v2303_v10  ;;  %v9157_v28 = vrot.slane %v7612_v63, %v8917_v12  ;;  %v9161_v18 = vrot.slane %v7612_v63, %v8919_v13  ;;  %v9168_v50 = vrot.slane %v7612_v63, %v8910_v9 }
 0x58d   :  { %v2443_v48 = vpack.c.bf16 %v2439_v6, %v2439_v6  ;;  %2356 = vmatpush1.bf16.msra.mxu1 %v2309_v26  ;;  %7608 = vmatprep.subr.msk.bf16.mxu0 %vm106_vm1, %v2441_v3  ;;  %v2550_v49 = vpop.permute.xlu1 %2549  ;;  %v2442_v31 = vpack.c.bf16 %v2438_v21, %v2438_v21 }
 0x58e   :  { %2346 = vmatprep.mubr.bf16.mxu0 %v10390_v2  ;;  %2387 = vmatprep.mubr.bf16.mxu1 %v10390_v2  ;;  %v2558_v44 = vsel %vm2555_vm10, %v2548_v8, %v2550_v49 }
 0x58f   :  { %v2552_v43 = vpop.permute.xlu0 %2551  ;;  %7610 = vmatprep.subr.msk.bf16.mxu1 %vm106_vm1, %v2443_v48  ;;  %v2583_v21 = vmul.f32 %v9157_v28, %v2558_v44 }
 0x590   :  { %v2557_v47 = vsel %vm2555_vm10, %v2550_v49, %v2552_v43  ;;  %v2450_v49 = vsel %vm106_vm1, %v2440_v34, 0 }
 0x591   :  { %v2584_v62 = vmul.f32 %v9152_v27, %v2557_v47  ;;  %v2554_v3 = vpop.permute.xlu1 %2553 }
 0x592   :  { %v2556_v6 = vsel %vm2555_vm10, %v2552_v43, %v2554_v3  ;;  %v2559_v10 = vsel %vm2555_vm10, %v2554_v3, %v2548_v8  ;;  %v2456_v43 = vsel %vm106_vm1, %v2442_v31, 0  ;;  %v7618_v8 = vld [vmem:[%s10375_s21 + $0x1c] sm:$0xf] }
 0x593   :  { %v2588_v26 = vpack.c.bf16 %v2584_v62, %v2584_v62  ;;  %v2586_v48 = vmul.f32 %v9161_v18, %v2559_v10  ;;  %v2695_v63 = vpop.permute.xlu0 %2694  ;;  %7603 = vmatmul.mubr.msk.bf16.vlgmr.msra.gmra.mrb[48].mxu0 %vm102_vm2, %v7601_v61  ;;  %v2585_v2 = vmul.f32 %v9168_v50, %v2556_v6  ;;  %v9191_v34 = vrot.slane %v7618_v8, %v8902_v7 }
 0x594   :  { %7605 = vmatmul.mubr.msk.bf16.vlgmr.msra.gmra.mrb[48].mxu1 %vm102_vm2, %v7601_v61  ;;  %2462 = vmatpush1.bf16.msra.mxu0 %v2450_v49  ;;  %v10439_v62 = vmov 0   ;;  %v2587_v61 = vpack.c.bf16 %v2583_v21, %v2583_v21  ;;  %v9196_v31 = vrot.slane %v7618_v8, %v8917_v12  ;;  %v9200_v6 = vrot.slane %v7618_v8, %v8919_v13  ;;  %v7607_v21 = vld [vmem:[%s10378_s12 + $0xa] sm:$0x3] }
 0x595   :  { %v2590_v44 = vpack.c.bf16 %v2586_v48, %v2586_v48  ;;  %2503 = vmatpush1.bf16.msra.mxu1 %v2456_v43  ;;  %7614 = vmatprep.subr.msk.bf16.mxu0 %vm106_vm1, %v2588_v26  ;;  %v2697_v47 = vpop.permute.xlu1 %2696  ;;  %v2589_v10 = vpack.c.bf16 %v2585_v2, %v2585_v2  ;;  %v9207_v49 = vrot.slane %v7618_v8, %v8910_v9 }
 0x596   :  { %2493 = vmatprep.mubr.bf16.mxu0 %v10439_v62  ;;  %2534 = vmatprep.mubr.bf16.mxu1 %v10439_v62  ;;  %v2705_v26 = vsel %vm2702_vm11, %v2695_v63, %v2697_v47  ;;  %v2597_v37 = vsel %vm106_vm1, %v2587_v61, 0 }
 0x597   :  { %v2699_v3 = vpop.permute.xlu0 %2698  ;;  %7616 = vmatprep.subr.msk.bf16.mxu1 %vm106_vm1, %v2590_v44  ;;  %v2730_v46 = vmul.f32 %v9196_v31, %v2705_v26 }
 0x598   :  { %v2704_v48 = vsel %vm2702_vm11, %v2697_v47, %v2699_v3 }
 0x599   :  { %v2731_v43 = vmul.f32 %v9191_v34, %v2704_v48  ;;  %v2701_v44 = vpop.permute.xlu1 %2700 }
 0x59a   :  { %v2703_v60 = vsel %vm2702_vm11, %v2699_v3, %v2701_v44  ;;  %v2706_v2 = vsel %vm2702_vm11, %v2701_v44, %v2695_v63  ;;  %v2603_v3 = vsel %vm106_vm1, %v2589_v10, 0  ;;  %v7624_v63 = vld [vmem:[%s10375_s21 + $0x20] sm:$0xf] }
 0x59b   :  { %v2735_v40 = vpack.c.bf16 %v2731_v43, %v2731_v43  ;;  %v2733_v47 = vmul.f32 %v9200_v6, %v2706_v2  ;;  %v2842_v8 = vpop.permute.xlu0 %2841  ;;  %7609 = vmatmul.mubr.msk.bf16.vlgmr.msra.gmra.mrb[52].mxu0 %vm102_vm2, %v7607_v21  ;;  %v2732_v38 = vmul.f32 %v9207_v49, %v2703_v60  ;;  %v9230_v61 = vrot.slane %v7624_v63, %v8902_v7 }
 0x59c   :  { %7611 = vmatmul.mubr.msk.bf16.vlgmr.msra.gmra.mrb[52].mxu1 %vm102_vm2, %v7607_v21  ;;  %2609 = vmatpush1.bf16.msra.mxu0 %v2597_v37  ;;  %v2734_v37 = vpack.c.bf16 %v2730_v46, %v2730_v46  ;;  %v9235_v60 = vrot.slane %v7624_v63, %v8917_v12  ;;  %v9239_v21 = vrot.slane %v7624_v63, %v8919_v13  ;;  %v7613_v12 = vld [vmem:[%s10378_s12 + $0xc] sm:$0x3] }
 0x59d   :  { %v2737_v26 = vpack.c.bf16 %v2733_v47, %v2733_v47  ;;  %2650 = vmatpush1.bf16.msra.mxu1 %v2603_v3  ;;  %7620 = vmatprep.subr.msk.bf16.mxu0 %vm106_vm1, %v2735_v40  ;;  %v2844_v48 = vpop.permute.xlu1 %2843  ;;  %v2736_v43 = vpack.c.bf16 %v2732_v38, %v2732_v38  ;;  %v9246_v44 = vrot.slane %v7624_v63, %v8910_v9 }
 0x59e   :  { %2640 = vmatprep.mubr.bf16.mxu0 %v10439_v62  ;;  %2681 = vmatprep.mubr.bf16.mxu1 %v10439_v62  ;;  %10440 = vst [vmem:[#allocation11_spill] sm:$0xff] %v9239_v21  ;;  %v2852_v40 = vsel %vm2849_vm12, %v2842_v8, %v2844_v48  ;;  %v2744_v63 = vsel %vm106_vm1, %v2734_v37, 0 }
 0x59f   :  { %v2846_v10 = vpop.permute.xlu0 %2845  ;;  %7622 = vmatprep.subr.msk.bf16.mxu1 %vm106_vm1, %v2737_v26  ;;  %10441 = vst [vmem:[#allocation12_spill] sm:$0xff] %v9246_v44  ;;  %v2877_v47 = vmul.f32 %v9235_v60, %v2852_v40 }
 0x5a0   :  { %v2851_v7 = vsel %vm2849_vm12, %v2844_v48, %v2846_v10 }
 0x5a1   :  { %v2878_v46 = vmul.f32 %v9230_v61, %v2851_v7  ;;  %v2848_v2 = vpop.permute.xlu1 %2847  ;;  %v2881_v37 = vpack.c.bf16 %v2877_v47, %v2877_v47 }
 0x5a2   :  { %v2850_v13 = vsel %vm2849_vm12, %v2846_v10, %v2848_v2  ;;  %v2853_v38 = vsel %vm2849_vm12, %v2848_v2, %v2842_v8  ;;  %v2750_v10 = vsel %vm106_vm1, %v2736_v43, 0  ;;  %v7619_v43 = vld [vmem:[%s10378_s12 + $0xe] sm:$0x3] }
 0x5a3   :  { %v2882_v3 = vpack.c.bf16 %v2878_v46, %v2878_v46  ;;  %v2880_v26 = vmul.f32 %v9239_v21, %v2853_v38  ;;  %v3024_v9 = vpop.permute.xlu0 %3023  ;;  %7615 = vmatmul.mubr.msk.bf16.vlgmr.msra.gmra.mrb[56].mxu0 %vm102_vm2, %v7613_v12  ;;  %v2879_v48 = vmul.f32 %v9246_v44, %v2850_v13 }
 0x5a4   :  { %7617 = vmatmul.mubr.msk.bf16.vlgmr.msra.gmra.mrb[56].mxu1 %vm102_vm2, %v7613_v12  ;;  %2756 = vmatpush1.bf16.msra.mxu0 %v2744_v63 }
 0x5a5   :  { %v2884_v7 = vpack.c.bf16 %v2880_v26, %v2880_v26  ;;  %2797 = vmatpush1.bf16.msra.mxu1 %v2750_v10  ;;  %7626 = vmatprep.subr.msk.bf16.mxu0 %vm106_vm1, %v2882_v3  ;;  %v3026_v8 = vpop.permute.xlu1 %3025  ;;  %v2883_v12 = vpack.c.bf16 %v2879_v48, %v2879_v48 }
 0x5a6   :  { %v3033_v40 = vsel %vm1732_vm5, %v3024_v9, %v3026_v8  ;;  %2787 = vmatprep.mubr.bf16.mxu0 %v10439_v62  ;;  %2828 = vmatprep.mubr.bf16.mxu1 %v10439_v62 }
 0x5a7   :  { %v3036_v46 = vmul.f32 %v3033_v40, %v8908_v0  ;;  %v3028_v2 = vpop.permute.xlu0 %3027  ;;  %7628 = vmatprep.subr.msk.bf16.mxu1 %vm106_vm1, %v2884_v7  ;;  %v2891_v7 = vsel %vm106_vm1, %v2881_v37, 0 }
 0x5a8   :  { %v3032_v38 = vsel %vm1732_vm5, %v3026_v8, %v3028_v2  ;;  %v2897_v8 = vsel %vm106_vm1, %v2883_v12, 0  ;;  %v7625_v12 = vld [vmem:[%s10378_s12 + $0x10] sm:$0x3] }
 0x5a9   :  { %v3040_v13 = vpack.c.bf16 %v3036_v46, %v3036_v46  ;;  %v3030_v3 = vpop.permute.xlu1 %3029  ;;  %v3037_v40 = vmul.f32 %v3032_v38, %v8915_v11 }
 0x5aa   :  { %v3031_v26 = vsel %vm1732_vm5, %v3028_v2, %v3030_v3  ;;  %v3034_v47 = vsel %vm1732_vm5, %v3030_v3, %v3024_v9 }
 0x5ab   :  { %v3035_v63 = vmul.f32 %v3034_v47, %v8927_v16  ;;  %v3038_v10 = vmul.f32 %v3031_v26, %v8930_v17  ;;  %v3003_v48 = vpop.permute.xlu0 %3002  ;;  %7621 = vmatmul.mubr.msk.bf16.vlgmr.msra.gmra.mrb[60].mxu0 %vm102_vm2, %v7619_v43 }
 0x5ac   :  { %7623 = vmatmul.mubr.msk.bf16.vlgmr.msra.gmra.mrb[60].mxu1 %vm102_vm2, %v7619_v43  ;;  %2903 = vmatpush1.bf16.msra.mxu0 %v2891_v7  ;;  %v3041_v43 = vpack.c.bf16 %v3037_v40, %v3037_v40 }
 0x5ad   :  { %v3042_v46 = vpack.c.bf16 %v3038_v10, %v3038_v10  ;;  %2944 = vmatpush1.bf16.msra.mxu1 %v2897_v8  ;;  %7631 = vmatprep.subr.msk.bf16.mxu0 %vm106_vm1, %v3040_v13  ;;  %v3005_v9 = vpop.permute.xlu1 %3004  ;;  %v3039_v37 = vpack.c.bf16 %v3035_v63, %v3035_v63 }
 0x5ae   :  { %v3012_v2 = vsel %vm1688_vm6, %v3003_v48, %v3005_v9  ;;  %2934 = vmatprep.mubr.bf16.mxu0 %v10439_v62  ;;  %2975 = vmatprep.mubr.bf16.mxu1 %v10439_v62 }
 0x5af   :  { %v3015_v38 = vmul.f32 %v3012_v2, %v8945_v25  ;;  %v3007_v3 = vpop.permute.xlu0 %3006  ;;  %7633 = vmatprep.subr.msk.bf16.mxu1 %vm106_vm1, %v3042_v46  ;;  %v3049_v46 = vsel %vm106_vm1, %v3039_v37, 0 }
 0x5b0   :  { %v3011_v26 = vsel %vm1688_vm6, %v3005_v9, %v3007_v3  ;;  %v3055_v9 = vsel %vm106_vm1, %v3041_v43, 0  ;;  %v7630_v43 = vld [vmem:[%s10379_s14 + $0x2] sm:$0x3] }
 0x5b1   :  { %v3019_v13 = vpack.c.bf16 %v3015_v38, %v3015_v38  ;;  %v3009_v47 = vpop.permute.xlu1 %3008  ;;  %v3016_v2 = vmul.f32 %v3011_v26, %v8956_v33 }
 0x5b2   :  { %v3010_v10 = vsel %vm1688_vm6, %v3007_v3, %v3009_v47  ;;  %v3013_v63 = vsel %vm1688_vm6, %v3009_v47, %v3003_v48 }
 0x5b3   :  { %v3014_v7 = vmul.f32 %v3013_v63, %v8964_v39  ;;  %v3017_v8 = vmul.f32 %v3010_v10, %v8973_v45  ;;  %v3240_v40 = vpop.permute.xlu0 %3239  ;;  %7627 = vmatmul.mubr.msk.bf16.vlgmr.msra.gmra.mrb[64].mxu0 %vm102_vm2, %v7625_v12 }
 0x5b4   :  { %7629 = vmatmul.mubr.msk.bf16.vlgmr.msra.gmra.mrb[64].mxu1 %vm102_vm2, %v7625_v12  ;;  %3061 = vmatpush1.bf16.msra.mxu0 %v3049_v46  ;;  %v3020_v12 = vpack.c.bf16 %v3016_v2, %v3016_v2 }
 0x5b5   :  { %v3021_v38 = vpack.c.bf16 %v3017_v8, %v3017_v8  ;;  %3102 = vmatpush1.bf16.msra.mxu1 %v3055_v9  ;;  %7635 = vmatprep.subr.msk.bf16.mxu0 %vm106_vm1, %v3019_v13  ;;  %v3242_v48 = vpop.permute.xlu1 %3241  ;;  %v3018_v37 = vpack.c.bf16 %v3014_v7, %v3014_v7 }
 0x5b6   :  { %v3249_v3 = vsel %vm1972_vm7, %v3240_v40, %v3242_v48  ;;  %3092 = vmatprep.mubr.bf16.mxu0 %v10439_v62  ;;  %3133 = vmatprep.mubr.bf16.mxu1 %v10439_v62 }
 0x5b7   :  { %v3252_v26 = vmul.f32 %v3249_v3, %v8992_v4  ;;  %v3244_v47 = vpop.permute.xlu0 %3243  ;;  %7637 = vmatprep.subr.msk.bf16.mxu1 %vm106_vm1, %v3021_v38  ;;  %v3146_v38 = vsel %vm106_vm1, %v3018_v37, 0 }
 0x5b8   :  { %v3248_v10 = vsel %vm1972_vm7, %v3242_v48, %v3244_v47  ;;  %v3152_v48 = vsel %vm106_vm1, %v3020_v12, 0  ;;  %v3022_v12 = vld [vmem:[%s10379_s14] sm:$0x3] }
 0x5b9   :  { %v3256_v13 = vpack.c.bf16 %v3252_v26, %v3252_v26  ;;  %v3246_v63 = vpop.permute.xlu1 %3245  ;;  %v3253_v3 = vmul.f32 %v3248_v10, %v9004_v20 }
 0x5ba   :  { %v3247_v8 = vsel %vm1972_vm7, %v3244_v47, %v3246_v63  ;;  %v3250_v7 = vsel %vm1972_vm7, %v3246_v63, %v3240_v40 }
 0x5bb   :  { %v3251_v46 = vmul.f32 %v3250_v7, %v9011_v22  ;;  %v3254_v9 = vmul.f32 %v3247_v8, %v9024_v30  ;;  %v3363_v2 = vpop.permute.xlu0 %3362  ;;  %7632 = vmatmul.mubr.msk.bf16.vlgmr.msra.gmra.mrb[68].mxu0 %vm102_vm2, %v7630_v43 }
 0x5bc   :  { %7634 = vmatmul.mubr.msk.bf16.vlgmr.msra.gmra.mrb[68].mxu1 %vm102_vm2, %v7630_v43  ;;  %3158 = vmatpush1.bf16.msra.mxu0 %v3146_v38  ;;  %v3257_v43 = vpack.c.bf16 %v3253_v3, %v3253_v3 }
 0x5bd   :  { %v3258_v26 = vpack.c.bf16 %v3254_v9, %v3254_v9  ;;  %3199 = vmatpush1.bf16.msra.mxu1 %v3152_v48  ;;  %7640 = vmatprep.subr.msk.bf16.mxu0 %vm106_vm1, %v3256_v13  ;;  %v3365_v40 = vpop.permute.xlu1 %3364  ;;  %v3255_v37 = vpack.c.bf16 %v3251_v46, %v3251_v46 }
 0x5be   :  { %v3372_v47 = vsel %vm2119_vm8, %v3363_v2, %v3365_v40  ;;  %3189 = vmatprep.mubr.bf16.mxu0 %v10439_v62  ;;  %3230 = vmatprep.mubr.bf16.mxu1 %v10439_v62 }
 0x5bf   :  { %v3375_v10 = vmul.f32 %v3372_v47, %v9050_v51  ;;  %v3367_v63 = vpop.permute.xlu0 %3366  ;;  %7642 = vmatprep.subr.msk.bf16.mxu1 %vm106_vm1, %v3258_v26  ;;  %v3265_v26 = vsel %vm106_vm1, %v3255_v37, 0  ;;  %v3486_v37 = vmul.f32 %v8814_v58, %v9017_v24 }
 0x5c0   :  { %v3371_v8 = vsel %vm2119_vm8, %v3365_v40, %v3367_v63  ;;  %v3271_v40 = vsel %vm106_vm1, %v3257_v43, 0  ;;  %v7639_v43 = vld [vmem:[%s10379_s14 + $0x4] sm:$0x3] }
 0x5c1   :  { %v3379_v13 = vpack.c.bf16 %v3375_v10, %v3375_v10  ;;  %v3369_v7 = vpop.permute.xlu1 %3368  ;;  %v3376_v47 = vmul.f32 %v3371_v8, %v9064_v14 }
 0x5c2   :  { %v3370_v9 = vsel %vm2119_vm8, %v3367_v63, %v3369_v7  ;;  %v3373_v46 = vsel %vm2119_vm8, %v3369_v7, %v3363_v2 }
 0x5c3   :  { %v3374_v38 = vmul.f32 %v3373_v46, %v9070_v1  ;;  %v3377_v48 = vmul.f32 %v3370_v9, %v9083_v29  ;;  %v3597_v3 = vpop.permute.xlu0 %3596  ;;  %7636 = vmatmul.mubr.msk.bf16.vlgmr.msra.gmra.mrb[72].mxu0 %vm102_vm2, %v3022_v12 }
 0x5c4   :  { %7638 = vmatmul.mubr.msk.bf16.vlgmr.msra.gmra.mrb[72].mxu1 %vm102_vm2, %v3022_v12  ;;  %3277 = vmatpush1.bf16.msra.mxu0 %v3265_v26  ;;  %v3380_v12 = vpack.c.bf16 %v3376_v47, %v3376_v47 }
 0x5c5   :  { %v3381_v10 = vpack.c.bf16 %v3377_v48, %v3377_v48  ;;  %3318 = vmatpush1.bf16.msra.mxu1 %v3271_v40  ;;  %7645 = vmatprep.subr.msk.bf16.mxu0 %vm106_vm1, %v3379_v13  ;;  %v3599_v2 = vpop.permute.xlu1 %3598  ;;  %v3378_v63 = vpack.c.bf16 %v3374_v38, %v3374_v38  ;;  %v3488_v13 = vmul.f32 %v8818_v59, %v9038_v41 }
 0x5c6   :  { %3308 = vmatprep.mubr.bf16.mxu0 %v10439_v62  ;;  %3349 = vmatprep.mubr.bf16.mxu1 %v10439_v62  ;;  %v3490_v38 = vpack.c.bf16 %v3486_v37, %v3486_v37  ;;  %v3485_v48 = vmul.f32 %v8802_v54, %v9014_v23  ;;  %v3394_v26 = vsel %vm106_vm1, %v3380_v12, 0  ;;  %v3487_v59 = vmul.f32 %v8806_v55, %v9035_v35 }
 0x5c7   :  { %v3601_v7 = vpop.permute.xlu0 %3600  ;;  %7647 = vmatprep.subr.msk.bf16.mxu1 %vm106_vm1, %v3381_v10  ;;  %v3388_v46 = vsel %vm106_vm1, %v3378_v63, 0  ;;  %v3492_v47 = vpack.c.bf16 %v3488_v13, %v3488_v13  ;;  %v3606_v55 = vsel %vm2408_vm9, %v3597_v3, %v3599_v2 }
 0x5c8   :  { %v3605_v58 = vsel %vm2408_vm9, %v3599_v2, %v3601_v7  ;;  %v3489_v37 = vpack.c.bf16 %v3485_v48, %v3485_v48  ;;  %v3491_v13 = vpack.c.bf16 %v3487_v59, %v3487_v59 }
 0x5c9   :  { %v3603_v8 = vpop.permute.xlu1 %3602  ;;  %v3609_v54 = vmul.f32 %v3605_v58, %v9108_v15  ;;  %v3608_v58 = vmul.f32 %v3606_v55, %v9114_v32 }
 0x5ca   :  { %v3607_v40 = vsel %vm2408_vm9, %v3603_v8, %v3597_v3  ;;  %v3499_v48 = vsel %vm106_vm1, %v3489_v37, 0 }
 0x5cb   :  { %v3720_v9 = vpop.permute.xlu0 %3719  ;;  %7641 = vmatmul.mubr.msk.bf16.vlgmr.msra.gmra.mrb[76].mxu0 %vm102_vm2, %v7639_v43  ;;  %v3611_v12 = vmul.f32 %v3607_v40, %v9120_v42 }
 0x5cc   :  { %7643 = vmatmul.mubr.msk.bf16.vlgmr.msra.gmra.mrb[76].mxu1 %vm102_vm2, %v7639_v43  ;;  %3400 = vmatpush1.bf16.msra.mxu0 %v3388_v46  ;;  %v7644_v43 = vld [vmem:[%s10379_s14 + $0x6] sm:$0x3]  ;;  %v3604_v46 = vsel %vm2408_vm9, %v3601_v7, %v3603_v8  ;;  %v3505_v7 = vsel %vm106_vm1, %v3491_v13, 0 }
 0x5cd   :  { %3441 = vmatpush1.bf16.msra.mxu1 %v3394_v26  ;;  %7650 = vmatprep.subr.msk.bf16.mxu0 %vm106_vm1, %v3490_v38  ;;  %v3722_v10 = vpop.permute.xlu1 %3721  ;;  %v3613_v26 = vpack.c.bf16 %v3609_v54, %v3609_v54  ;;  %v3610_v3 = vmul.f32 %v3604_v46, %v9127_v19  ;;  %v3615_v2 = vpack.c.bf16 %v3611_v12, %v3611_v12  ;;  %v7649_v46 = vld [vmem:[%s10379_s14 + $0x8] sm:$0x3] }
 0x5ce   :  { %7652 = vmatprep.subr.msk.bf16.mxu1 %vm106_vm1, %v3492_v47  ;;  %3431 = vmatprep.mubr.bf16.mxu0 %v10439_v62  ;;  %v3612_v54 = vpack.c.bf16 %v3608_v58, %v3608_v58 }
 0x5cf   :  { %v3724_v63 = vpop.permute.xlu0 %3723  ;;  %3472 = vmatprep.mubr.bf16.mxu1 %v10439_v62  ;;  %v3614_v12 = vpack.c.bf16 %v3610_v3, %v3610_v3 }
 0x5d0   :  { %v3728_v40 = vsel %vm2555_vm10, %v3722_v10, %v3724_v63  ;;  %v3622_v3 = vsel %vm106_vm1, %v3612_v54, 0 }
 0x5d1   :  { %v3726_v38 = vpop.permute.xlu1 %3725  ;;  %v3732_v37 = vmul.f32 %v3728_v40, %v9152_v27 }
 0x5d2   :  { %v3730_v8 = vsel %vm2555_vm10, %v3726_v38, %v3720_v9 }
 0x5d3   :  { %v3843_v47 = vpop.permute.xlu0 %3842  ;;  %7646 = vmatmul.mubr.msk.bf16.vlgmr.msra.gmra.mrb[80].mxu0 %vm102_vm2, %v7644_v43  ;;  %v3734_v13 = vmul.f32 %v3730_v8, %v9161_v18 }
 0x5d4   :  { %7648 = vmatmul.mubr.msk.bf16.vlgmr.msra.gmra.mrb[80].mxu1 %vm102_vm2, %v7644_v43  ;;  %3511 = vmatpush1.bf16.msra.mxu0 %v3499_v48  ;;  %v3729_v43 = vsel %vm2555_vm10, %v3720_v9, %v3722_v10 }
 0x5d5   :  { %3552 = vmatpush1.bf16.msra.mxu1 %v3505_v7  ;;  %7655 = vmatprep.subr.msk.bf16.mxu0 %vm106_vm1, %v3613_v26  ;;  %v3845_v59 = vpop.permute.xlu1 %3844  ;;  %v3727_v26 = vsel %vm2555_vm10, %v3724_v63, %v3726_v38  ;;  %v3731_v58 = vmul.f32 %v3729_v43, %v9157_v28  ;;  %v3738_v10 = vpack.c.bf16 %v3734_v13, %v3734_v13  ;;  %v3628_v63 = vsel %vm106_vm1, %v3614_v12, 0 }
 0x5d6   :  { %7657 = vmatprep.subr.msk.bf16.mxu1 %vm106_vm1, %v3615_v2  ;;  %3542 = vmatprep.mubr.bf16.mxu0 %v10439_v62  ;;  %v3736_v2 = vpack.c.bf16 %v3732_v37, %v3732_v37  ;;  %v3733_v9 = vmul.f32 %v3727_v26, %v9168_v50  ;;  %v3852_v12 = vsel %vm2702_vm11, %v3843_v47, %v3845_v59 }
 0x5d7   :  { %v3847_v55 = vpop.permute.xlu0 %3846  ;;  %3583 = vmatprep.mubr.bf16.mxu1 %v10439_v62  ;;  %v3735_v54 = vpack.c.bf16 %v3731_v58, %v3731_v58  ;;  %v3854_v58 = vmul.f32 %v3852_v12, %v9196_v31  ;;  %v7659_v12 = vld [vmem:[%s10379_s14 + $0xc] sm:$0x3] }
 0x5d8   :  { %v3851_v7 = vsel %vm2702_vm11, %v3845_v59, %v3847_v55  ;;  %v3737_v43 = vpack.c.bf16 %v3733_v9, %v3733_v9 }
 0x5d9   :  { %v3849_v48 = vpop.permute.xlu1 %3848  ;;  %v3855_v37 = vmul.f32 %v3851_v7, %v9191_v34  ;;  %v3745_v9 = vsel %vm106_vm1, %v3735_v54, 0 }
 0x5da   :  { %v3853_v38 = vsel %vm2702_vm11, %v3849_v48, %v3843_v47  ;;  %v3850_v26 = vsel %vm2702_vm11, %v3847_v55, %v3849_v48  ;;  %v3751_v55 = vsel %vm106_vm1, %v3737_v43, 0 }
 0x5db   :  { %v3966_v40 = vpop.permute.xlu0 %3965  ;;  %7651 = vmatmul.mubr.msk.bf16.vlgmr.msra.gmra.mrb[84].mxu0 %vm102_vm2, %v7649_v46  ;;  %v3857_v13 = vmul.f32 %v3853_v38, %v9200_v6  ;;  %v3856_v47 = vmul.f32 %v3850_v26, %v9207_v49 }
 0x5dc   :  { %7653 = vmatmul.mubr.msk.bf16.vlgmr.msra.gmra.mrb[84].mxu1 %vm102_vm2, %v7649_v46  ;;  %3634 = vmatpush1.bf16.msra.mxu0 %v3622_v3  ;;  %v7654_v46 = vld [vmem:[%s10379_s14 + $0xa] sm:$0x3] }
 0x5dd   :  { %3675 = vmatpush1.bf16.msra.mxu1 %v3628_v63  ;;  %7660 = vmatprep.subr.msk.bf16.mxu0 %vm106_vm1, %v3736_v2  ;;  %v3968_v8 = vpop.permute.xlu1 %3967  ;;  %v3861_v59 = vpack.c.bf16 %v3857_v13, %v3857_v13  ;;  %v3858_v63 = vpack.c.bf16 %v3854_v58, %v3854_v58  ;;  %v3860_v54 = vpack.c.bf16 %v3856_v47, %v3856_v47 }
 0x5de   :  { %7662 = vmatprep.subr.msk.bf16.mxu1 %vm106_vm1, %v3738_v10  ;;  %3665 = vmatprep.mubr.bf16.mxu0 %v10439_v62  ;;  %v3859_v10 = vpack.c.bf16 %v3855_v37, %v3855_v37  ;;  %v3975_v37 = vsel %vm2849_vm12, %v3966_v40, %v3968_v8 }
 0x5df   :  { %3706 = vmatprep.mubr.bf16.mxu1 %v10439_v62  ;;  %v3970_v2 = vpop.permute.xlu0 %3969  ;;  %v3868_v58 = vsel %vm106_vm1, %v3858_v63, 0 }
 0x5e0   :  { %v3974_v7 = vsel %vm2849_vm12, %v3968_v8, %v3970_v2 }
 0x5e1   :  { %v3972_v3 = vpop.permute.xlu1 %3971  ;;  %v3978_v38 = vmul.f32 %v3974_v7, %v9230_v61  ;;  %v7669_v7 = vld [vmem:[%s10379_s14 + $0x10] sm:$0x3] }
 0x5e2   :  { %v3976_v48 = vsel %vm2849_vm12, %v3972_v3, %v3966_v40  ;;  %v3973_v13 = vsel %vm2849_vm12, %v3970_v2, %v3972_v3  ;;  %v3874_v40 = vsel %vm106_vm1, %v3860_v54, 0  ;;  %v7664_v3 = vld [vmem:[%s10379_s14 + $0xe] sm:$0x3] }
 0x5e3   :  { %7656 = vmatmul.mubr.msk.bf16.vlgmr.msra.gmra.mrb[88].mxu0 %vm102_vm2, %v7654_v46  ;;  %v3980_v43 = vmul.f32 %v3976_v48, %v9239_v21  ;;  %v3982_v26 = vpack.c.bf16 %v3978_v38, %v3978_v38 }
 0x5e4   :  { %7658 = vmatmul.mubr.msk.bf16.vlgmr.msra.gmra.mrb[88].mxu1 %vm102_vm2, %v7654_v46  ;;  %3757 = vmatpush1.bf16.msra.mxu0 %v3745_v9  ;;  %v3977_v46 = vmul.f32 %v3975_v37, %v9235_v60 }
 0x5e5   :  { %3798 = vmatpush1.bf16.msra.mxu1 %v3751_v55  ;;  %7665 = vmatprep.subr.msk.bf16.mxu0 %vm106_vm1, %v3859_v10  ;;  %v3979_v10 = vmul.f32 %v3973_v13, %v9246_v44  ;;  %v3984_v9 = vpack.c.bf16 %v3980_v43, %v3980_v43 }
 0x5e6   :  { %7667 = vmatprep.subr.msk.bf16.mxu1 %vm106_vm1, %v3861_v59  ;;  %3788 = vmatprep.mubr.bf16.mxu0 %v10439_v62  ;;  %v3981_v8 = vpack.c.bf16 %v3977_v46, %v3977_v46 }
 0x5e7   :  { %3829 = vmatprep.mubr.bf16.mxu1 %v10439_v62  ;;  %v3983_v2 = vpack.c.bf16 %v3979_v10, %v3979_v10 }
 0x5e8   :  { %v3991_v47 = vsel %vm106_vm1, %v3981_v8, 0 }
 0x5e9   :  { %v3997_v59 = vsel %vm106_vm1, %v3983_v2, 0 }
 0x5eb   :  { %7661 = vmatmul.mubr.msk.bf16.vlgmr.msra.gmra.mrb[92].mxu0 %vm102_vm2, %v7659_v12 }
 0x5ec   :  { %7663 = vmatmul.mubr.msk.bf16.vlgmr.msra.gmra.mrb[92].mxu1 %vm102_vm2, %v7659_v12  ;;  %3880 = vmatpush1.bf16.msra.mxu0 %v3868_v58 }
 0x5ed   :  { %3921 = vmatpush1.bf16.msra.mxu1 %v3874_v40  ;;  %7670 = vmatprep.subr.msk.bf16.mxu0 %vm106_vm1, %v3982_v26 }
 0x5ee   :  { %7672 = vmatprep.subr.msk.bf16.mxu1 %vm106_vm1, %v3984_v9  ;;  %3911 = vmatprep.mubr.bf16.mxu0 %v10439_v62 }
 0x5ef   :  { %3952 = vmatprep.mubr.bf16.mxu1 %v10439_v62 }
 0x5f3   :  { %7666 = vmatmul.mubr.msk.bf16.vlgmr.msra.gmra.mrb[96].mxu0 %vm102_vm2, %v7664_v3 }
 0x5f4   :  { %7668 = vmatmul.mubr.msk.bf16.vlgmr.msra.gmra.mrb[96].mxu1 %vm102_vm2, %v7664_v3  ;;  %4003 = vmatpush1.bf16.msra.mxu0 %v3991_v47 }
 0x5f5   :  { %4044 = vmatpush1.bf16.msra.mxu1 %v3997_v59  ;;  %4034 = vmatprep.mubr.bf16.mxu0 %v10439_v62 }
 0x5f6   :  { %4075 = vmatprep.mubr.bf16.mxu1 %v10439_v62 }
 0x5fb   :  { %7671 = vmatmul.mubr.msk.bf16.vlgmr.msra.gmra.mrb[100].mxu0 %vm102_vm2, %v7669_v7 }
 0x5fc   :  { %7673 = vmatmul.mubr.msk.bf16.vlgmr.msra.gmra.mrb[100].mxu1 %vm102_vm2, %v7669_v7  ;;  %4244 = vmatprep.mubr.bf16.mxu0 %v10439_v62 }
 0x5fd   :  { %4285 = vmatprep.mubr.bf16.mxu1 %v10439_v62 }
 0x646   :  { %v1819_v55 = vpop.f32.mrb[32].mxu0 }
 0x647   :  { %v1821_v48 = vpop.f32.mrb[33].mxu0  ;;  %v1860_v63 = vpop.f32.mrb[32].mxu1 }
 0x648   :  { %v1823_v38 = vpop.f32.mrb[34].mxu0  ;;  %v1862_v54 = vpop.f32.mrb[33].mxu1 }
 0x649   :  { %v1824_v37 = vpop.f32.mrb[35].mxu0  ;;  %v1864_v43 = vpop.f32.mrb[34].mxu1 }
 0x64a   :  { %v1865_v12 = vpop.f32.mrb[35].mxu1 }
 0x64e   :  { %v1916_v13 = vpop.f32.mrb[36].mxu0 }
 0x64f   :  { %v1917_v46 = vadd.f32 %v1916_v13, %v1819_v55  ;;  %v1957_v26 = vpop.f32.mrb[36].mxu1  ;;  %v1918_v58 = vpop.f32.mrb[37].mxu0 }
 0x650   :  { %v1958_v10 = vadd.f32 %v1957_v26, %v1860_v63  ;;  %v1919_v9 = vadd.f32 %v1918_v58, %v1821_v48  ;;  %v1959_v40 = vpop.f32.mrb[37].mxu1  ;;  %v1920_v8 = vpop.f32.mrb[38].mxu0 }
 0x651   :  { %v1960_v2 = vadd.f32 %v1959_v40, %v1862_v54  ;;  %v1921_v3 = vpop.f32.mrb[39].mxu0  ;;  %v1961_v47 = vpop.f32.mrb[38].mxu1 }
 0x652   :  { %v1962_v59 = vpop.f32.mrb[39].mxu1 }
 0x656   :  { %v2059_v7 = vpop.f32.mrb[40].mxu0 }
 0x657   :  { %v2107_v35 = vadd.f32 %v2059_v7, %v1917_v46  ;;  %v2100_v23 = vpop.f32.mrb[40].mxu1  ;;  %v2061_v38 = vpop.f32.mrb[41].mxu0 }
 0x658   :  { %v2109_v41 = vadd.f32 %v2100_v23, %v1958_v10  ;;  %v2108_v37 = vadd.f32 %v2061_v38, %v1919_v9  ;;  %v2102_v43 = vpop.f32.mrb[41].mxu1  ;;  %v2063_v12 = vpop.f32.mrb[42].mxu0 }
 0x659   :  { %v2110_v24 = vadd.f32 %v2102_v43, %v1960_v2  ;;  %v2064_v55 = vpop.f32.mrb[43].mxu0  ;;  %v2104_v13 = vpop.f32.mrb[42].mxu1 }
 0x65a   :  { %v2105_v44 = vpop.f32.mrb[43].mxu1 }
 0x65e   :  { %v2206_v63 = vpop.f32.mrb[44].mxu0 }
 0x65f   :  { %v2254_v48 = vadd.f32 %v2206_v63, %v2107_v35  ;;  %v2247_v26 = vpop.f32.mrb[44].mxu1  ;;  %v2208_v58 = vpop.f32.mrb[45].mxu0 }
 0x660   :  { %v2256_v54 = vadd.f32 %v2247_v26, %v2109_v41  ;;  %v2255_v40 = vadd.f32 %v2208_v58, %v2108_v37  ;;  %v2249_v8 = vpop.f32.mrb[45].mxu1  ;;  %v2210_v3 = vpop.f32.mrb[46].mxu0 }
 0x661   :  { %v2257_v47 = vadd.f32 %v2249_v8, %v2110_v24  ;;  %v2211_v46 = vpop.f32.mrb[47].mxu0  ;;  %v2251_v59 = vpop.f32.mrb[46].mxu1 }
 0x662   :  { %v2252_v7 = vpop.f32.mrb[47].mxu1 }
 0x666   :  { %v2348_v23 = vpop.f32.mrb[48].mxu0 }
 0x667   :  { %v2396_v10 = vadd.f32 %v2348_v23, %v2254_v48  ;;  %v2389_v9 = vpop.f32.mrb[48].mxu1  ;;  %v2350_v38 = vpop.f32.mrb[49].mxu0 }
 0x668   :  { %v2398_v2 = vadd.f32 %v2389_v9, %v2256_v54  ;;  %v2397_v43 = vadd.f32 %v2350_v38, %v2255_v40  ;;  %v2391_v12 = vpop.f32.mrb[49].mxu1  ;;  %v2352_v44 = vpop.f32.mrb[50].mxu0 }
 0x669   :  { %v2399_v55 = vadd.f32 %v2391_v12, %v2257_v47  ;;  %v2353_v35 = vpop.f32.mrb[51].mxu0  ;;  %v2393_v13 = vpop.f32.mrb[50].mxu1 }
 0x66a   :  { %v2394_v63 = vpop.f32.mrb[51].mxu1 }
 0x66e   :  { %v2495_v41 = vpop.f32.mrb[52].mxu0 }
 0x66f   :  { %v2543_v37 = vadd.f32 %v2495_v41, %v2396_v10  ;;  %v2536_v26 = vpop.f32.mrb[52].mxu1  ;;  %v2497_v58 = vpop.f32.mrb[53].mxu0 }
 0x670   :  { %v2545_v24 = vadd.f32 %v2536_v26, %v2398_v2  ;;  %v2544_v8 = vadd.f32 %v2497_v58, %v2397_v43  ;;  %v2538_v3 = vpop.f32.mrb[53].mxu1  ;;  %v2499_v46 = vpop.f32.mrb[54].mxu0 }
 0x671   :  { %v2546_v59 = vadd.f32 %v2538_v3, %v2399_v55  ;;  %v2500_v48 = vpop.f32.mrb[55].mxu0  ;;  %v2540_v7 = vpop.f32.mrb[54].mxu1 }
 0x672   :  { %v2541_v23 = vpop.f32.mrb[55].mxu1 }
 0x676   :  { %v2642_v54 = vpop.f32.mrb[56].mxu0 }
 0x677   :  { %v2690_v40 = vadd.f32 %v2642_v54, %v2543_v37  ;;  %v2683_v9 = vpop.f32.mrb[56].mxu1  ;;  %v2644_v38 = vpop.f32.mrb[57].mxu0 }
 0x678   :  { %v2692_v47 = vadd.f32 %v2683_v9, %v2545_v24  ;;  %v2691_v12 = vadd.f32 %v2644_v38, %v2544_v8  ;;  %v2685_v44 = vpop.f32.mrb[57].mxu1  ;;  %v2646_v35 = vpop.f32.mrb[58].mxu0 }
 0x679   :  { %v2693_v13 = vadd.f32 %v2685_v44, %v2546_v59  ;;  %v2647_v10 = vpop.f32.mrb[59].mxu0  ;;  %v2687_v63 = vpop.f32.mrb[58].mxu1 }
 0x67a   :  { %v2688_v41 = vpop.f32.mrb[59].mxu1  ;;  %v2992_v24 = vpop.permute.xlu0 %2991 }
 0x67e   :  { %v2789_v2 = vpop.f32.mrb[60].mxu0 }
 0x67f   :  { %v2837_v43 = vadd.f32 %v2789_v2, %v2690_v40  ;;  %v2830_v26 = vpop.f32.mrb[60].mxu1  ;;  %v2791_v58 = vpop.f32.mrb[61].mxu0 }
 0x680   :  { %v2839_v55 = vadd.f32 %v2830_v26, %v2692_v47  ;;  %v2838_v3 = vadd.f32 %v2791_v58, %v2691_v12  ;;  %v2832_v46 = vpop.f32.mrb[61].mxu1  ;;  %v2793_v48 = vpop.f32.mrb[62].mxu0 }
 0x681   :  { %v2840_v7 = vadd.f32 %v2832_v46, %v2693_v13  ;;  %v2794_v37 = vpop.f32.mrb[63].mxu0  ;;  %v2834_v23 = vpop.f32.mrb[62].mxu1 }
 0x682   :  { %v2835_v54 = vpop.f32.mrb[63].mxu1 }
 0x686   :  { %v2936_v8 = vpop.f32.mrb[64].mxu0 }
 0x687   :  { %v2984_v9 = vadd.f32 %v2936_v8, %v2837_v43  ;;  %v2977_v38 = vpop.f32.mrb[64].mxu1  ;;  %v2938_v59 = vpop.f32.mrb[65].mxu0 }
 0x688   :  { %v2986_v44 = vadd.f32 %v2977_v38, %v2839_v55  ;;  %v2985_v35 = vadd.f32 %v2938_v59, %v2838_v3  ;;  %v2979_v10 = vpop.f32.mrb[65].mxu1  ;;  %v2940_v63 = vpop.f32.mrb[66].mxu0 }
 0x689   :  { %v2994_v40 = vadd.f32 %v2992_v24, %v2984_v9  ;;  %v2987_v41 = vadd.f32 %v2979_v10, %v2840_v7  ;;  %v2941_v2 = vpop.f32.mrb[67].mxu0  ;;  %v2981_v47 = vpop.f32.mrb[66].mxu1 }
 0x68a   :  { %v2996_v12 = vadd.f32 %v2992_v24, %v2986_v44  ;;  %v2995_v26 = vadd.f32 %v2992_v24, %v2985_v35  ;;  %v2982_v58 = vpop.f32.mrb[67].mxu1 }
 0x68b   :  { %v4098_v13 = vsub.f32 0.0, %v2994_v40  ;;  %v2997_v46 = vadd.f32 %v2992_v24, %v2987_v41 }
 0x68c   :  { %v4100_v48 = vsub.f32 0.0, %v2996_v12  ;;  %v4099_v37 = vsub.f32 0.0, %v2995_v26 }
 0x68d   :  { %v4102_v23 = vmul.f32 1.442695, %v4098_v13  ;;  %v4101_v54 = vsub.f32 0.0, %v2997_v46 }
 0x68e   :  { %v4106_v43 = vmul.f32 1.442695, %v4100_v48  ;;  %v4104_v8 = vmul.f32 1.442695, %v4099_v37  ;;  %v3094_v21 = vpop.f32.mrb[68].mxu0 }
 0x68f   :  { %8176 = vpow2.f32 %v4102_v23  ;;  %v4108_v55 = vmul.f32 1.442695, %v4101_v54  ;;  %v3096_v3 = vpop.f32.mrb[69].mxu0  ;;  %v3135_v38 = vpop.f32.mrb[68].mxu1 }
 0x690   :  { %8178 = vpow2.f32 %v4106_v43  ;;  %v3098_v7 = vpop.f32.mrb[70].mxu0  ;;  %v3137_v9 = vpop.f32.mrb[69].mxu1 }
 0x691   :  { %8180 = vpow2.f32 %v4104_v8  ;;  %v3099_v59 = vpop.f32.mrb[71].mxu0  ;;  %v3139_v44 = vpop.f32.mrb[70].mxu1 }
 0x692   :  { %8182 = vpow2.f32 %v4108_v55  ;;  %v3140_v35 = vpop.f32.mrb[71].mxu1 }
 0x696   :  { %v3191_v24 = vpop.f32.mrb[72].mxu0 }
 0x697   :  { %v3192_v10 = vadd.f32 %v3191_v24, %v3094_v21  ;;  %v3232_v63 = vpop.f32.mrb[72].mxu1  ;;  %v3193_v40 = vpop.f32.mrb[73].mxu0 }
 0x698   :  { %v3233_v41 = vadd.f32 %v3232_v63, %v3135_v38  ;;  %v3194_v2 = vadd.f32 %v3193_v40, %v3096_v3  ;;  %v3234_v47 = vpop.f32.mrb[73].mxu1  ;;  %v3195_v12 = vpop.f32.mrb[74].mxu0 }
 0x699   :  { %v8177_v26 = vpop.eup %8176  ;;  %v3235_v58 = vadd.f32 %v3234_v47, %v3137_v9  ;;  %v3196_v13 = vpop.f32.mrb[75].mxu0 }
 0x69a   :  { %v3236_v46 = vpop.f32.mrb[74].mxu1  ;;  %v8179_v48 = vpop.eup %8178  ;;  %v4110_v37 = vadd.f32 1.0, %v8177_v26 }
 0x69b   :  { %v3237_v23 = vpop.f32.mrb[75].mxu1  ;;  %v8181_v54 = vpop.eup %8180  ;;  %v4112_v43 = vadd.f32 1.0, %v8179_v48 }
 0x69c   :  { %v8183_v8 = vpop.eup %8182  ;;  %8184 = vrcp.f32 %v4110_v37  ;;  %v4111_v55 = vadd.f32 1.0, %v8181_v54 }
 0x69d   :  { %8186 = vrcp.f32 %v4112_v43  ;;  %v4113_v21 = vadd.f32 1.0, %v8183_v8 }
 0x69e   :  { %8188 = vrcp.f32 %v4111_v55  ;;  %v3310_v7 = vpop.f32.mrb[76].mxu0 }
 0x69f   :  { %8190 = vrcp.f32 %v4113_v21  ;;  %v3358_v3 = vadd.f32 %v3310_v7, %v3192_v10  ;;  %v3351_v38 = vpop.f32.mrb[76].mxu1  ;;  %v3312_v59 = vpop.f32.mrb[77].mxu0 }
 0x6a0   :  { %v3360_v44 = vadd.f32 %v3351_v38, %v3233_v41  ;;  %v3359_v9 = vadd.f32 %v3312_v59, %v3194_v2  ;;  %v3353_v35 = vpop.f32.mrb[77].mxu1  ;;  %v3314_v24 = vpop.f32.mrb[78].mxu0 }
 0x6a1   :  { %v3361_v63 = vadd.f32 %v3353_v35, %v3235_v58  ;;  %v3315_v40 = vpop.f32.mrb[79].mxu0  ;;  %v3355_v47 = vpop.f32.mrb[78].mxu1  ;;  %v8208_v35 = vld [vmem:[%s10374_s0] sm:$0xff] }
 0x6a2   :  { %v3356_v12 = vpop.f32.mrb[79].mxu1 }
 0x6a6   :  { %v8185_v26 = vpop.eup %8184  ;;  %v3433_v13 = vpop.f32.mrb[80].mxu0 }
 0x6a7   :  { %v8187_v46 = vpop.eup %8186  ;;  %v3481_v48 = vadd.f32 %v3433_v13, %v3358_v3  ;;  %v3474_v37 = vpop.f32.mrb[80].mxu1  ;;  %v8209_v3 = vld [vmem:[%s10374_s0 + $0x8] sm:$0xff] }
 0x6a8   :  { %v3435_v23 = vpop.f32.mrb[81].mxu0  ;;  %v8189_v54 = vpop.eup %8188  ;;  %v3483_v43 = vadd.f32 %v3474_v37, %v3360_v44 }
 0x6a9   :  { %v3482_v8 = vadd.f32 %v3435_v23, %v3359_v9  ;;  %v3476_v10 = vpop.f32.mrb[81].mxu1  ;;  %v3437_v55 = vpop.f32.mrb[82].mxu0  ;;  %v4142_v41 = vcombine.low %v8185_v26, %v8189_v54 }
 0x6aa   :  { %v8191_v21 = vpop.eup %8190  ;;  %v3484_v2 = vadd.f32 %v3476_v10, %v3361_v63  ;;  %v3438_v7 = vpop.f32.mrb[83].mxu0 }
 0x6ab   :  { %v3478_v38 = vpop.f32.mrb[82].mxu1  ;;  %v4143_v58 = vcombine.low %v8187_v46, %v8191_v21  ;;  %v9489_v24 = vmul.f32 %v8208_v35, %v4142_v41  ;;  %7448 = vst [vmem:[%s10380_s23] sm:$0xff] %v4142_v41 }
 0x6ac   :  { %v3479_v59 = vpop.f32.mrb[83].mxu1 }
 0x6ad   :  { %7449 = vst [vmem:[%s10380_s23 + $0x8] sm:$0xff] %v4143_v58  ;;  %v9500_v44 = vmul.f32 %v8209_v3, %v4143_v58  ;;  %4175 = vrot.lane.b32.xlu0 %v9489_v24, %s8222_s4  ;;  %v9506_v9 = vcombine.high %v9489_v24, %v9489_v24 }
 0x6ae   :  { %v3544_v63 = vpop.f32.mrb[84].mxu0 }
 0x6af   :  { %4177 = vrot.lane.b32.xlu1 %v9506_v9, %s8222_s4  ;;  %v3592_v40 = vadd.f32 %v3544_v63, %v3481_v48  ;;  %v3585_v47 = vpop.f32.mrb[84].mxu1  ;;  %v3546_v12 = vpop.f32.mrb[85].mxu0  ;;  %v9514_v54 = vcombine.high %v9500_v44, %v9500_v44 }
 0x6b0   :  { %v3594_v26 = vadd.f32 %v3585_v47, %v3483_v43  ;;  %v3593_v13 = vadd.f32 %v3546_v12, %v3482_v8  ;;  %v3587_v46 = vpop.f32.mrb[85].mxu1  ;;  %v3548_v37 = vpop.f32.mrb[86].mxu0 }
 0x6b1   :  { %v3595_v23 = vadd.f32 %v3587_v46, %v3484_v2  ;;  %4179 = vrot.lane.b32.xlu0 %v9500_v44, %s8222_s4  ;;  %v3549_v10 = vpop.f32.mrb[87].mxu0  ;;  %v3589_v55 = vpop.f32.mrb[86].mxu1 }
 0x6b2   :  { %v3590_v21 = vpop.f32.mrb[87].mxu1 }
 0x6b3   :  { %4181 = vrot.lane.b32.xlu1 %v9514_v54, %s8222_s4 }
 0x6b5   :  { %4154 = vrot.lane.b32.xlu0 %v9489_v24, %s8223_s8 }
 0x6b6   :  { %v3667_v48 = vpop.f32.mrb[88].mxu0 }
 0x6b7   :  { %4156 = vrot.lane.b32.xlu1 %v9506_v9, %s8223_s8  ;;  %v3715_v43 = vadd.f32 %v3667_v48, %v3592_v40  ;;  %v3708_v8 = vpop.f32.mrb[88].mxu1  ;;  %v3669_v41 = vpop.f32.mrb[89].mxu0 }
 0x6b8   :  { %v3717_v2 = vadd.f32 %v3708_v8, %v3594_v26  ;;  %v3716_v7 = vadd.f32 %v3669_v41, %v3593_v13  ;;  %v3710_v38 = vpop.f32.mrb[89].mxu1  ;;  %v3671_v58 = vpop.f32.mrb[90].mxu0 }
 0x6b9   :  { %v3718_v59 = vadd.f32 %v3710_v38, %v3595_v23  ;;  %4158 = vrot.lane.b32.xlu0 %v9500_v44, %s8223_s8  ;;  %v3672_v35 = vpop.f32.mrb[91].mxu0  ;;  %v3712_v3 = vpop.f32.mrb[90].mxu1 }
 0x6ba   :  { %v3713_v63 = vpop.f32.mrb[91].mxu1 }
 0x6bb   :  { %4160 = vrot.lane.b32.xlu1 %v9514_v54, %s8223_s8 }
 0x6bd   :  { %4391 = vrot.lane.b32.xlu0 %v9489_v24, %s8224_s30 }
 0x6be   :  { %v3790_v40 = vpop.f32.mrb[92].mxu0 }
 0x6bf   :  { %4393 = vrot.lane.b32.xlu1 %v9506_v9, %s8224_s30  ;;  %v3838_v47 = vadd.f32 %v3790_v40, %v3715_v43  ;;  %v3831_v12 = vpop.f32.mrb[92].mxu1  ;;  %v3792_v26 = vpop.f32.mrb[93].mxu0 }
 0x6c0   :  { %v3840_v13 = vadd.f32 %v3831_v12, %v3717_v2  ;;  %v3839_v46 = vadd.f32 %v3792_v26, %v3716_v7  ;;  %v3833_v37 = vpop.f32.mrb[93].mxu1  ;;  %v3794_v23 = vpop.f32.mrb[94].mxu0 }
 0x6c1   :  { %v3841_v10 = vadd.f32 %v3833_v37, %v3718_v59  ;;  %4395 = vrot.lane.b32.xlu0 %v9500_v44, %s8224_s30  ;;  %v3795_v55 = vpop.f32.mrb[95].mxu0  ;;  %v3835_v21 = vpop.f32.mrb[94].mxu1 }
 0x6c2   :  { %v3836_v48 = vpop.f32.mrb[95].mxu1 }
 0x6c3   :  { %4397 = vrot.lane.b32.xlu1 %v9514_v54, %s8224_s30 }
 0x6c5   :  { %4514 = vrot.lane.b32.xlu0 %v9489_v24, %s8215_s29 }
 0x6c6   :  { %v3913_v43 = vpop.f32.mrb[96].mxu0 }
 0x6c7   :  { %4516 = vrot.lane.b32.xlu1 %v9506_v9, %s8215_s29  ;;  %v3961_v8 = vadd.f32 %v3913_v43, %v3838_v47  ;;  %v3954_v41 = vpop.f32.mrb[96].mxu1  ;;  %v3915_v2 = vpop.f32.mrb[97].mxu0 }
 0x6c8   :  { %v3963_v7 = vadd.f32 %v3954_v41, %v3840_v13  ;;  %v3962_v38 = vadd.f32 %v3915_v2, %v3839_v46  ;;  %v3956_v58 = vpop.f32.mrb[97].mxu1  ;;  %v3917_v59 = vpop.f32.mrb[98].mxu0 }
 0x6c9   :  { %v3964_v35 = vadd.f32 %v3956_v58, %v3841_v10  ;;  %4518 = vrot.lane.b32.xlu0 %v9500_v44, %s8215_s29  ;;  %v3918_v3 = vpop.f32.mrb[99].mxu0  ;;  %v3958_v63 = vpop.f32.mrb[98].mxu1 }
 0x6ca   :  { %v3959_v40 = vpop.f32.mrb[99].mxu1  ;;  %v4092_v47 = vpop.permute.xlu1 %4091 }
 0x6cb   :  { %4520 = vrot.lane.b32.xlu1 %v9514_v54, %s8215_s29 }
 0x6cd   :  { %4752 = vrot.lane.b32.xlu0 %v9489_v24, %s8216_s2 }
 0x6ce   :  { %v4036_v12 = vpop.f32.mrb[100].mxu0 }
 0x6cf   :  { %4754 = vrot.lane.b32.xlu1 %v9506_v9, %s8216_s2  ;;  %v4084_v26 = vadd.f32 %v4036_v12, %v3961_v8  ;;  %v4077_v13 = vpop.f32.mrb[100].mxu1  ;;  %v4038_v46 = vpop.f32.mrb[101].mxu0 }
 0x6d0   :  { %v4086_v37 = vadd.f32 %v4077_v13, %v3963_v7  ;;  %v4085_v23 = vadd.f32 %v4038_v46, %v3962_v38  ;;  %v4079_v10 = vpop.f32.mrb[101].mxu1  ;;  %v4040_v55 = vpop.f32.mrb[102].mxu0 }
 0x6d1   :  { %v4094_v21 = vadd.f32 %v4092_v47, %v4084_v26  ;;  %v4087_v48 = vadd.f32 %v4079_v10, %v3964_v35  ;;  %4756 = vrot.lane.b32.xlu0 %v9500_v44, %s8216_s2  ;;  %v4041_v43 = vpop.f32.mrb[103].mxu0  ;;  %v4081_v41 = vpop.f32.mrb[102].mxu1 }
 0x6d2   :  { %v4096_v2 = vadd.f32 %v4092_v47, %v4086_v37  ;;  %v4095_v58 = vadd.f32 %v4092_v47, %v4085_v23  ;;  %v4082_v59 = vpop.f32.mrb[103].mxu1 }
 0x6d3   :  { %v4118_v3 = vsub.f32 0.0, %v4094_v21  ;;  %v4097_v63 = vadd.f32 %v4092_v47, %v4087_v48  ;;  %4758 = vrot.lane.b32.xlu1 %v9514_v54, %s8216_s2 }
 0x6d4   :  { %v4120_v8 = vsub.f32 0.0, %v4096_v2  ;;  %v4119_v7 = vsub.f32 0.0, %v4095_v58 }
 0x6d5   :  { %v4122_v38 = vmul.f32 1.442695, %v4118_v3  ;;  %v4121_v40 = vsub.f32 0.0, %v4097_v63  ;;  %4875 = vrot.lane.b32.xlu0 %v9489_v24, %s8225_s3 }
 0x6d6   :  { %v4126_v35 = vmul.f32 1.442695, %v4120_v8  ;;  %v4124_v12 = vmul.f32 1.442695, %v4119_v7 }
 0x6d7   :  { %8192 = vpow2.f32 %v4122_v38  ;;  %v4128_v26 = vmul.f32 1.442695, %v4121_v40  ;;  %4877 = vrot.lane.b32.xlu1 %v9506_v9, %s8225_s3 }
 0x6d8   :  { %8194 = vpow2.f32 %v4126_v35 }
 0x6d9   :  { %8196 = vpow2.f32 %v4124_v12  ;;  %4879 = vrot.lane.b32.xlu0 %v9500_v44, %s8225_s3 }
 0x6da   :  { %8198 = vpow2.f32 %v4128_v26 }
 0x6db   :  { %4881 = vrot.lane.b32.xlu1 %v9514_v54, %s8225_s3 }
 0x6dd   :  { %4998 = vrot.lane.b32.xlu0 %v9489_v24, %s8226_s6 }
 0x6df   :  { %5000 = vrot.lane.b32.xlu1 %v9506_v9, %s8226_s6 }
 0x6e1   :  { %v8193_v47 = vpop.eup %8192  ;;  %5002 = vrot.lane.b32.xlu0 %v9500_v44, %s8226_s6 }
 0x6e2   :  { %v8195_v13 = vpop.eup %8194  ;;  %v4130_v46 = vadd.f32 1.0, %v8193_v47 }
 0x6e3   :  { %v8197_v37 = vpop.eup %8196  ;;  %v4132_v23 = vadd.f32 1.0, %v8195_v13  ;;  %5004 = vrot.lane.b32.xlu1 %v9514_v54, %s8226_s6 }
 0x6e4   :  { %v8199_v10 = vpop.eup %8198  ;;  %8200 = vrcp.f32 %v4130_v46  ;;  %v4131_v55 = vadd.f32 1.0, %v8197_v37 }
 0x6e5   :  { %8202 = vrcp.f32 %v4132_v23  ;;  %v4133_v21 = vadd.f32 1.0, %v8199_v10  ;;  %5121 = vrot.lane.b32.xlu0 %v9489_v24, %s8227_s25 }
 0x6e6   :  { %8204 = vrcp.f32 %v4131_v55 }
 0x6e7   :  { %8206 = vrcp.f32 %v4133_v21  ;;  %5123 = vrot.lane.b32.xlu1 %v9506_v9, %s8227_s25 }
 0x6e9   :  { %5125 = vrot.lane.b32.xlu0 %v9500_v44, %s8227_s25 }
 0x6eb   :  { %5127 = vrot.lane.b32.xlu1 %v9514_v54, %s8227_s25 }
 0x6ee   :  { %v8201_v48 = vpop.eup %8200 }
 0x6ef   :  { %v8203_v43 = vpop.eup %8202  ;;  %v9575_v41 = vmul.f32 %v8201_v48, %v8795_v52 }
 0x6f0   :  { %v8205_v2 = vpop.eup %8204  ;;  %v9578_v58 = vmul.f32 %v8203_v43, %v8797_v53 }
 0x6f1   :  { %v8207_v59 = vpop.eup %8206  ;;  %v9581_v3 = vmul.f32 %v8205_v2, %v8808_v56  ;;  %v7454_v9 = vcombine.low %v8201_v48, %v8205_v2  ;;  %5269 = vrot.lane.b32.xlu0 %v9575_v41, %s8222_s4 }
 0x6f2   :  { %v9586_v63 = vmul.f32 %v8207_v59, %v8810_v57  ;;  %v7455_v54 = vcombine.low %v8203_v43, %v8207_v59 }
 0x6f3   :  { %7458 = vst [vmem:[%s10381_s24] sm:$0xff] %v7454_v9  ;;  %5271 = vrot.lane.b32.xlu1 %v9581_v3, %s8222_s4 }
 0x6f4   :  { %7459 = vst [vmem:[%s10381_s24 + $0x8] sm:$0xff] %v7455_v54  ;;  %v7674_v54 = vld [vmem:[%s10382_s16 + $0x2] sm:$0x3] }
 0x6f5   :  { %5273 = vrot.lane.b32.xlu0 %v9578_v58, %s8222_s4 }
 0x6f7   :  { %5275 = vrot.lane.b32.xlu1 %v9586_v63, %s8222_s4 }
 0x6f9   :  { %5248 = vrot.lane.b32.xlu0 %v9575_v41, %s8223_s8 }
 0x6fb   :  { %5250 = vrot.lane.b32.xlu1 %v9581_v3, %s8223_s8 }
 0x6fd   :  { %5252 = vrot.lane.b32.xlu0 %v9578_v58, %s8223_s8 }
 0x6ff   :  { %5254 = vrot.lane.b32.xlu1 %v9586_v63, %s8223_s8 }
 0x701   :  { %5485 = vrot.lane.b32.xlu0 %v9575_v41, %s8224_s30 }
 0x703   :  { %5487 = vrot.lane.b32.xlu1 %v9581_v3, %s8224_s30 }
 0x705   :  { %5489 = vrot.lane.b32.xlu0 %v9578_v58, %s8224_s30 }
 0x707   :  { %5491 = vrot.lane.b32.xlu1 %v9586_v63, %s8224_s30 }
 0x709   :  { %5608 = vrot.lane.b32.xlu0 %v9575_v41, %s8215_s29 }
 0x70b   :  { %5610 = vrot.lane.b32.xlu1 %v9581_v3, %s8215_s29 }
 0x70d   :  { %5612 = vrot.lane.b32.xlu0 %v9578_v58, %s8215_s29 }
 0x70f   :  { %5614 = vrot.lane.b32.xlu1 %v9586_v63, %s8215_s29 }
 0x711   :  { %5842 = vrot.lane.b32.xlu0 %v9575_v41, %s8216_s2 }
 0x713   :  { %5844 = vrot.lane.b32.xlu1 %v9581_v3, %s8216_s2 }
 0x715   :  { %5846 = vrot.lane.b32.xlu0 %v9578_v58, %s8216_s2 }
 0x717   :  { %5848 = vrot.lane.b32.xlu1 %v9586_v63, %s8216_s2 }
 0x719   :  { %5965 = vrot.lane.b32.xlu0 %v9575_v41, %s8225_s3 }
 0x71b   :  { %5967 = vrot.lane.b32.xlu1 %v9581_v3, %s8225_s3 }
 0x71d   :  { %5969 = vrot.lane.b32.xlu0 %v9578_v58, %s8225_s3 }
 0x71f   :  { %v4176_v52 = vpop.permute.xlu0 %4175  ;;  %5971 = vrot.lane.b32.xlu1 %v9586_v63, %s8225_s3 }
 0x721   :  { %v4178_v53 = vpop.permute.xlu1 %4177  ;;  %6088 = vrot.lane.b32.xlu0 %v9575_v41, %s8226_s6 }
 0x722   :  { %v4185_v56 = vsel %vm1732_vm5, %v4176_v52, %v4178_v53 }
 0x723   :  { %v4188_v57 = vmul.f32 %v4185_v56, %v8908_v0  ;;  %v4180_v8 = vpop.permute.xlu0 %4179  ;;  %6090 = vrot.lane.b32.xlu1 %v9581_v3, %s8226_s6 }
 0x724   :  { %v4184_v7 = vsel %vm1732_vm5, %v4178_v53, %v4180_v8 }
 0x725   :  { %v4192_v38 = vpack.c.bf16 %v4188_v57, %v4188_v57  ;;  %v4189_v40 = vmul.f32 %v4184_v7, %v8915_v11  ;;  %v4182_v35 = vpop.permute.xlu1 %4181  ;;  %6092 = vrot.lane.b32.xlu0 %v9578_v58, %s8226_s6 }
 0x726   :  { %v4183_v12 = vsel %vm1732_vm5, %v4180_v8, %v4182_v35  ;;  %v4186_v26 = vsel %vm1732_vm5, %v4182_v35, %v4176_v52 }
 0x727   :  { %v4193_v47 = vpack.c.bf16 %v4189_v40, %v4189_v40  ;;  %v4187_v13 = vmul.f32 %v4186_v26, %v8927_v16  ;;  %v4190_v46 = vmul.f32 %v4183_v12, %v8930_v17  ;;  %v4155_v37 = vpop.permute.xlu0 %4154  ;;  %6094 = vrot.lane.b32.xlu1 %v9586_v63, %s8226_s6  ;;  %7675 = vmatprep.subr.msk.bf16.mxu0 %vm106_vm1, %v4192_v38 }
 0x729   :  { %v4191_v23 = vpack.c.bf16 %v4187_v13, %v4187_v13  ;;  %v4194_v10 = vpack.c.bf16 %v4190_v46, %v4190_v46  ;;  %v4157_v55 = vpop.permute.xlu1 %4156  ;;  %6211 = vrot.lane.b32.xlu0 %v9575_v41, %s8227_s25  ;;  %v4207_v59 = vsel %vm106_vm1, %v4193_v47, 0 }
 0x72a   :  { %v4164_v21 = vsel %vm1688_vm6, %v4155_v37, %v4157_v55 }
 0x72b   :  { %v4167_v48 = vmul.f32 %v4164_v21, %v8945_v25  ;;  %v4159_v43 = vpop.permute.xlu0 %4158  ;;  %6213 = vrot.lane.b32.xlu1 %v9581_v3, %s8227_s25  ;;  %7677 = vmatprep.subr.msk.bf16.mxu1 %vm106_vm1, %v4194_v10  ;;  %v4201_v2 = vsel %vm106_vm1, %v4191_v23, 0  ;;  %v10442_v23 = vld [vmem:[#allocation3_spill] sm:$0xff] }
 0x72c   :  { %v4163_v9 = vsel %vm1688_vm6, %v4157_v55, %v4159_v43  ;;  %4213 = vmatpush1.bf16.msra.mxu0 %v4201_v2  ;;  %4254 = vmatpush1.bf16.msra.mxu1 %v4207_v59 }
 0x72d   :  { %v4171_v52 = vpack.c.bf16 %v4167_v48, %v4167_v48  ;;  %v4168_v53 = vmul.f32 %v4163_v9, %v8956_v33  ;;  %v4161_v56 = vpop.permute.xlu1 %4160  ;;  %6215 = vrot.lane.b32.xlu0 %v9578_v58, %s8227_s25  ;;  %v4174_v48 = vld [vmem:[%s10382_s16] sm:$0x3] }
 0x72e   :  { %v4162_v57 = vsel %vm1688_vm6, %v4159_v43, %v4161_v56  ;;  %v4165_v8 = vsel %vm1688_vm6, %v4161_v56, %v4155_v37  ;;  %v10443_v9 = vld [vmem:[#allocation2_spill] sm:$0xff] }
 0x72f   :  { %v4172_v7 = vpack.c.bf16 %v4168_v53, %v4168_v53  ;;  %v4166_v38 = vmul.f32 %v4165_v8, %v8964_v39  ;;  %v4169_v40 = vmul.f32 %v4162_v57, %v8973_v45  ;;  %v4392_v35 = vpop.permute.xlu0 %4391  ;;  %6217 = vrot.lane.b32.xlu1 %v9586_v63, %s8227_s25  ;;  %7676 = vmatmul.mubr.msk.bf16.vlgmr.msra.gmra.mrb[104].mxu0 %vm102_vm2, %v7674_v54 }
 0x730   :  { %7678 = vmatmul.mubr.msk.bf16.vlgmr.msra.gmra.mrb[104].mxu1 %vm102_vm2, %v7674_v54  ;;  %7679 = vmatprep.subr.msk.bf16.mxu0 %vm106_vm1, %v4171_v52 }
 0x731   :  { %v4170_v12 = vpack.c.bf16 %v4166_v38, %v4166_v38  ;;  %v4173_v26 = vpack.c.bf16 %v4169_v40, %v4169_v40  ;;  %v4394_v47 = vpop.permute.xlu1 %4393  ;;  %6359 = vrot.lane.b32.xlu0 %v8749_v36, %s8222_s4  ;;  %4341 = vmatprep.mubr.bf16.mxu0 %v10439_v62  ;;  %v4304_v55 = vsel %vm106_vm1, %v4172_v7, 0  ;;  %v10444_v7 = vld [vmem:[#allocation4_spill] sm:$0xff] }
 0x732   :  { %v4401_v13 = vsel %vm1972_vm7, %v4392_v35, %v4394_v47  ;;  %4382 = vmatprep.mubr.bf16.mxu1 %v10439_v62 }
 0x733   :  { %v4404_v46 = vmul.f32 %v4401_v13, %v8992_v4  ;;  %v4396_v37 = vpop.permute.xlu0 %4395  ;;  %6361 = vrot.lane.b32.xlu1 %v10442_v23, %s8222_s4  ;;  %7681 = vmatprep.subr.msk.bf16.mxu1 %vm106_vm1, %v4173_v26  ;;  %v4298_v10 = vsel %vm106_vm1, %v4170_v12, 0  ;;  %v10445_v26 = vld [vmem:[#allocation9_spill] sm:$0xff]  ;;  %v10446_v13 = vld [vmem:[#allocation10_spill] sm:$0xff] }
 0x734   :  { %v4400_v21 = vsel %vm1972_vm7, %v4394_v47, %v4396_v37  ;;  %4310 = vmatpush1.bf16.msra.mxu0 %v4298_v10  ;;  %4351 = vmatpush1.bf16.msra.mxu1 %v4304_v55  ;;  %v4637_v47 = vmul.f32 %v9489_v24, %v10445_v26  ;;  %v7683_v24 = vld [vmem:[%s10382_s16 + $0x4] sm:$0x3] }
 0x735   :  { %v4408_v43 = vpack.c.bf16 %v4404_v46, %v4404_v46  ;;  %v4405_v2 = vmul.f32 %v4400_v21, %v9004_v20  ;;  %v4398_v59 = vpop.permute.xlu1 %4397  ;;  %6363 = vrot.lane.b32.xlu0 %v10443_v9, %s8222_s4  ;;  %v9731_v46 = vmul.f32 %v9500_v44, %v10446_v13 }
 0x736   :  { %v4399_v54 = vsel %vm1972_vm7, %v4396_v37, %v4398_v59  ;;  %v4402_v52 = vsel %vm1972_vm7, %v4398_v59, %v4392_v35  ;;  %v4645_v26 = vpack.c.bf16 %v4637_v47, %v4637_v47 }
 0x737   :  { %v4409_v53 = vpack.c.bf16 %v4405_v2, %v4405_v2  ;;  %v4403_v56 = vmul.f32 %v4402_v52, %v9011_v22  ;;  %v4406_v57 = vmul.f32 %v4399_v54, %v9024_v30  ;;  %v4515_v8 = vpop.permute.xlu0 %4514  ;;  %6365 = vrot.lane.b32.xlu1 %v10444_v7, %s8222_s4  ;;  %7680 = vmatmul.mubr.msk.bf16.vlgmr.msra.gmra.mrb[108].mxu0 %vm102_vm2, %v4174_v48 }
 0x738   :  { %7682 = vmatmul.mubr.msk.bf16.vlgmr.msra.gmra.mrb[108].mxu1 %vm102_vm2, %v4174_v48  ;;  %7684 = vmatprep.subr.msk.bf16.mxu0 %vm106_vm1, %v4408_v43  ;;  %v4641_v52 = vcombine.high %v4637_v47, %v4637_v47  ;;  %v7688_v47 = vld [vmem:[%s10382_s16 + $0x6] sm:$0x3] }
 0x739   :  { %v4407_v38 = vpack.c.bf16 %v4403_v56, %v4403_v56  ;;  %v4410_v40 = vpack.c.bf16 %v4406_v57, %v4406_v57  ;;  %v4517_v12 = vpop.permute.xlu1 %4516  ;;  %6338 = vrot.lane.b32.xlu0 %v8749_v36, %s8223_s8  ;;  %4460 = vmatprep.mubr.bf16.mxu0 %v10439_v62  ;;  %v4423_v21 = vsel %vm106_vm1, %v4409_v53, 0  ;;  %v4642_v53 = vcombine.high %v9731_v46, %v9731_v46 }
 0x73a   :  { %v4524_v35 = vsel %vm2119_vm8, %v4515_v8, %v4517_v12  ;;  %4501 = vmatprep.mubr.bf16.mxu1 %v10439_v62 }
 0x73b   :  { %v4527_v37 = vmul.f32 %v4524_v35, %v9050_v51  ;;  %v4519_v10 = vpop.permute.xlu0 %4518  ;;  %6340 = vrot.lane.b32.xlu1 %v10442_v23, %s8223_s8  ;;  %7686 = vmatprep.subr.msk.bf16.mxu1 %vm106_vm1, %v4410_v40  ;;  %v4417_v55 = vsel %vm106_vm1, %v4407_v38, 0 }
 0x73c   :  { %v4523_v48 = vsel %vm2119_vm8, %v4517_v12, %v4519_v10  ;;  %4429 = vmatpush1.bf16.msra.mxu0 %v4417_v55  ;;  %4470 = vmatpush1.bf16.msra.mxu1 %v4423_v21  ;;  %v4646_v55 = vpack.c.bf16 %v4641_v52, %v4641_v52  ;;  %v4648_v21 = vpack.c.bf16 %v4642_v53, %v4642_v53 }
 0x73d   :  { %v4531_v44 = vpack.c.bf16 %v4527_v37, %v4527_v37  ;;  %v4528_v43 = vmul.f32 %v4523_v48, %v9064_v14  ;;  %v4521_v2 = vpop.permute.xlu1 %4520  ;;  %6342 = vrot.lane.b32.xlu0 %v10443_v9, %s8223_s8 }
 0x73e   :  { %v4522_v59 = vsel %vm2119_vm8, %v4519_v10, %v4521_v2  ;;  %v4525_v54 = vsel %vm2119_vm8, %v4521_v2, %v4515_v8 }
 0x73f   :  { %v4532_v56 = vpack.c.bf16 %v4528_v43, %v4528_v43  ;;  %v4526_v57 = vmul.f32 %v4525_v54, %v9070_v1  ;;  %v4529_v38 = vmul.f32 %v4522_v59, %v9083_v29  ;;  %v4753_v40 = vpop.permute.xlu0 %4752  ;;  %6344 = vrot.lane.b32.xlu1 %v10444_v7, %s8223_s8  ;;  %7685 = vmatmul.mubr.msk.bf16.vlgmr.msra.gmra.mrb[112].mxu0 %vm102_vm2, %v7683_v24 }
 0x740   :  { %7687 = vmatmul.mubr.msk.bf16.vlgmr.msra.gmra.mrb[112].mxu1 %vm102_vm2, %v7683_v24  ;;  %7689 = vmatprep.subr.msk.bf16.mxu0 %vm106_vm1, %v4531_v44  ;;  %v4647_v44 = vpack.c.bf16 %v9731_v46, %v9731_v46 }
 0x741   :  { %v4530_v8 = vpack.c.bf16 %v4526_v57, %v4526_v57  ;;  %v4533_v12 = vpack.c.bf16 %v4529_v38, %v4529_v38  ;;  %v4755_v35 = vpop.permute.xlu1 %4754  ;;  %6575 = vrot.lane.b32.xlu0 %v8749_v36, %s8224_s30  ;;  %4583 = vmatprep.mubr.bf16.mxu0 %v10439_v62  ;;  %v4546_v10 = vsel %vm106_vm1, %v4532_v56, 0  ;;  %v4655_v57 = vsel %vm106_vm1, %v4645_v26, 0 }
 0x742   :  { %4624 = vmatprep.mubr.bf16.mxu1 %v10439_v62  ;;  %v4762_v48 = vsel %vm2408_vm9, %v4753_v40, %v4755_v35 }
 0x743   :  { %v4757_v13 = vpop.permute.xlu0 %4756  ;;  %6577 = vrot.lane.b32.xlu1 %v10442_v23, %s8224_s30  ;;  %7691 = vmatprep.subr.msk.bf16.mxu1 %vm106_vm1, %v4533_v12  ;;  %v4540_v37 = vsel %vm106_vm1, %v4530_v8, 0  ;;  %v4764_v52 = vmul.f32 %v4762_v48, %v9114_v32 }
 0x744   :  { %v4761_v24 = vsel %vm2408_vm9, %v4755_v35, %v4757_v13  ;;  %4552 = vmatpush1.bf16.msra.mxu0 %v4540_v37  ;;  %4593 = vmatpush1.bf16.msra.mxu1 %v4546_v10 }
 0x745   :  { %v4765_v43 = vmul.f32 %v4761_v24, %v9108_v15  ;;  %7694 = vmatprep.subr.msk.bf16.mxu0 %vm106_vm1, %v4646_v55  ;;  %7696 = vmatprep.subr.msk.bf16.mxu1 %vm106_vm1, %v4648_v21  ;;  %v4759_v2 = vpop.permute.xlu1 %4758  ;;  %v4768_v35 = vpack.c.bf16 %v4764_v52, %v4764_v52  ;;  %v7693_v55 = vld [vmem:[%s10382_s16 + $0x8] sm:$0x3] }
 0x746   :  { %v4760_v59 = vsel %vm2408_vm9, %v4757_v13, %v4759_v2  ;;  %v4763_v54 = vsel %vm2408_vm9, %v4759_v2, %v4753_v40  ;;  %6579 = vrot.lane.b32.xlu0 %v10443_v9, %s8224_s30  ;;  %v4661_v40 = vsel %vm106_vm1, %v4647_v44, 0 }
 0x747   :  { %v4769_v53 = vpack.c.bf16 %v4765_v43, %v4765_v43  ;;  %v4767_v46 = vmul.f32 %v4763_v54, %v9120_v42  ;;  %v4876_v56 = vpop.permute.xlu0 %4875  ;;  %6581 = vrot.lane.b32.xlu1 %v10444_v7, %s8224_s30  ;;  %7690 = vmatmul.mubr.msk.bf16.vlgmr.msra.gmra.mrb[116].mxu0 %vm102_vm2, %v7688_v47  ;;  %v4766_v38 = vmul.f32 %v4760_v59, %v9127_v19  ;;  %v4778_v54 = vsel %vm106_vm1, %v4768_v35, 0  ;;  %v7698_v35 = vld [vmem:[%s10382_s16 + $0xa] sm:$0x3] }
 0x748   :  { %7692 = vmatmul.mubr.msk.bf16.vlgmr.msra.gmra.mrb[116].mxu1 %vm102_vm2, %v7688_v47  ;;  %4667 = vmatpush1.bf16.msra.mxu0 %v4655_v57 }
 0x749   :  { %v4771_v8 = vpack.c.bf16 %v4767_v46, %v4767_v46  ;;  %4708 = vmatpush1.bf16.msra.mxu1 %v4661_v40  ;;  %7699 = vmatprep.subr.msk.bf16.mxu0 %vm106_vm1, %v4769_v53  ;;  %v4878_v12 = vpop.permute.xlu1 %4877  ;;  %v4770_v26 = vpack.c.bf16 %v4766_v38, %v4766_v38 }
 0x74a   :  { %6698 = vrot.lane.b32.xlu0 %v8749_v36, %s8215_s29  ;;  %4698 = vmatprep.mubr.bf16.mxu0 %v10439_v62  ;;  %v4885_v37 = vsel %vm2555_vm10, %v4876_v56, %v4878_v12 }
 0x74b   :  { %v4880_v13 = vpop.permute.xlu0 %4879  ;;  %6700 = vrot.lane.b32.xlu1 %v10442_v23, %s8215_s29  ;;  %7701 = vmatprep.subr.msk.bf16.mxu1 %vm106_vm1, %v4771_v8  ;;  %v4887_v44 = vmul.f32 %v4885_v37, %v9157_v28  ;;  %v4784_v53 = vsel %vm106_vm1, %v4770_v26, 0 }
 0x74c   :  { %v4884_v10 = vsel %vm2555_vm10, %v4878_v12, %v4880_v13  ;;  %4739 = vmatprep.mubr.bf16.mxu1 %v10439_v62 }
 0x74d   :  { %v4888_v21 = vmul.f32 %v4884_v10, %v9152_v27  ;;  %v4882_v48 = vpop.permute.xlu1 %4881  ;;  %v4891_v57 = vpack.c.bf16 %v4887_v44, %v4887_v44 }
 0x74e   :  { %v4883_v24 = vsel %vm2555_vm10, %v4880_v13, %v4882_v48  ;;  %v4886_v47 = vsel %vm2555_vm10, %v4882_v48, %v4876_v56  ;;  %6702 = vrot.lane.b32.xlu0 %v10443_v9, %s8215_s29 }
 0x74f   :  { %v4892_v43 = vpack.c.bf16 %v4888_v21, %v4888_v21  ;;  %v4890_v2 = vmul.f32 %v4886_v47, %v9161_v18  ;;  %v4999_v59 = vpop.permute.xlu0 %4998  ;;  %6704 = vrot.lane.b32.xlu1 %v10444_v7, %s8215_s29  ;;  %7695 = vmatmul.mubr.msk.bf16.vlgmr.msra.gmra.mrb[120].mxu0 %vm102_vm2, %v7693_v55  ;;  %v4889_v52 = vmul.f32 %v4883_v24, %v9168_v50  ;;  %v4901_v47 = vsel %vm106_vm1, %v4891_v57, 0  ;;  %v7703_v57 = vld [vmem:[%s10382_s16 + $0xc] sm:$0x3] }
 0x750   :  { %7697 = vmatmul.mubr.msk.bf16.vlgmr.msra.gmra.mrb[120].mxu1 %vm102_vm2, %v7693_v55  ;;  %4790 = vmatpush1.bf16.msra.mxu0 %v4778_v54 }
 0x751   :  { %v4894_v46 = vpack.c.bf16 %v4890_v2, %v4890_v2  ;;  %4831 = vmatpush1.bf16.msra.mxu1 %v4784_v53  ;;  %7704 = vmatprep.subr.msk.bf16.mxu0 %vm106_vm1, %v4892_v43  ;;  %v5001_v56 = vpop.permute.xlu1 %5000  ;;  %v4893_v40 = vpack.c.bf16 %v4889_v52, %v4889_v52 }
 0x752   :  { %6932 = vrot.lane.b32.xlu0 %v8749_v36, %s8216_s2  ;;  %4821 = vmatprep.mubr.bf16.mxu0 %v10439_v62  ;;  %v5008_v8 = vsel %vm2702_vm11, %v4999_v59, %v5001_v56 }
 0x753   :  { %v5003_v38 = vpop.permute.xlu0 %5002  ;;  %6934 = vrot.lane.b32.xlu1 %v10442_v23, %s8216_s2  ;;  %7706 = vmatprep.subr.msk.bf16.mxu1 %vm106_vm1, %v4894_v46  ;;  %v5010_v55 = vmul.f32 %v5008_v8, %v9196_v31  ;;  %v4907_v43 = vsel %vm106_vm1, %v4893_v40, 0 }
 0x754   :  { %v5007_v12 = vsel %vm2702_vm11, %v5001_v56, %v5003_v38  ;;  %4862 = vmatprep.mubr.bf16.mxu1 %v10439_v62 }
 0x755   :  { %v5011_v13 = vmul.f32 %v5007_v12, %v9191_v34  ;;  %v5005_v26 = vpop.permute.xlu1 %5004  ;;  %v5014_v54 = vpack.c.bf16 %v5010_v55, %v5010_v55  ;;  %v10448_v55 = vld [vmem:[#allocation12_spill] sm:$0xff] }
 0x756   :  { %v5006_v37 = vsel %vm2702_vm11, %v5003_v38, %v5005_v26  ;;  %v5009_v10 = vsel %vm2702_vm11, %v5005_v26, %v4999_v59  ;;  %6936 = vrot.lane.b32.xlu0 %v10443_v9, %s8216_s2  ;;  %v10447_v26 = vld [vmem:[#allocation11_spill] sm:$0xff] }
 0x757   :  { %v5015_v21 = vpack.c.bf16 %v5011_v13, %v5011_v13  ;;  %v5013_v48 = vmul.f32 %v5009_v10, %v9200_v6  ;;  %v5122_v24 = vpop.permute.xlu0 %5121  ;;  %6938 = vrot.lane.b32.xlu1 %v10444_v7, %s8216_s2  ;;  %7700 = vmatmul.mubr.msk.bf16.vlgmr.msra.gmra.mrb[124].mxu0 %vm102_vm2, %v7698_v35  ;;  %v5012_v44 = vmul.f32 %v5006_v37, %v9207_v49  ;;  %v5024_v10 = vsel %vm106_vm1, %v5014_v54, 0 }
 0x758   :  { %7702 = vmatmul.mubr.msk.bf16.vlgmr.msra.gmra.mrb[124].mxu1 %vm102_vm2, %v7698_v35  ;;  %4913 = vmatpush1.bf16.msra.mxu0 %v4901_v47 }
 0x759   :  { %v5017_v2 = vpack.c.bf16 %v5013_v48, %v5013_v48  ;;  %4954 = vmatpush1.bf16.msra.mxu1 %v4907_v43  ;;  %7709 = vmatprep.subr.msk.bf16.mxu0 %vm106_vm1, %v5015_v21  ;;  %v5124_v59 = vpop.permute.xlu1 %5123  ;;  %v5016_v53 = vpack.c.bf16 %v5012_v44, %v5012_v44 }
 0x75a   :  { %7055 = vrot.lane.b32.xlu0 %v8749_v36, %s8225_s3  ;;  %4944 = vmatprep.mubr.bf16.mxu0 %v10439_v62  ;;  %v5131_v46 = vsel %vm2849_vm12, %v5122_v24, %v5124_v59 }
 0x75b   :  { %v5126_v52 = vpop.permute.xlu0 %5125  ;;  %7057 = vrot.lane.b32.xlu1 %v10442_v23, %s8225_s3  ;;  %7711 = vmatprep.subr.msk.bf16.mxu1 %vm106_vm1, %v5017_v2  ;;  %v5133_v35 = vmul.f32 %v5131_v46, %v9235_v60  ;;  %v5030_v48 = vsel %vm106_vm1, %v5016_v53, 0  ;;  %v7708_v2 = vld [vmem:[%s10382_s16 + $0xe] sm:$0x3] }
 0x75c   :  { %v5130_v56 = vsel %vm2849_vm12, %v5124_v59, %v5126_v52  ;;  %4985 = vmatprep.mubr.bf16.mxu1 %v10439_v62 }
 0x75d   :  { %v5134_v38 = vmul.f32 %v5130_v56, %v9230_v61  ;;  %v5128_v40 = vpop.permute.xlu1 %5127  ;;  %v5137_v47 = vpack.c.bf16 %v5133_v35, %v5133_v35 }
 0x75e   :  { %v5129_v8 = vsel %vm2849_vm12, %v5126_v52, %v5128_v40  ;;  %v5132_v12 = vsel %vm2849_vm12, %v5128_v40, %v5122_v24  ;;  %7059 = vrot.lane.b32.xlu0 %v10443_v9, %s8225_s3 }
 0x75f   :  { %v5138_v13 = vpack.c.bf16 %v5134_v38, %v5134_v38  ;;  %v5136_v37 = vmul.f32 %v5132_v12, %v10447_v26  ;;  %7061 = vrot.lane.b32.xlu1 %v10444_v7, %s8225_s3  ;;  %7705 = vmatmul.mubr.msk.bf16.vlgmr.msra.gmra.mrb[128].mxu0 %vm102_vm2, %v7703_v57  ;;  %v5135_v21 = vmul.f32 %v5129_v8, %v10448_v55  ;;  %v5147_v53 = vsel %vm106_vm1, %v5137_v47, 0 }
 0x760   :  { %7707 = vmatmul.mubr.msk.bf16.vlgmr.msra.gmra.mrb[128].mxu1 %vm102_vm2, %v7703_v57  ;;  %5036 = vmatpush1.bf16.msra.mxu0 %v5024_v10 }
 0x761   :  { %v5140_v24 = vpack.c.bf16 %v5136_v37, %v5136_v37  ;;  %5077 = vmatpush1.bf16.msra.mxu1 %v5030_v48  ;;  %7714 = vmatprep.subr.msk.bf16.mxu0 %vm106_vm1, %v5138_v13  ;;  %v5139_v43 = vpack.c.bf16 %v5135_v21, %v5135_v21  ;;  %v7713_v48 = vld [vmem:[%s10382_s16 + $0x10] sm:$0x3] }
 0x762   :  { %7178 = vrot.lane.b32.xlu0 %v8749_v36, %s8226_s6  ;;  %5067 = vmatprep.mubr.bf16.mxu0 %v10439_v62 }
 0x763   :  { %7180 = vrot.lane.b32.xlu1 %v10442_v23, %s8226_s6  ;;  %7716 = vmatprep.subr.msk.bf16.mxu1 %vm106_vm1, %v5140_v24  ;;  %v5270_v44 = vpop.permute.xlu0 %5269  ;;  %v5153_v56 = vsel %vm106_vm1, %v5139_v43, 0 }
 0x764   :  { %5108 = vmatprep.mubr.bf16.mxu1 %v10439_v62 }
 0x765   :  { %v5272_v59 = vpop.permute.xlu1 %5271 }
 0x766   :  { %v5279_v54 = vsel %vm1732_vm5, %v5270_v44, %v5272_v59  ;;  %7182 = vrot.lane.b32.xlu0 %v10443_v9, %s8226_s6 }
 0x767   :  { %v5282_v52 = vmul.f32 %v5279_v54, %v8908_v0  ;;  %7184 = vrot.lane.b32.xlu1 %v10444_v7, %s8226_s6  ;;  %7710 = vmatmul.mubr.msk.bf16.vlgmr.msra.gmra.mrb[132].mxu0 %vm102_vm2, %v7708_v2  ;;  %v5274_v46 = vpop.permute.xlu0 %5273 }
 0x768   :  { %7712 = vmatmul.mubr.msk.bf16.vlgmr.msra.gmra.mrb[132].mxu1 %vm102_vm2, %v7708_v2  ;;  %5159 = vmatpush1.bf16.msra.mxu0 %v5147_v53  ;;  %v5278_v57 = vsel %vm1732_vm5, %v5272_v59, %v5274_v46  ;;  %v7428_v53 = vld [vmem:[%s10383_s19] sm:$0xf] }
 0x769   :  { %v5286_v38 = vpack.c.bf16 %v5282_v52, %v5282_v52  ;;  %5200 = vmatpush1.bf16.msra.mxu1 %v5153_v56  ;;  %v5283_v40 = vmul.f32 %v5278_v57, %v8915_v11  ;;  %v5276_v8 = vpop.permute.xlu1 %5275  ;;  %5190 = vmatprep.mubr.bf16.mxu0 %v10439_v62 }
 0x76a   :  { %v5277_v12 = vsel %vm1732_vm5, %v5274_v46, %v5276_v8  ;;  %v5280_v35 = vsel %vm1732_vm5, %v5276_v8, %v5270_v44  ;;  %7301 = vrot.lane.b32.xlu0 %v8749_v36, %s8227_s25  ;;  %5231 = vmatprep.mubr.bf16.mxu1 %v10439_v62 }
 0x76b   :  { %v5287_v13 = vpack.c.bf16 %v5283_v40, %v5283_v40  ;;  %v5281_v37 = vmul.f32 %v5280_v35, %v8927_v16  ;;  %v5284_v10 = vmul.f32 %v5277_v12, %v8930_v17  ;;  %7303 = vrot.lane.b32.xlu1 %v10442_v23, %s8227_s25  ;;  %7719 = vmatprep.subr.msk.bf16.mxu0 %vm106_vm1, %v5286_v38  ;;  %v5249_v21 = vpop.permute.xlu0 %5248 }
 0x76d   :  { %v5285_v24 = vpack.c.bf16 %v5281_v37, %v5281_v37  ;;  %v5288_v47 = vpack.c.bf16 %v5284_v10, %v5284_v10  ;;  %v5251_v44 = vpop.permute.xlu1 %5250  ;;  %v5301_v2 = vsel %vm106_vm1, %v5287_v13, 0  ;;  %v7718_v10 = vld [vmem:[%s10384_s17 + $0x2] sm:$0x3] }
 0x76e   :  { %v5258_v43 = vsel %vm1688_vm6, %v5249_v21, %v5251_v44  ;;  %7305 = vrot.lane.b32.xlu0 %v10443_v9, %s8227_s25 }
 0x76f   :  { %v5261_v59 = vmul.f32 %v5258_v43, %v8945_v25  ;;  %7307 = vrot.lane.b32.xlu1 %v10444_v7, %s8227_s25  ;;  %7715 = vmatmul.mubr.msk.bf16.vlgmr.msra.gmra.mrb[136].mxu0 %vm102_vm2, %v7713_v48  ;;  %v5253_v54 = vpop.permute.xlu0 %5252  ;;  %v5295_v52 = vsel %vm106_vm1, %v5285_v24, 0 }
 0x770   :  { %7717 = vmatmul.mubr.msk.bf16.vlgmr.msra.gmra.mrb[136].mxu1 %vm102_vm2, %v7713_v48  ;;  %7721 = vmatprep.subr.msk.bf16.mxu1 %vm106_vm1, %v5288_v47  ;;  %v5257_v46 = vsel %vm1688_vm6, %v5251_v44, %v5253_v54 }
 0x771   :  { %v5265_v56 = vpack.c.bf16 %v5261_v59, %v5261_v59  ;;  %v5262_v57 = vmul.f32 %v5257_v46, %v8956_v33  ;;  %5307 = vmatpush1.bf16.msra.mxu0 %v5295_v52  ;;  %5348 = vmatpush1.bf16.msra.mxu1 %v5301_v2  ;;  %v5255_v38 = vpop.permute.xlu1 %5254 }
 0x772   :  { %v5256_v40 = vsel %vm1688_vm6, %v5253_v54, %v5255_v38  ;;  %v5259_v8 = vsel %vm1688_vm6, %v5255_v38, %v5249_v21  ;;  %7431 = vperm.xlu0 %8076, %v7428_v53   ;;  %5338 = vmatprep.mubr.bf16.mxu0 %v10439_v62 }
 0x773   :  { %v5266_v12 = vpack.c.bf16 %v5262_v57, %v5262_v57  ;;  %v5260_v35 = vmul.f32 %v5259_v8, %v8964_v39  ;;  %v5263_v13 = vmul.f32 %v5256_v40, %v8973_v45  ;;  %7723 = vmatprep.subr.msk.bf16.mxu0 %vm106_vm1, %v5265_v56  ;;  %v5486_v37 = vpop.permute.xlu0 %5485  ;;  %5379 = vmatprep.mubr.bf16.mxu1 %v10439_v62 }
 0x775   :  { %v5264_v48 = vpack.c.bf16 %v5260_v35, %v5260_v35  ;;  %v5267_v24 = vpack.c.bf16 %v5263_v13, %v5263_v13  ;;  %v5488_v21 = vpop.permute.xlu1 %5487  ;;  %v5398_v44 = vsel %vm106_vm1, %v5266_v12, 0  ;;  %v5268_v35 = vld [vmem:[%s10384_s17] sm:$0x3] }
 0x776   :  { %v5495_v47 = vsel %vm1972_vm7, %v5486_v37, %v5488_v21 }
 0x777   :  { %v5498_v43 = vmul.f32 %v5495_v47, %v8992_v4  ;;  %7720 = vmatmul.mubr.msk.bf16.vlgmr.msra.gmra.mrb[140].mxu0 %vm102_vm2, %v7718_v10  ;;  %7725 = vmatprep.subr.msk.bf16.mxu1 %vm106_vm1, %v5267_v24  ;;  %v5490_v2 = vpop.permute.xlu0 %5489  ;;  %v5392_v59 = vsel %vm106_vm1, %v5264_v48, 0 }
 0x778   :  { %7722 = vmatmul.mubr.msk.bf16.vlgmr.msra.gmra.mrb[140].mxu1 %vm102_vm2, %v7718_v10  ;;  %v5494_v54 = vsel %vm1972_vm7, %v5488_v21, %v5490_v2  ;;  %5404 = vmatpush1.bf16.msra.mxu0 %v5392_v59 }
 0x779   :  { %v5502_v52 = vpack.c.bf16 %v5498_v43, %v5498_v43  ;;  %v5499_v53 = vmul.f32 %v5494_v54, %v9004_v20  ;;  %5445 = vmatpush1.bf16.msra.mxu1 %v5398_v44  ;;  %v5492_v46 = vpop.permute.xlu1 %5491  ;;  %5435 = vmatprep.mubr.bf16.mxu0 %v10439_v62 }
 0x77a   :  { %v5493_v56 = vsel %vm1972_vm7, %v5490_v2, %v5492_v46  ;;  %v5496_v57 = vsel %vm1972_vm7, %v5492_v46, %v5486_v37  ;;  %5476 = vmatprep.mubr.bf16.mxu1 %v10439_v62 }
 0x77b   :  { %v5503_v38 = vpack.c.bf16 %v5499_v53, %v5499_v53  ;;  %v5497_v40 = vmul.f32 %v5496_v57, %v9011_v22  ;;  %v5500_v8 = vmul.f32 %v5493_v56, %v9024_v30  ;;  %7728 = vmatprep.subr.msk.bf16.mxu0 %vm106_vm1, %v5502_v52  ;;  %v5609_v12 = vpop.permute.xlu0 %5608 }
 0x77d   :  { %v5501_v13 = vpack.c.bf16 %v5497_v40, %v5497_v40  ;;  %v5504_v10 = vpack.c.bf16 %v5500_v8, %v5500_v8  ;;  %v5611_v48 = vpop.permute.xlu1 %5610  ;;  %v5517_v24 = vsel %vm106_vm1, %v5503_v38, 0  ;;  %v10449_v40 = vld [vmem:[#allocation6_spill] sm:$0xff] }
 0x77e   :  { %v5618_v37 = vsel %vm2119_vm8, %v5609_v12, %v5611_v48  ;;  %v5732_v8 = vmul.f32 %v9581_v3, %v10449_v40 }
 0x77f   :  { %v5621_v21 = vmul.f32 %v5618_v37, %v9050_v51  ;;  %7724 = vmatmul.mubr.msk.bf16.vlgmr.msra.gmra.mrb[144].mxu0 %vm102_vm2, %v5268_v35  ;;  %7730 = vmatprep.subr.msk.bf16.mxu1 %vm106_vm1, %v5504_v10  ;;  %v5613_v47 = vpop.permute.xlu0 %5612  ;;  %v5511_v44 = vsel %vm106_vm1, %v5501_v13, 0  ;;  %v10450_v13 = vld [vmem:[#allocation8_spill] sm:$0xff] }
 0x780   :  { %7726 = vmatmul.mubr.msk.bf16.vlgmr.msra.gmra.mrb[144].mxu1 %vm102_vm2, %v5268_v35  ;;  %v5617_v43 = vsel %vm2119_vm8, %v5611_v48, %v5613_v47  ;;  %5523 = vmatpush1.bf16.msra.mxu0 %v5511_v44  ;;  %v7727_v35 = vld [vmem:[%s10384_s17 + $0x4] sm:$0x3]  ;;  %v5736_v3 = vpack.c.bf16 %v5732_v8, %v5732_v8  ;;  %v10451_v44 = vld [vmem:[#allocation5_spill] sm:$0xff]  ;;  %v7732_v8 = vld [vmem:[%s10384_s17 + $0x6] sm:$0x3] }
 0x781   :  { %v5625_v2 = vpack.c.bf16 %v5621_v21, %v5621_v21  ;;  %v5622_v59 = vmul.f32 %v5617_v43, %v9064_v14  ;;  %5564 = vmatpush1.bf16.msra.mxu1 %v5517_v24  ;;  %v5615_v54 = vpop.permute.xlu1 %5614  ;;  %5554 = vmatprep.mubr.bf16.mxu0 %v10439_v62  ;;  %v5731_v43 = vmul.f32 %v9575_v41, %v10451_v44 }
 0x782   :  { %v5616_v52 = vsel %vm2119_vm8, %v5613_v47, %v5615_v54  ;;  %v5619_v53 = vsel %vm2119_vm8, %v5615_v54, %v5609_v12  ;;  %5595 = vmatprep.mubr.bf16.mxu1 %v10439_v62  ;;  %v5734_v12 = vmul.f32 %v9586_v63, %v10450_v13 }
 0x783   :  { %v5626_v46 = vpack.c.bf16 %v5622_v59, %v5622_v59  ;;  %v5620_v56 = vmul.f32 %v5619_v53, %v9070_v1  ;;  %v5623_v57 = vmul.f32 %v5616_v52, %v9083_v29  ;;  %7733 = vmatprep.subr.msk.bf16.mxu0 %vm106_vm1, %v5625_v2  ;;  %v5843_v38 = vpop.permute.xlu0 %5842  ;;  %v10452_v59 = vld [vmem:[#allocation7_spill] sm:$0xff] }
 0x784   :  { %v5738_v2 = vpack.c.bf16 %v5734_v12, %v5734_v12  ;;  %v5733_v54 = vmul.f32 %v9578_v58, %v10452_v59 }
 0x785   :  { %v5624_v10 = vpack.c.bf16 %v5620_v56, %v5620_v56  ;;  %v5627_v48 = vpack.c.bf16 %v5623_v57, %v5623_v57  ;;  %v5845_v37 = vpop.permute.xlu1 %5844  ;;  %v5640_v24 = vsel %vm106_vm1, %v5626_v46, 0  ;;  %v5735_v57 = vpack.c.bf16 %v5731_v43, %v5731_v43 }
 0x786   :  { %v5852_v58 = vsel %vm2408_vm9, %v5843_v38, %v5845_v37 }
 0x787   :  { %7729 = vmatmul.mubr.msk.bf16.vlgmr.msra.gmra.mrb[148].mxu0 %vm102_vm2, %v7727_v35  ;;  %7735 = vmatprep.subr.msk.bf16.mxu1 %vm106_vm1, %v5627_v48  ;;  %v5847_v21 = vpop.permute.xlu0 %5846  ;;  %v5634_v47 = vsel %vm106_vm1, %v5624_v10, 0 }
 0x788   :  { %7731 = vmatmul.mubr.msk.bf16.vlgmr.msra.gmra.mrb[148].mxu1 %vm102_vm2, %v7727_v35  ;;  %v5851_v63 = vsel %vm2408_vm9, %v5845_v37, %v5847_v21  ;;  %5646 = vmatpush1.bf16.msra.mxu0 %v5634_v47  ;;  %v5737_v35 = vpack.c.bf16 %v5733_v54, %v5733_v54 }
 0x789   :  { %5687 = vmatpush1.bf16.msra.mxu1 %v5640_v24  ;;  %7738 = vmatprep.subr.msk.bf16.mxu0 %vm106_vm1, %v5736_v3  ;;  %v5849_v52 = vpop.permute.xlu1 %5848  ;;  %v5855_v41 = vmul.f32 %v5851_v63, %v9108_v15  ;;  %v5854_v24 = vmul.f32 %v5852_v58, %v9114_v32  ;;  %v5745_v3 = vsel %vm106_vm1, %v5735_v57, 0  ;;  %v7737_v58 = vld [vmem:[%s10384_s17 + $0x8] sm:$0x3] }
 0x78a   :  { %7740 = vmatprep.subr.msk.bf16.mxu1 %vm106_vm1, %v5738_v2  ;;  %v5853_v53 = vsel %vm2408_vm9, %v5849_v52, %v5843_v38  ;;  %5677 = vmatprep.mubr.bf16.mxu0 %v10439_v62  ;;  %v5850_v12 = vsel %vm2408_vm9, %v5847_v21, %v5849_v52  ;;  %v5751_v37 = vsel %vm106_vm1, %v5737_v35, 0 }
 0x78b   :  { %v5857_v46 = vmul.f32 %v5853_v53, %v9120_v42  ;;  %v5966_v56 = vpop.permute.xlu0 %5965  ;;  %5718 = vmatprep.mubr.bf16.mxu1 %v10439_v62  ;;  %v5859_v47 = vpack.c.bf16 %v5855_v41, %v5855_v41  ;;  %v5856_v38 = vmul.f32 %v5850_v12, %v9127_v19  ;;  %v5858_v54 = vpack.c.bf16 %v5854_v24, %v5854_v24 }
 0x78d   :  { %v5968_v10 = vpop.permute.xlu1 %5967  ;;  %v5861_v48 = vpack.c.bf16 %v5857_v46, %v5857_v46  ;;  %v5860_v46 = vpack.c.bf16 %v5856_v38, %v5856_v38 }
 0x78e   :  { %v5975_v57 = vsel %vm2555_vm10, %v5966_v56, %v5968_v10 }
 0x78f   :  { %7734 = vmatmul.mubr.msk.bf16.vlgmr.msra.gmra.mrb[152].mxu0 %vm102_vm2, %v7732_v8  ;;  %v5970_v43 = vpop.permute.xlu0 %5969 }
 0x790   :  { %7736 = vmatmul.mubr.msk.bf16.vlgmr.msra.gmra.mrb[152].mxu1 %vm102_vm2, %v7732_v8  ;;  %5757 = vmatpush1.bf16.msra.mxu0 %v5745_v3  ;;  %v5974_v21 = vsel %vm2555_vm10, %v5968_v10, %v5970_v43 }
 0x791   :  { %5798 = vmatpush1.bf16.msra.mxu1 %v5751_v37  ;;  %7743 = vmatprep.subr.msk.bf16.mxu0 %vm106_vm1, %v5859_v47  ;;  %v5972_v63 = vpop.permute.xlu1 %5971  ;;  %v5978_v52 = vmul.f32 %v5974_v21, %v9152_v27  ;;  %v5868_v47 = vsel %vm106_vm1, %v5858_v54, 0 }
 0x792   :  { %7745 = vmatprep.subr.msk.bf16.mxu1 %vm106_vm1, %v5861_v48  ;;  %v5976_v2 = vsel %vm2555_vm10, %v5972_v63, %v5966_v56  ;;  %5788 = vmatprep.mubr.bf16.mxu0 %v10439_v62  ;;  %v5973_v8 = vsel %vm2555_vm10, %v5970_v43, %v5972_v63  ;;  %v5977_v48 = vmul.f32 %v5975_v57, %v9157_v28  ;;  %v5874_v56 = vsel %vm106_vm1, %v5860_v46, 0  ;;  %v7742_v46 = vld [vmem:[%s10384_s17 + $0xa] sm:$0x3] }
 0x793   :  { %v5980_v53 = vmul.f32 %v5976_v2, %v9161_v18  ;;  %v6089_v41 = vpop.permute.xlu0 %6088  ;;  %5829 = vmatprep.mubr.bf16.mxu1 %v10439_v62  ;;  %v5982_v24 = vpack.c.bf16 %v5978_v52, %v5978_v52  ;;  %v5979_v38 = vmul.f32 %v5973_v8, %v9168_v50 }
 0x794   :  { %v5981_v21 = vpack.c.bf16 %v5977_v48, %v5977_v48 }
 0x795   :  { %v6091_v35 = vpop.permute.xlu1 %6090  ;;  %v5984_v12 = vpack.c.bf16 %v5980_v53, %v5980_v53  ;;  %v5983_v52 = vpack.c.bf16 %v5979_v38, %v5979_v38 }
 0x796   :  { %v6098_v53 = vsel %vm2702_vm11, %v6089_v41, %v6091_v35 }
 0x797   :  { %7739 = vmatmul.mubr.msk.bf16.vlgmr.msra.gmra.mrb[156].mxu0 %vm102_vm2, %v7737_v58  ;;  %v6093_v3 = vpop.permute.xlu0 %6092 }
 0x798   :  { %7741 = vmatmul.mubr.msk.bf16.vlgmr.msra.gmra.mrb[156].mxu1 %vm102_vm2, %v7737_v58  ;;  %5880 = vmatpush1.bf16.msra.mxu0 %v5868_v47  ;;  %v6097_v10 = vsel %vm2702_vm11, %v6091_v35, %v6093_v3 }
 0x799   :  { %5921 = vmatpush1.bf16.msra.mxu1 %v5874_v56  ;;  %7748 = vmatprep.subr.msk.bf16.mxu0 %vm106_vm1, %v5982_v24  ;;  %v6095_v43 = vpop.permute.xlu1 %6094  ;;  %v6101_v63 = vmul.f32 %v6097_v10, %v9191_v34  ;;  %v5991_v24 = vsel %vm106_vm1, %v5981_v21, 0 }
 0x79a   :  { %7750 = vmatprep.subr.msk.bf16.mxu1 %vm106_vm1, %v5984_v12  ;;  %v6099_v37 = vsel %vm2702_vm11, %v6095_v43, %v6089_v41  ;;  %5911 = vmatprep.mubr.bf16.mxu0 %v10439_v62  ;;  %v6096_v57 = vsel %vm2702_vm11, %v6093_v3, %v6095_v43  ;;  %v6100_v12 = vmul.f32 %v6098_v53, %v9196_v31  ;;  %v5997_v41 = vsel %vm106_vm1, %v5983_v52, 0  ;;  %v7747_v52 = vld [vmem:[%s10384_s17 + $0xc] sm:$0x3] }
 0x79b   :  { %v6103_v2 = vmul.f32 %v6099_v37, %v9200_v6  ;;  %v6212_v54 = vpop.permute.xlu0 %6211  ;;  %5952 = vmatprep.mubr.bf16.mxu1 %v10439_v62  ;;  %v6105_v48 = vpack.c.bf16 %v6101_v63, %v6101_v63  ;;  %v6102_v38 = vmul.f32 %v6096_v57, %v9207_v49 }
 0x79c   :  { %v6104_v10 = vpack.c.bf16 %v6100_v12, %v6100_v12 }
 0x79d   :  { %v6214_v58 = vpop.permute.xlu1 %6213  ;;  %v6107_v8 = vpack.c.bf16 %v6103_v2, %v6103_v2  ;;  %v6106_v63 = vpack.c.bf16 %v6102_v38, %v6102_v38 }
 0x79e   :  { %v6221_v2 = vsel %vm2849_vm12, %v6212_v54, %v6214_v58 }
 0x79f   :  { %7744 = vmatmul.mubr.msk.bf16.vlgmr.msra.gmra.mrb[160].mxu0 %vm102_vm2, %v7742_v46  ;;  %v6216_v47 = vpop.permute.xlu0 %6215 }
 0x7a0   :  { %7746 = vmatmul.mubr.msk.bf16.vlgmr.msra.gmra.mrb[160].mxu1 %vm102_vm2, %v7742_v46  ;;  %6003 = vmatpush1.bf16.msra.mxu0 %v5991_v24  ;;  %v6220_v35 = vsel %vm2849_vm12, %v6214_v58, %v6216_v47  ;;  %v6120_v58 = vsel %vm106_vm1, %v6106_v63, 0  ;;  %v7752_v63 = vld [vmem:[%s10384_s17 + $0xe] sm:$0x3] }
 0x7a1   :  { %6044 = vmatpush1.bf16.msra.mxu1 %v5997_v41  ;;  %7753 = vmatprep.subr.msk.bf16.mxu0 %vm106_vm1, %v6105_v48  ;;  %v6218_v3 = vpop.permute.xlu1 %6217  ;;  %v6224_v43 = vmul.f32 %v6220_v35, %v9230_v61  ;;  %v6114_v48 = vsel %vm106_vm1, %v6104_v10, 0 }
 0x7a2   :  { %7755 = vmatprep.subr.msk.bf16.mxu1 %vm106_vm1, %v6107_v8  ;;  %v6222_v56 = vsel %vm2849_vm12, %v6218_v3, %v6212_v54  ;;  %6034 = vmatprep.mubr.bf16.mxu0 %v10439_v62  ;;  %v6219_v53 = vsel %vm2849_vm12, %v6216_v47, %v6218_v3  ;;  %v6223_v8 = vmul.f32 %v6221_v2, %v9235_v60 }
 0x7a3   :  { %v6226_v37 = vmul.f32 %v6222_v56, %v10447_v26  ;;  %v6360_v21 = vpop.permute.xlu0 %6359  ;;  %6075 = vmatprep.mubr.bf16.mxu1 %v10439_v62  ;;  %v6228_v12 = vpack.c.bf16 %v6224_v43, %v6224_v43  ;;  %v6225_v38 = vmul.f32 %v6219_v53, %v10448_v55 }
 0x7a4   :  { %v6227_v35 = vpack.c.bf16 %v6223_v8, %v6223_v8 }
 0x7a5   :  { %v6362_v46 = vpop.permute.xlu1 %6361  ;;  %v6230_v57 = vpack.c.bf16 %v6226_v37, %v6226_v37  ;;  %v6229_v43 = vpack.c.bf16 %v6225_v38, %v6225_v38 }
 0x7a6   :  { %v6369_v54 = vsel %vm1732_vm5, %v6360_v21, %v6362_v46 }
 0x7a7   :  { %7749 = vmatmul.mubr.msk.bf16.vlgmr.msra.gmra.mrb[164].mxu0 %vm102_vm2, %v7747_v52  ;;  %v6364_v24 = vpop.permute.xlu0 %6363  ;;  %v6372_v3 = vmul.f32 %v6369_v54, %v8908_v0 }
 0x7a8   :  { %7751 = vmatmul.mubr.msk.bf16.vlgmr.msra.gmra.mrb[164].mxu1 %vm102_vm2, %v7747_v52  ;;  %6126 = vmatpush1.bf16.msra.mxu0 %v6114_v48  ;;  %v6368_v2 = vsel %vm1732_vm5, %v6362_v46, %v6364_v24  ;;  %v6243_v46 = vsel %vm106_vm1, %v6229_v43, 0 }
 0x7a9   :  { %6167 = vmatpush1.bf16.msra.mxu1 %v6120_v58  ;;  %7758 = vmatprep.subr.msk.bf16.mxu0 %vm106_vm1, %v6228_v12  ;;  %v6366_v47 = vpop.permute.xlu1 %6365  ;;  %v6373_v12 = vmul.f32 %v6368_v2, %v8915_v11 }
 0x7aa   :  { %7760 = vmatprep.subr.msk.bf16.mxu1 %vm106_vm1, %v6230_v57  ;;  %v6367_v41 = vsel %vm1732_vm5, %v6364_v24, %v6366_v47  ;;  %6157 = vmatprep.mubr.bf16.mxu0 %v10439_v62  ;;  %v6370_v37 = vsel %vm1732_vm5, %v6366_v47, %v6360_v21  ;;  %v6376_v57 = vpack.c.bf16 %v6372_v3, %v6372_v3 }
 0x7ab   :  { %v6374_v56 = vmul.f32 %v6367_v41, %v8930_v17  ;;  %v6339_v10 = vpop.permute.xlu0 %6338  ;;  %6198 = vmatprep.mubr.bf16.mxu1 %v10439_v62  ;;  %v6371_v0 = vmul.f32 %v6370_v37, %v8927_v16  ;;  %v6237_v17 = vsel %vm106_vm1, %v6227_v35, 0  ;;  %v6377_v58 = vpack.c.bf16 %v6373_v12, %v6373_v12  ;;  %v7757_v41 = vld [vmem:[%s10384_s17 + $0x10] sm:$0x3]  ;;  %v7762_v12 = vld [vmem:[%s10385_s18 + $0x2] sm:$0x3] }
 0x7ad   :  { %v6341_v52 = vpop.permute.xlu1 %6340  ;;  %v6378_v53 = vpack.c.bf16 %v6374_v56, %v6374_v56  ;;  %v6375_v11 = vpack.c.bf16 %v6371_v0, %v6371_v0 }
 0x7ae   :  { %v6348_v21 = vsel %vm1688_vm6, %v6339_v10, %v6341_v52 }
 0x7af   :  { %7754 = vmatmul.mubr.msk.bf16.vlgmr.msra.gmra.mrb[168].mxu0 %vm102_vm2, %v7752_v63  ;;  %v6343_v8 = vpop.permute.xlu0 %6342  ;;  %v6351_v24 = vmul.f32 %v6348_v21, %v8945_v25 }
 0x7b0   :  { %7756 = vmatmul.mubr.msk.bf16.vlgmr.msra.gmra.mrb[168].mxu1 %vm102_vm2, %v7752_v63  ;;  %6249 = vmatpush1.bf16.msra.mxu0 %v6237_v17  ;;  %v6347_v35 = vsel %vm1688_vm6, %v6341_v52, %v6343_v8  ;;  %v6391_v63 = vsel %vm106_vm1, %v6377_v58, 0 }
 0x7b1   :  { %6290 = vmatpush1.bf16.msra.mxu1 %v6243_v46  ;;  %7763 = vmatprep.subr.msk.bf16.mxu0 %vm106_vm1, %v6376_v57  ;;  %v6345_v48 = vpop.permute.xlu1 %6344  ;;  %v6355_v43 = vpack.c.bf16 %v6351_v24, %v6351_v24  ;;  %v6352_v37 = vmul.f32 %v6347_v35, %v8956_v33 }
 0x7b2   :  { %7765 = vmatprep.subr.msk.bf16.mxu1 %vm106_vm1, %v6378_v53  ;;  %v6346_v16 = vsel %vm1688_vm6, %v6343_v8, %v6345_v48  ;;  %6280 = vmatprep.mubr.bf16.mxu0 %v10439_v62  ;;  %v6349_v47 = vsel %vm1688_vm6, %v6345_v48, %v6339_v10 }
 0x7b3   :  { %v6353_v38 = vmul.f32 %v6346_v16, %v8973_v45  ;;  %v6576_v54 = vpop.permute.xlu0 %6575  ;;  %6321 = vmatprep.mubr.bf16.mxu1 %v10439_v62  ;;  %v6350_v25 = vmul.f32 %v6349_v47, %v8964_v39  ;;  %v6385_v45 = vsel %vm106_vm1, %v6375_v11, 0  ;;  %v6356_v0 = vpack.c.bf16 %v6352_v37, %v6352_v37 }
 0x7b5   :  { %v6578_v3 = vpop.permute.xlu1 %6577  ;;  %v6357_v56 = vpack.c.bf16 %v6353_v38, %v6353_v38  ;;  %v6354_v33 = vpack.c.bf16 %v6350_v25, %v6350_v25  ;;  %v6488_v38 = vsel %vm106_vm1, %v6356_v0, 0  ;;  %v6824_v0 = vmul.f32 %v10450_v13, %v10444_v7 }
 0x7b6   :  { %v6585_v10 = vsel %vm1972_vm7, %v6576_v54, %v6578_v3  ;;  %v6823_v7 = vmul.f32 %v10452_v59, %v10443_v9 }
 0x7b7   :  { %7759 = vmatmul.mubr.msk.bf16.vlgmr.msra.gmra.mrb[172].mxu0 %vm102_vm2, %v7757_v41  ;;  %v6588_v53 = vmul.f32 %v6585_v10, %v8992_v4 }
 0x7b8   :  { %7761 = vmatmul.mubr.msk.bf16.vlgmr.msra.gmra.mrb[172].mxu1 %vm102_vm2, %v7757_v41  ;;  %6397 = vmatpush1.bf16.msra.mxu0 %v6385_v45  ;;  %v6580_v2 = vpop.permute.xlu0 %6579 }
 0x7b9   :  { %6438 = vmatpush1.bf16.msra.mxu1 %v6391_v63  ;;  %7767 = vmatprep.subr.msk.bf16.mxu0 %vm106_vm1, %v6355_v43  ;;  %v6582_v52 = vpop.permute.xlu1 %6581  ;;  %v6584_v21 = vsel %vm1972_vm7, %v6578_v3, %v6580_v2  ;;  %v6592_v16 = vpack.c.bf16 %v6588_v53, %v6588_v53  ;;  %v6358_v43 = vld [vmem:[%s10385_s18] sm:$0x3] }
 0x7ba   :  { %7769 = vmatprep.subr.msk.bf16.mxu1 %vm106_vm1, %v6357_v56  ;;  %v6583_v39 = vsel %vm1972_vm7, %v6580_v2, %v6582_v52  ;;  %6428 = vmatprep.mubr.bf16.mxu0 %v10439_v62  ;;  %v6586_v17 = vsel %vm1972_vm7, %v6582_v52, %v6576_v54  ;;  %v6589_v11 = vmul.f32 %v6584_v21, %v9004_v20 }
 0x7bb   :  { %v6590_v57 = vmul.f32 %v6583_v39, %v9024_v30  ;;  %6469 = vmatprep.mubr.bf16.mxu1 %v10439_v62  ;;  %v6587_v4 = vmul.f32 %v6586_v17, %v9011_v22  ;;  %v6482_v30 = vsel %vm106_vm1, %v6354_v33, 0  ;;  %v6821_v21 = vmul.f32 %v10451_v44, %v8749_v36 }
 0x7bc   :  { %v6699_v8 = vpop.permute.xlu0 %6698  ;;  %v6593_v35 = vpack.c.bf16 %v6589_v11, %v6589_v11  ;;  %v6827_v11 = vpack.c.bf16 %v6823_v7, %v6823_v7 }
 0x7bd   :  { %v6701_v46 = vpop.permute.xlu1 %6700  ;;  %v6594_v48 = vpack.c.bf16 %v6590_v57, %v6590_v57  ;;  %v6591_v20 = vpack.c.bf16 %v6587_v4, %v6587_v4  ;;  %v7771_v57 = vld [vmem:[%s10385_s18 + $0x4] sm:$0x3] }
 0x7be   :  { %v6708_v24 = vsel %vm2119_vm8, %v6699_v8, %v6701_v46  ;;  %v6607_v2 = vsel %vm106_vm1, %v6593_v35, 0 }
 0x7bf   :  { %7764 = vmatmul.mubr.msk.bf16.vlgmr.msra.gmra.mrb[176].mxu0 %vm102_vm2, %v7762_v12  ;;  %v6711_v47 = vmul.f32 %v6708_v24, %v9050_v51 }
 0x7c0   :  { %7766 = vmatmul.mubr.msk.bf16.vlgmr.msra.gmra.mrb[176].mxu1 %vm102_vm2, %v7762_v12  ;;  %6494 = vmatpush1.bf16.msra.mxu0 %v6482_v30  ;;  %v6703_v54 = vpop.permute.xlu0 %6702  ;;  %v7776_v30 = vld [vmem:[%s10385_s18 + $0x6] sm:$0x3] }
 0x7c1   :  { %6535 = vmatpush1.bf16.msra.mxu1 %v6488_v38  ;;  %7772 = vmatprep.subr.msk.bf16.mxu0 %vm106_vm1, %v6592_v16  ;;  %v6705_v58 = vpop.permute.xlu1 %6704  ;;  %v6707_v25 = vsel %vm2119_vm8, %v6701_v46, %v6703_v54  ;;  %v6715_v10 = vpack.c.bf16 %v6711_v47, %v6711_v47  ;;  %v6825_v16 = vpack.c.bf16 %v6821_v21, %v6821_v21  ;;  %v6841_v47 = vsel %vm106_vm1, %v6827_v11, 0 }
 0x7c2   :  { %7774 = vmatprep.subr.msk.bf16.mxu1 %vm106_vm1, %v6594_v48  ;;  %v6706_v22 = vsel %vm2119_vm8, %v6703_v54, %v6705_v58  ;;  %6525 = vmatprep.mubr.bf16.mxu0 %v10439_v62  ;;  %v6709_v3 = vsel %vm2119_vm8, %v6705_v58, %v6699_v8  ;;  %v6712_v63 = vmul.f32 %v6707_v25, %v9064_v14 }
 0x7c3   :  { %v6713_v41 = vmul.f32 %v6706_v22, %v9083_v29  ;;  %6566 = vmatprep.mubr.bf16.mxu1 %v10439_v62  ;;  %v6710_v51 = vmul.f32 %v6709_v3, %v9070_v1  ;;  %v6601_v29 = vsel %vm106_vm1, %v6591_v20, 0  ;;  %v6822_v14 = vmul.f32 %v10449_v40, %v10442_v23 }
 0x7c4   :  { %v6933_v56 = vpop.permute.xlu0 %6932  ;;  %v6716_v33 = vpack.c.bf16 %v6712_v63, %v6712_v63  ;;  %v6828_v48 = vpack.c.bf16 %v6824_v0, %v6824_v0  ;;  %v6835_v58 = vsel %vm106_vm1, %v6825_v16, 0 }
 0x7c5   :  { %v6935_v45 = vpop.permute.xlu1 %6934  ;;  %v6717_v37 = vpack.c.bf16 %v6713_v41, %v6713_v41  ;;  %v6714_v1 = vpack.c.bf16 %v6710_v51, %v6710_v51  ;;  %v6826_v12 = vpack.c.bf16 %v6822_v14, %v6822_v14 }
 0x7c6   :  { %v6730_v40 = vsel %vm106_vm1, %v6716_v33, 0  ;;  %v6942_v4 = vsel %vm2408_vm9, %v6933_v56, %v6935_v45 }
 0x7c7   :  { %7768 = vmatmul.mubr.msk.bf16.vlgmr.msra.gmra.mrb[180].mxu0 %vm102_vm2, %v6358_v43  ;;  %v6724_v8 = vsel %vm106_vm1, %v6714_v1, 0 }
 0x7c8   :  { %7770 = vmatmul.mubr.msk.bf16.vlgmr.msra.gmra.mrb[180].mxu1 %vm102_vm2, %v6358_v43  ;;  %6613 = vmatpush1.bf16.msra.mxu0 %v6601_v29  ;;  %v6937_v52 = vpop.permute.xlu0 %6936 }
 0x7c9   :  { %6654 = vmatpush1.bf16.msra.mxu1 %v6607_v2  ;;  %7777 = vmatprep.subr.msk.bf16.mxu0 %vm106_vm1, %v6715_v10  ;;  %v6939_v39 = vpop.permute.xlu1 %6938  ;;  %v6941_v23 = vsel %vm2408_vm9, %v6935_v45, %v6937_v52  ;;  %v7781_v45 = vld [vmem:[%s10385_s18 + $0x8] sm:$0x3] }
 0x7ca   :  { %7779 = vmatprep.subr.msk.bf16.mxu1 %vm106_vm1, %v6717_v37  ;;  %6644 = vmatprep.mubr.bf16.mxu0 %v10439_v62  ;;  %v6943_v13 = vsel %vm2408_vm9, %v6939_v39, %v6933_v56  ;;  %v6945_v44 = vmul.f32 %v6941_v23, %v9108_v15  ;;  %v6940_v24 = vsel %vm2408_vm9, %v6937_v52, %v6939_v39 }
 0x7cb   :  { %6685 = vmatprep.mubr.bf16.mxu1 %v10439_v62  ;;  %v6947_v9 = vmul.f32 %v6943_v13, %v9120_v42  ;;  %v6944_v15 = vmul.f32 %v6942_v4, %v9114_v32  ;;  %v6946_v22 = vmul.f32 %v6940_v24, %v9127_v19 }
 0x7cc   :  { %v7056_v53 = vpop.permute.xlu0 %7055  ;;  %v6949_v54 = vpack.c.bf16 %v6945_v44, %v6945_v44  ;;  %v7791_v44 = vld [vmem:[%s10385_s18 + $0xc] sm:$0x3] }
 0x7cd   :  { %v7058_v17 = vpop.permute.xlu1 %7057  ;;  %v6951_v42 = vpack.c.bf16 %v6947_v9, %v6947_v9  ;;  %v6948_v19 = vpack.c.bf16 %v6944_v15, %v6944_v15  ;;  %v6950_v56 = vpack.c.bf16 %v6946_v22, %v6946_v22 }
 0x7ce   :  { %v7065_v43 = vsel %vm2555_vm10, %v7056_v53, %v7058_v17 }
 0x7cf   :  { %7773 = vmatmul.mubr.msk.bf16.vlgmr.msra.gmra.mrb[184].mxu0 %vm102_vm2, %v7771_v57  ;;  %v7067_v10 = vmul.f32 %v7065_v43, %v9157_v28  ;;  %v6964_v39 = vsel %vm106_vm1, %v6950_v56, 0 }
 0x7d0   :  { %7775 = vmatmul.mubr.msk.bf16.vlgmr.msra.gmra.mrb[184].mxu1 %vm102_vm2, %v7771_v57  ;;  %6736 = vmatpush1.bf16.msra.mxu0 %v6724_v8  ;;  %v7060_v46 = vpop.permute.xlu0 %7059  ;;  %v7786_v57 = vld [vmem:[%s10385_s18 + $0xa] sm:$0x3] }
 0x7d1   :  { %6777 = vmatpush1.bf16.msra.mxu1 %v6730_v40  ;;  %7782 = vmatprep.subr.msk.bf16.mxu0 %vm106_vm1, %v6826_v12  ;;  %v7062_v36 = vpop.permute.xlu1 %7061  ;;  %v7064_v20 = vsel %vm2555_vm10, %v7058_v17, %v7060_v46 }
 0x7d2   :  { %7784 = vmatprep.subr.msk.bf16.mxu1 %vm106_vm1, %v6828_v48  ;;  %6767 = vmatprep.mubr.bf16.mxu0 %v10439_v62  ;;  %v7066_v41 = vsel %vm2555_vm10, %v7062_v36, %v7056_v53  ;;  %v7068_v3 = vmul.f32 %v7064_v20, %v9152_v27  ;;  %v7063_v37 = vsel %vm2555_vm10, %v7060_v46, %v7062_v36  ;;  %v6958_v27 = vsel %vm106_vm1, %v6948_v19, 0 }
 0x7d3   :  { %6808 = vmatprep.mubr.bf16.mxu1 %v10439_v62  ;;  %v7070_v25 = vmul.f32 %v7066_v41, %v9161_v18  ;;  %v7069_v63 = vmul.f32 %v7063_v37, %v9168_v50  ;;  %v7071_v50 = vpack.c.bf16 %v7067_v10, %v7067_v10 }
 0x7d4   :  { %v7179_v59 = vpop.permute.xlu0 %7178  ;;  %v7072_v51 = vpack.c.bf16 %v7068_v3, %v7068_v3 }
 0x7d5   :  { %v7181_v38 = vpop.permute.xlu1 %7180  ;;  %v7074_v2 = vpack.c.bf16 %v7070_v25, %v7070_v25  ;;  %v7073_v14 = vpack.c.bf16 %v7069_v63, %v7069_v63  ;;  %v7081_v21 = vsel %vm106_vm1, %v7071_v50, 0 }
 0x7d6   :  { %v7188_v33 = vsel %vm2702_vm11, %v7179_v59, %v7181_v38 }
 0x7d7   :  { %7778 = vmatmul.mubr.msk.bf16.vlgmr.msra.gmra.mrb[188].mxu0 %vm102_vm2, %v7776_v30  ;;  %v7190_v12 = vmul.f32 %v7188_v33, %v9196_v31  ;;  %v7087_v46 = vsel %vm106_vm1, %v7073_v14, 0 }
 0x7d8   :  { %7780 = vmatmul.mubr.msk.bf16.vlgmr.msra.gmra.mrb[188].mxu1 %vm102_vm2, %v7776_v30  ;;  %6847 = vmatpush1.bf16.msra.mxu0 %v6835_v58  ;;  %v7183_v32 = vpop.permute.xlu0 %7182 }
 0x7d9   :  { %6888 = vmatpush1.bf16.msra.mxu1 %v6841_v47  ;;  %7787 = vmatprep.subr.msk.bf16.mxu0 %vm106_vm1, %v6949_v54  ;;  %v7185_v35 = vpop.permute.xlu1 %7184  ;;  %v7187_v18 = vsel %vm2702_vm11, %v7181_v38, %v7183_v32  ;;  %v7194_v31 = vpack.c.bf16 %v7190_v12, %v7190_v12  ;;  %v7801_v38 = vld [vmem:[%s10385_s18 + $0x10] sm:$0x3] }
 0x7da   :  { %7789 = vmatprep.subr.msk.bf16.mxu1 %vm106_vm1, %v6951_v42  ;;  %6878 = vmatprep.mubr.bf16.mxu0 %v10439_v62  ;;  %v7189_v28 = vsel %vm2702_vm11, %v7185_v35, %v7179_v59  ;;  %v7191_v1 = vmul.f32 %v7187_v18, %v9191_v34  ;;  %v7186_v0 = vsel %vm2702_vm11, %v7183_v32, %v7185_v35 }
 0x7db   :  { %6919 = vmatprep.mubr.bf16.mxu1 %v10439_v62  ;;  %v7193_v53 = vmul.f32 %v7189_v28, %v9200_v6  ;;  %v7192_v23 = vmul.f32 %v7186_v0, %v9207_v49 }
 0x7dc   :  { %v7302_v29 = vpop.permute.xlu0 %7301  ;;  %v7195_v34 = vpack.c.bf16 %v7191_v1, %v7191_v1 }
 0x7dd   :  { %v7304_v52 = vpop.permute.xlu1 %7303  ;;  %v7197_v40 = vpack.c.bf16 %v7193_v53, %v7193_v53  ;;  %v7196_v7 = vpack.c.bf16 %v7192_v23, %v7192_v23 }
 0x7de   :  { %v7311_v13 = vsel %vm2849_vm12, %v7302_v29, %v7304_v52 }
 0x7df   :  { %7783 = vmatmul.mubr.msk.bf16.vlgmr.msra.gmra.mrb[192].mxu0 %vm102_vm2, %v7781_v45  ;;  %v7313_v4 = vmul.f32 %v7311_v13, %v9235_v60 }
 0x7e0   :  { %7785 = vmatmul.mubr.msk.bf16.vlgmr.msra.gmra.mrb[192].mxu1 %vm102_vm2, %v7781_v45  ;;  %6970 = vmatpush1.bf16.msra.mxu0 %v6958_v27  ;;  %v7306_v17 = vpop.permute.xlu0 %7305 }
 0x7e1   :  { %7011 = vmatpush1.bf16.msra.mxu1 %v6964_v39  ;;  %7792 = vmatprep.subr.msk.bf16.mxu0 %vm106_vm1, %v7072_v51  ;;  %v7308_v8 = vpop.permute.xlu1 %7307  ;;  %v7310_v6 = vsel %vm2849_vm12, %v7304_v52, %v7306_v17  ;;  %v7317_v5 = vpack.c.bf16 %v7313_v4, %v7313_v4 }
 0x7e2   :  { %7794 = vmatprep.subr.msk.bf16.mxu1 %vm106_vm1, %v7074_v2  ;;  %7001 = vmatprep.mubr.bf16.mxu0 %v10439_v62  ;;  %v7312_v48 = vsel %vm2849_vm12, %v7308_v8, %v7302_v29  ;;  %v7314_v49 = vmul.f32 %v7310_v6, %v9230_v61  ;;  %v7309_v16 = vsel %vm2849_vm12, %v7306_v17, %v7308_v8  ;;  %v7204_v61 = vsel %vm106_vm1, %v7194_v31, 0 }
 0x7e3   :  { %7042 = vmatprep.mubr.bf16.mxu1 %v10439_v62  ;;  %v7316_v36 = vmul.f32 %v7312_v48, %v10447_v26  ;;  %v7315_v59 = vmul.f32 %v7309_v16, %v10448_v55  ;;  %v7210_v26 = vsel %vm106_vm1, %v7196_v7, 0  ;;  %v7796_v55 = vld [vmem:[%s10385_s18 + $0xe] sm:$0x3]  ;;  %v7327_v11 = vsel %vm106_vm1, %v7317_v5, 0 }
 0x7e4   :  { %v7318_v9 = vpack.c.bf16 %v7314_v49, %v7314_v49 }
 0x7e5   :  { %v7320_v30 = vpack.c.bf16 %v7316_v36, %v7316_v36  ;;  %v7319_v60 = vpack.c.bf16 %v7315_v59, %v7315_v59 }
 0x7e7   :  { %7788 = vmatmul.mubr.msk.bf16.vlgmr.msra.gmra.mrb[196].mxu0 %vm102_vm2, %v7786_v57  ;;  %v7333_v24 = vsel %vm106_vm1, %v7319_v60, 0 }
 0x7e8   :  { %7790 = vmatmul.mubr.msk.bf16.vlgmr.msra.gmra.mrb[196].mxu1 %vm102_vm2, %v7786_v57  ;;  %7093 = vmatpush1.bf16.msra.mxu0 %v7081_v21 }
 0x7e9   :  { %7134 = vmatpush1.bf16.msra.mxu1 %v7087_v46  ;;  %7797 = vmatprep.subr.msk.bf16.mxu0 %vm106_vm1, %v7195_v34 }
 0x7ea   :  { %7799 = vmatprep.subr.msk.bf16.mxu1 %vm106_vm1, %v7197_v40  ;;  %7124 = vmatprep.mubr.bf16.mxu0 %v10439_v62 }
 0x7eb   :  { %7165 = vmatprep.mubr.bf16.mxu1 %v10439_v62 }
 0x7ef   :  { %7793 = vmatmul.mubr.msk.bf16.vlgmr.msra.gmra.mrb[200].mxu0 %vm102_vm2, %v7791_v44 }
 0x7f0   :  { %7795 = vmatmul.mubr.msk.bf16.vlgmr.msra.gmra.mrb[200].mxu1 %vm102_vm2, %v7791_v44  ;;  %7216 = vmatpush1.bf16.msra.mxu0 %v7204_v61 }
 0x7f1   :  { %7257 = vmatpush1.bf16.msra.mxu1 %v7210_v26  ;;  %7802 = vmatprep.subr.msk.bf16.mxu0 %vm106_vm1, %v7318_v9 }
 0x7f2   :  { %7804 = vmatprep.subr.msk.bf16.mxu1 %vm106_vm1, %v7320_v30  ;;  %7247 = vmatprep.mubr.bf16.mxu0 %v10439_v62 }
 0x7f3   :  { %7288 = vmatprep.mubr.bf16.mxu1 %v10439_v62 }
 0x7f7   :  { %7798 = vmatmul.mubr.msk.bf16.vlgmr.msra.gmra.mrb[204].mxu0 %vm102_vm2, %v7796_v55 }
 0x7f8   :  { %7800 = vmatmul.mubr.msk.bf16.vlgmr.msra.gmra.mrb[204].mxu1 %vm102_vm2, %v7796_v55  ;;  %7339 = vmatpush1.bf16.msra.mxu0 %v7327_v11 }
 0x7f9   :  { %7380 = vmatpush1.bf16.msra.mxu1 %v7333_v24  ;;  %7370 = vmatprep.mubr.bf16.mxu0 %v10439_v62 }
 0x7fa   :  { %7411 = vmatprep.mubr.bf16.mxu1 %v10439_v62 }
 0x7ff   :  { %7803 = vmatmul.mubr.msk.bf16.vlgmr.msra.gmra.mrb[208].mxu0 %vm102_vm2, %v7801_v38 }
 0x800   :  { %7805 = vmatmul.mubr.msk.bf16.vlgmr.msra.gmra.mrb[208].mxu1 %vm102_vm2, %v7801_v38 }
 0x802   :  { %v4246_v15 = vpop.f32.mrb[104].mxu0 }
 0x803   :  { %v4287_v54 = vpop.f32.mrb[104].mxu1  ;;  %v4248_v58 = vpop.f32.mrb[105].mxu0 }
 0x804   :  { %v4289_v22 = vpop.f32.mrb[105].mxu1  ;;  %v4250_v42 = vpop.f32.mrb[106].mxu0 }
 0x805   :  { %v4291_v20 = vpop.f32.mrb[106].mxu1  ;;  %v4251_v47 = vpop.f32.mrb[107].mxu0 }
 0x806   :  { %v4292_v41 = vpop.f32.mrb[107].mxu1 }
 0x80a   :  { %v4343_v32 = vpop.f32.mrb[108].mxu0 }
 0x80b   :  { %v4344_v35 = vadd.f32 %v4343_v32, %v4246_v15  ;;  %v4384_v19 = vpop.f32.mrb[108].mxu1  ;;  %v4345_v62 = vpop.f32.mrb[109].mxu0 }
 0x80c   :  { %v4385_v3 = vadd.f32 %v4384_v19, %v4287_v54  ;;  %v4346_v56 = vadd.f32 %v4345_v62, %v4248_v58  ;;  %v4386_v43 = vpop.f32.mrb[109].mxu1  ;;  %v4347_v25 = vpop.f32.mrb[110].mxu0 }
 0x80d   :  { %v4387_v45 = vadd.f32 %v4386_v43, %v4289_v22  ;;  %v4388_v37 = vpop.f32.mrb[110].mxu1  ;;  %v4348_v10 = vpop.f32.mrb[111].mxu0 }
 0x80e   :  { %v4389_v51 = vpop.f32.mrb[111].mxu1 }
 0x812   :  { %v4462_v29 = vpop.f32.mrb[112].mxu0 }
 0x813   :  { %v4510_v27 = vadd.f32 %v4462_v29, %v4344_v35  ;;  %v4503_v63 = vpop.f32.mrb[112].mxu1  ;;  %v4464_v2 = vpop.f32.mrb[113].mxu0 }
 0x814   :  { %v4512_v18 = vadd.f32 %v4503_v63, %v4385_v3  ;;  %v4511_v52 = vadd.f32 %v4464_v2, %v4346_v56  ;;  %v4505_v39 = vpop.f32.mrb[113].mxu1  ;;  %v4466_v28 = vpop.f32.mrb[114].mxu0 }
 0x815   :  { %v4513_v50 = vadd.f32 %v4505_v39, %v4387_v45  ;;  %v4507_v1 = vpop.f32.mrb[114].mxu1  ;;  %v4467_v14 = vpop.f32.mrb[115].mxu0 }
 0x816   :  { %v4508_v33 = vpop.f32.mrb[115].mxu1 }
 0x81a   :  { %v4585_v53 = vpop.f32.mrb[116].mxu0 }
 0x81b   :  { %v4633_v57 = vadd.f32 %v4585_v53, %v4510_v27  ;;  %v4626_v0 = vpop.f32.mrb[116].mxu1  ;;  %v4587_v17 = vpop.f32.mrb[117].mxu0 }
 0x81c   :  { %v4635_v8 = vadd.f32 %v4626_v0, %v4512_v18  ;;  %v4634_v12 = vadd.f32 %v4587_v17, %v4511_v52  ;;  %v4628_v34 = vpop.f32.mrb[117].mxu1  ;;  %v4589_v21 = vpop.f32.mrb[118].mxu0 }
 0x81d   :  { %v4636_v23 = vadd.f32 %v4628_v34, %v4513_v50  ;;  %v4630_v40 = vpop.f32.mrb[118].mxu1  ;;  %v4590_v6 = vpop.f32.mrb[119].mxu0 }
 0x81e   :  { %v4631_v46 = vpop.f32.mrb[119].mxu1 }
 0x822   :  { %v4700_v48 = vpop.f32.mrb[120].mxu0 }
 0x823   :  { %v4748_v31 = vadd.f32 %v4700_v48, %v4633_v57  ;;  %v4741_v49 = vpop.f32.mrb[120].mxu1  ;;  %v4702_v7 = vpop.f32.mrb[121].mxu0 }
 0x824   :  { %v4750_v13 = vadd.f32 %v4741_v49, %v4635_v8  ;;  %v4749_v36 = vadd.f32 %v4702_v7, %v4634_v12  ;;  %v4743_v44 = vpop.f32.mrb[121].mxu1  ;;  %v4704_v16 = vpop.f32.mrb[122].mxu0 }
 0x825   :  { %v4751_v4 = vadd.f32 %v4743_v44, %v4636_v23  ;;  %v4745_v9 = vpop.f32.mrb[122].mxu1  ;;  %v4705_v61 = vpop.f32.mrb[123].mxu0 }
 0x826   :  { %v4746_v59 = vpop.f32.mrb[123].mxu1 }
 0x82a   :  { %v4823_v30 = vpop.f32.mrb[124].mxu0 }
 0x82b   :  { %v4871_v26 = vadd.f32 %v4823_v30, %v4748_v31  ;;  %v4864_v5 = vpop.f32.mrb[124].mxu1  ;;  %v4825_v60 = vpop.f32.mrb[125].mxu0 }
 0x82c   :  { %v4873_v55 = vadd.f32 %v4864_v5, %v4750_v13  ;;  %v4872_v11 = vadd.f32 %v4825_v60, %v4749_v36  ;;  %v4866_v24 = vpop.f32.mrb[125].mxu1  ;;  %v4827_v38 = vpop.f32.mrb[126].mxu0 }
 0x82d   :  { %v4874_v15 = vadd.f32 %v4866_v24, %v4751_v4  ;;  %v4868_v54 = vpop.f32.mrb[126].mxu1  ;;  %v4828_v58 = vpop.f32.mrb[127].mxu0 }
 0x82e   :  { %v4869_v22 = vpop.f32.mrb[127].mxu1 }
 0x832   :  { %v4946_v42 = vpop.f32.mrb[128].mxu0 }
 0x833   :  { %v4994_v20 = vadd.f32 %v4946_v42, %v4871_v26  ;;  %v4987_v47 = vpop.f32.mrb[128].mxu1  ;;  %v4948_v41 = vpop.f32.mrb[129].mxu0 }
 0x834   :  { %v4996_v32 = vadd.f32 %v4987_v47, %v4873_v55  ;;  %v4995_v35 = vadd.f32 %v4948_v41, %v4872_v11  ;;  %v4989_v19 = vpop.f32.mrb[129].mxu1  ;;  %v4950_v62 = vpop.f32.mrb[130].mxu0 }
 0x835   :  { %v4997_v3 = vadd.f32 %v4989_v19, %v4874_v15  ;;  %v4991_v56 = vpop.f32.mrb[130].mxu1  ;;  %v4951_v43 = vpop.f32.mrb[131].mxu0 }
 0x836   :  { %v4992_v25 = vpop.f32.mrb[131].mxu1 }
 0x83a   :  { %v5069_v45 = vpop.f32.mrb[132].mxu0 }
 0x83b   :  { %v5117_v37 = vadd.f32 %v5069_v45, %v4994_v20  ;;  %v5110_v10 = vpop.f32.mrb[132].mxu1  ;;  %v5071_v51 = vpop.f32.mrb[133].mxu0 }
 0x83c   :  { %v5119_v29 = vadd.f32 %v5110_v10, %v4996_v32  ;;  %v5118_v27 = vadd.f32 %v5071_v51, %v4995_v35  ;;  %v5112_v63 = vpop.f32.mrb[133].mxu1  ;;  %v5073_v2 = vpop.f32.mrb[134].mxu0 }
 0x83d   :  { %v5120_v18 = vadd.f32 %v5112_v63, %v4997_v3  ;;  %v5114_v52 = vpop.f32.mrb[134].mxu1  ;;  %v5074_v39 = vpop.f32.mrb[135].mxu0 }
 0x83e   :  { %v5115_v28 = vpop.f32.mrb[135].mxu1 }
 0x842   :  { %v5192_v50 = vpop.f32.mrb[136].mxu0 }
 0x843   :  { %v10332_v1 = vadd.f32 %v5192_v50, %v5117_v37  ;;  %v5233_v14 = vpop.f32.mrb[136].mxu1  ;;  %v5194_v33 = vpop.f32.mrb[137].mxu0 }
 0x844   :  { %v10334_v53 = vadd.f32 %v5233_v14, %v5119_v29  ;;  %v10336_v57 = vadd.f32 %v5194_v33, %v5118_v27  ;;  %v5235_v0 = vpop.f32.mrb[137].mxu1  ;;  %v5196_v17 = vpop.f32.mrb[138].mxu0 }
 0x845   :  { %v10338_v8 = vadd.f32 %v5235_v0, %v5120_v18  ;;  %v5237_v12 = vpop.f32.mrb[138].mxu1  ;;  %v5197_v34 = vpop.f32.mrb[139].mxu0 }
 0x846   :  { %v5238_v21 = vpop.f32.mrb[139].mxu1 }
 0x84a   :  { %v5340_v23 = vpop.f32.mrb[140].mxu0 }
 0x84b   :  { %v5381_v40 = vpop.f32.mrb[140].mxu1  ;;  %v5342_v6 = vpop.f32.mrb[141].mxu0 }
 0x84c   :  { %v5383_v46 = vpop.f32.mrb[141].mxu1  ;;  %v5344_v48 = vpop.f32.mrb[142].mxu0 }
 0x84d   :  { %v5385_v31 = vpop.f32.mrb[142].mxu1  ;;  %v5345_v49 = vpop.f32.mrb[143].mxu0 }
 0x84e   :  { %v5386_v7 = vpop.f32.mrb[143].mxu1 }
 0x852   :  { %v5437_v13 = vpop.f32.mrb[144].mxu0 }
 0x853   :  { %v5438_v36 = vadd.f32 %v5437_v13, %v5340_v23  ;;  %v5478_v44 = vpop.f32.mrb[144].mxu1  ;;  %v5439_v16 = vpop.f32.mrb[145].mxu0 }
 0x854   :  { %v5479_v4 = vadd.f32 %v5478_v44, %v5381_v40  ;;  %v5440_v9 = vadd.f32 %v5439_v16, %v5342_v6  ;;  %v5480_v61 = vpop.f32.mrb[145].mxu1  ;;  %v5441_v59 = vpop.f32.mrb[146].mxu0 }
 0x855   :  { %v5481_v30 = vadd.f32 %v5480_v61, %v5383_v46  ;;  %v5482_v26 = vpop.f32.mrb[146].mxu1  ;;  %v5442_v5 = vpop.f32.mrb[147].mxu0 }
 0x856   :  { %v5483_v60 = vpop.f32.mrb[147].mxu1 }
 0x85a   :  { %v5556_v55 = vpop.f32.mrb[148].mxu0 }
 0x85b   :  { %v5604_v11 = vadd.f32 %v5556_v55, %v5438_v36  ;;  %v5597_v24 = vpop.f32.mrb[148].mxu1  ;;  %v5558_v38 = vpop.f32.mrb[149].mxu0 }
 0x85c   :  { %v5606_v15 = vadd.f32 %v5597_v24, %v5479_v4  ;;  %v5605_v54 = vadd.f32 %v5558_v38, %v5440_v9  ;;  %v5599_v58 = vpop.f32.mrb[149].mxu1  ;;  %v5560_v22 = vpop.f32.mrb[150].mxu0 }
 0x85d   :  { %v5607_v42 = vadd.f32 %v5599_v58, %v5481_v30  ;;  %v5601_v20 = vpop.f32.mrb[150].mxu1  ;;  %v5561_v47 = vpop.f32.mrb[151].mxu0 }
 0x85e   :  { %v5602_v41 = vpop.f32.mrb[151].mxu1 }
 0x862   :  { %v5679_v32 = vpop.f32.mrb[152].mxu0 }
 0x863   :  { %v5727_v35 = vadd.f32 %v5679_v32, %v5604_v11  ;;  %v5720_v19 = vpop.f32.mrb[152].mxu1  ;;  %v5681_v62 = vpop.f32.mrb[153].mxu0 }
 0x864   :  { %v5729_v3 = vadd.f32 %v5720_v19, %v5606_v15  ;;  %v5728_v56 = vadd.f32 %v5681_v62, %v5605_v54  ;;  %v5722_v43 = vpop.f32.mrb[153].mxu1  ;;  %v5683_v25 = vpop.f32.mrb[154].mxu0 }
 0x865   :  { %v5730_v45 = vadd.f32 %v5722_v43, %v5607_v42  ;;  %v5724_v37 = vpop.f32.mrb[154].mxu1  ;;  %v5684_v10 = vpop.f32.mrb[155].mxu0 }
 0x866   :  { %v5725_v51 = vpop.f32.mrb[155].mxu1 }
 0x86a   :  { %v5790_v29 = vpop.f32.mrb[156].mxu0 }
 0x86b   :  { %v5838_v27 = vadd.f32 %v5790_v29, %v5727_v35  ;;  %v5831_v63 = vpop.f32.mrb[156].mxu1  ;;  %v5792_v2 = vpop.f32.mrb[157].mxu0 }
 0x86c   :  { %v5840_v18 = vadd.f32 %v5831_v63, %v5729_v3  ;;  %v5839_v52 = vadd.f32 %v5792_v2, %v5728_v56  ;;  %v5833_v39 = vpop.f32.mrb[157].mxu1  ;;  %v5794_v28 = vpop.f32.mrb[158].mxu0 }
 0x86d   :  { %v5841_v50 = vadd.f32 %v5833_v39, %v5730_v45  ;;  %v5835_v14 = vpop.f32.mrb[158].mxu1  ;;  %v5795_v33 = vpop.f32.mrb[159].mxu0 }
 0x86e   :  { %v5836_v0 = vpop.f32.mrb[159].mxu1 }
 0x872   :  { %v5913_v17 = vpop.f32.mrb[160].mxu0 }
 0x873   :  { %v5961_v12 = vadd.f32 %v5913_v17, %v5838_v27  ;;  %v5954_v34 = vpop.f32.mrb[160].mxu1  ;;  %v5915_v21 = vpop.f32.mrb[161].mxu0 }
 0x874   :  { %v5963_v23 = vadd.f32 %v5954_v34, %v5840_v18  ;;  %v5962_v40 = vadd.f32 %v5915_v21, %v5839_v52  ;;  %v5956_v6 = vpop.f32.mrb[161].mxu1  ;;  %v5917_v46 = vpop.f32.mrb[162].mxu0 }
 0x875   :  { %v5964_v48 = vadd.f32 %v5956_v6, %v5841_v50  ;;  %v5958_v31 = vpop.f32.mrb[162].mxu1  ;;  %v5918_v49 = vpop.f32.mrb[163].mxu0 }
 0x876   :  { %v5959_v7 = vpop.f32.mrb[163].mxu1 }
 0x87a   :  { %v6036_v13 = vpop.f32.mrb[164].mxu0 }
 0x87b   :  { %v6084_v36 = vadd.f32 %v6036_v13, %v5961_v12  ;;  %v6077_v44 = vpop.f32.mrb[164].mxu1  ;;  %v6038_v16 = vpop.f32.mrb[165].mxu0 }
 0x87c   :  { %v6086_v4 = vadd.f32 %v6077_v44, %v5963_v23  ;;  %v6085_v9 = vadd.f32 %v6038_v16, %v5962_v40  ;;  %v6079_v61 = vpop.f32.mrb[165].mxu1  ;;  %v6040_v59 = vpop.f32.mrb[166].mxu0 }
 0x87d   :  { %v6087_v30 = vadd.f32 %v6079_v61, %v5964_v48  ;;  %v6081_v26 = vpop.f32.mrb[166].mxu1  ;;  %v6041_v5 = vpop.f32.mrb[167].mxu0 }
 0x87e   :  { %v6082_v60 = vpop.f32.mrb[167].mxu1 }
 0x882   :  { %v6159_v55 = vpop.f32.mrb[168].mxu0 }
 0x883   :  { %v6207_v11 = vadd.f32 %v6159_v55, %v6084_v36  ;;  %v6200_v24 = vpop.f32.mrb[168].mxu1  ;;  %v6161_v38 = vpop.f32.mrb[169].mxu0 }
 0x884   :  { %v6209_v15 = vadd.f32 %v6200_v24, %v6086_v4  ;;  %v6208_v54 = vadd.f32 %v6161_v38, %v6085_v9  ;;  %v6202_v58 = vpop.f32.mrb[169].mxu1  ;;  %v6163_v22 = vpop.f32.mrb[170].mxu0 }
 0x885   :  { %v6210_v42 = vadd.f32 %v6202_v58, %v6087_v30  ;;  %v6204_v20 = vpop.f32.mrb[170].mxu1  ;;  %v6164_v47 = vpop.f32.mrb[171].mxu0 }
 0x886   :  { %v6205_v41 = vpop.f32.mrb[171].mxu1 }
 0x88a   :  { %v6282_v32 = vpop.f32.mrb[172].mxu0 }
 0x88b   :  { %v6330_v35 = vadd.f32 %v6282_v32, %v6207_v11  ;;  %v6323_v19 = vpop.f32.mrb[172].mxu1  ;;  %v6284_v62 = vpop.f32.mrb[173].mxu0 }
 0x88c   :  { %v6332_v3 = vadd.f32 %v6323_v19, %v6209_v15  ;;  %v6331_v56 = vadd.f32 %v6284_v62, %v6208_v54  ;;  %v6325_v43 = vpop.f32.mrb[173].mxu1  ;;  %v6286_v25 = vpop.f32.mrb[174].mxu0 }
 0x88d   :  { %v10341_v45 = vadd.f32 %v6330_v35, %v10332_v1  ;;  %v6333_v37 = vadd.f32 %v6325_v43, %v6210_v42  ;;  %v6327_v10 = vpop.f32.mrb[174].mxu1  ;;  %v6287_v51 = vpop.f32.mrb[175].mxu0 }
 0x88e   :  { %v10344_v29 = vadd.f32 %v6332_v3, %v10334_v53  ;;  %v10347_v27 = vadd.f32 %v6331_v56, %v10336_v57  ;;  %v6328_v63 = vpop.f32.mrb[175].mxu1 }
 0x88f   :  { %v10350_v2 = vadd.f32 %v6333_v37, %v10338_v8 }
 0x892   :  { %v6430_v18 = vpop.f32.mrb[176].mxu0 }
 0x893   :  { %v6471_v52 = vpop.f32.mrb[176].mxu1  ;;  %v6432_v39 = vpop.f32.mrb[177].mxu0 }
 0x894   :  { %v6473_v28 = vpop.f32.mrb[177].mxu1  ;;  %v6434_v50 = vpop.f32.mrb[178].mxu0 }
 0x895   :  { %v6475_v1 = vpop.f32.mrb[178].mxu1  ;;  %v6435_v14 = vpop.f32.mrb[179].mxu0 }
 0x896   :  { %v6476_v33 = vpop.f32.mrb[179].mxu1 }
 0x89a   :  { %v6527_v0 = vpop.f32.mrb[180].mxu0 }
 0x89b   :  { %v6528_v17 = vadd.f32 %v6527_v0, %v6430_v18  ;;  %v6568_v12 = vpop.f32.mrb[180].mxu1  ;;  %v6529_v53 = vpop.f32.mrb[181].mxu0 }
 0x89c   :  { %v6569_v34 = vadd.f32 %v6568_v12, %v6471_v52  ;;  %v6530_v21 = vadd.f32 %v6529_v53, %v6432_v39  ;;  %v6570_v57 = vpop.f32.mrb[181].mxu1  ;;  %v6531_v23 = vpop.f32.mrb[182].mxu0 }
 0x89d   :  { %v6571_v40 = vadd.f32 %v6570_v57, %v6473_v28  ;;  %v6572_v6 = vpop.f32.mrb[182].mxu1  ;;  %v6532_v8 = vpop.f32.mrb[183].mxu0 }
 0x89e   :  { %v6573_v46 = vpop.f32.mrb[183].mxu1 }
 0x8a2   :  { %v6646_v48 = vpop.f32.mrb[184].mxu0 }
 0x8a3   :  { %v6694_v31 = vadd.f32 %v6646_v48, %v6528_v17  ;;  %v6687_v49 = vpop.f32.mrb[184].mxu1  ;;  %v6648_v7 = vpop.f32.mrb[185].mxu0 }
 0x8a4   :  { %v6696_v13 = vadd.f32 %v6687_v49, %v6569_v34  ;;  %v6695_v36 = vadd.f32 %v6648_v7, %v6530_v21  ;;  %v6689_v44 = vpop.f32.mrb[185].mxu1  ;;  %v6650_v16 = vpop.f32.mrb[186].mxu0 }
 0x8a5   :  { %v6697_v4 = vadd.f32 %v6689_v44, %v6571_v40  ;;  %v6691_v9 = vpop.f32.mrb[186].mxu1  ;;  %v6651_v61 = vpop.f32.mrb[187].mxu0 }
 0x8a6   :  { %v6692_v59 = vpop.f32.mrb[187].mxu1 }
 0x8aa   :  { %v6769_v30 = vpop.f32.mrb[188].mxu0 }
 0x8ab   :  { %v6817_v26 = vadd.f32 %v6769_v30, %v6694_v31  ;;  %v6810_v5 = vpop.f32.mrb[188].mxu1  ;;  %v6771_v60 = vpop.f32.mrb[189].mxu0 }
 0x8ac   :  { %v6819_v55 = vadd.f32 %v6810_v5, %v6696_v13  ;;  %v6818_v11 = vadd.f32 %v6771_v60, %v6695_v36  ;;  %v6812_v24 = vpop.f32.mrb[189].mxu1  ;;  %v6773_v38 = vpop.f32.mrb[190].mxu0 }
 0x8ad   :  { %v6820_v15 = vadd.f32 %v6812_v24, %v6697_v4  ;;  %v6814_v54 = vpop.f32.mrb[190].mxu1  ;;  %v6774_v58 = vpop.f32.mrb[191].mxu0 }
 0x8ae   :  { %v6815_v22 = vpop.f32.mrb[191].mxu1 }
 0x8b2   :  { %v6880_v42 = vpop.f32.mrb[192].mxu0 }
 0x8b3   :  { %v6928_v20 = vadd.f32 %v6880_v42, %v6817_v26  ;;  %v6921_v47 = vpop.f32.mrb[192].mxu1  ;;  %v6882_v41 = vpop.f32.mrb[193].mxu0 }
 0x8b4   :  { %v6930_v32 = vadd.f32 %v6921_v47, %v6819_v55  ;;  %v6929_v35 = vadd.f32 %v6882_v41, %v6818_v11  ;;  %v6923_v19 = vpop.f32.mrb[193].mxu1  ;;  %v6884_v62 = vpop.f32.mrb[194].mxu0 }
 0x8b5   :  { %v6931_v3 = vadd.f32 %v6923_v19, %v6820_v15  ;;  %v6925_v56 = vpop.f32.mrb[194].mxu1  ;;  %v6885_v43 = vpop.f32.mrb[195].mxu0 }
 0x8b6   :  { %v6926_v25 = vpop.f32.mrb[195].mxu1  ;;  %v7432_v42 = vpop.permute.xlu0 %7431 }
 0x8ba   :  { %v7003_v37 = vpop.f32.mrb[196].mxu0 }
 0x8bb   :  { %v7051_v10 = vadd.f32 %v7003_v37, %v6928_v20  ;;  %v7044_v51 = vpop.f32.mrb[196].mxu1  ;;  %v7005_v63 = vpop.f32.mrb[197].mxu0 }
 0x8bc   :  { %v7053_v18 = vadd.f32 %v7044_v51, %v6930_v32  ;;  %v7052_v52 = vadd.f32 %v7005_v63, %v6929_v35  ;;  %v7046_v39 = vpop.f32.mrb[197].mxu1  ;;  %v7007_v28 = vpop.f32.mrb[198].mxu0 }
 0x8bd   :  { %v7054_v50 = vadd.f32 %v7046_v39, %v6931_v3  ;;  %v7048_v1 = vpop.f32.mrb[198].mxu1  ;;  %v7008_v14 = vpop.f32.mrb[199].mxu0 }
 0x8be   :  { %v7049_v33 = vpop.f32.mrb[199].mxu1 }
 0x8c2   :  { %v7126_v0 = vpop.f32.mrb[200].mxu0 }
 0x8c3   :  { %v7174_v17 = vadd.f32 %v7126_v0, %v7051_v10  ;;  %v7167_v12 = vpop.f32.mrb[200].mxu1  ;;  %v7128_v53 = vpop.f32.mrb[201].mxu0 }
 0x8c4   :  { %v7176_v34 = vadd.f32 %v7167_v12, %v7053_v18  ;;  %v7175_v21 = vadd.f32 %v7128_v53, %v7052_v52  ;;  %v7169_v57 = vpop.f32.mrb[201].mxu1  ;;  %v7130_v23 = vpop.f32.mrb[202].mxu0 }
 0x8c5   :  { %v7177_v40 = vadd.f32 %v7169_v57, %v7054_v50  ;;  %v7171_v6 = vpop.f32.mrb[202].mxu1  ;;  %v7131_v8 = vpop.f32.mrb[203].mxu0 }
 0x8c6   :  { %v7172_v46 = vpop.f32.mrb[203].mxu1 }
 0x8ca   :  { %v7249_v48 = vpop.f32.mrb[204].mxu0 }
 0x8cb   :  { %v7297_v31 = vadd.f32 %v7249_v48, %v7174_v17  ;;  %v7290_v49 = vpop.f32.mrb[204].mxu1  ;;  %v7251_v7 = vpop.f32.mrb[205].mxu0 }
 0x8cc   :  { %v7299_v13 = vadd.f32 %v7290_v49, %v7176_v34  ;;  %v7298_v36 = vadd.f32 %v7251_v7, %v7175_v21  ;;  %v7292_v44 = vpop.f32.mrb[205].mxu1  ;;  %v7253_v16 = vpop.f32.mrb[206].mxu0 }
 0x8cd   :  { %v7300_v4 = vadd.f32 %v7292_v44, %v7177_v40  ;;  %v7294_v9 = vpop.f32.mrb[206].mxu1  ;;  %v7254_v61 = vpop.f32.mrb[207].mxu0 }
 0x8ce   :  { %v7295_v59 = vpop.f32.mrb[207].mxu1 }
 0x8d2   :  { %v7372_v30 = vpop.f32.mrb[208].mxu0 }
 0x8d3   :  { %v7420_v26 = vadd.f32 %v7372_v30, %v7297_v31  ;;  %v7413_v5 = vpop.f32.mrb[208].mxu1  ;;  %v7374_v60 = vpop.f32.mrb[209].mxu0 }
 0x8d4   :  { %v7422_v55 = vadd.f32 %v7413_v5, %v7299_v13  ;;  %v7421_v11 = vadd.f32 %v7374_v60, %v7298_v36  ;;  %v7415_v24 = vpop.f32.mrb[209].mxu1  ;;  %v7376_v38 = vpop.f32.mrb[210].mxu0 }
 0x8d5   :  { %v7424_v15 = vadd.f32 %v7420_v26, %v10341_v45  ;;  %v7423_v54 = vadd.f32 %v7415_v24, %v7300_v4  ;;  %v7417_v58 = vpop.f32.mrb[210].mxu1  ;;  %v7377_v22 = vpop.f32.mrb[211].mxu0 }
 0x8d6   :  { %v7426_v20 = vadd.f32 %v7422_v55, %v10344_v29  ;;  %v7425_v47 = vadd.f32 %v7421_v11, %v10347_v27  ;;  %v7418_v41 = vpop.f32.mrb[211].mxu1 }
 0x8d7   :  { %v7434_v32 = vadd.f32 %v7432_v42, %v7424_v15  ;;  %v7427_v35 = vadd.f32 %v7423_v54, %v10350_v2 }
 0x8d8   :  { %v7436_v19 = vadd.f32 %v7432_v42, %v7426_v20  ;;  %v7435_v62 = vadd.f32 %v7432_v42, %v7425_v47 }
 0x8d9   :  { %v7437_v3 = vadd.f32 %v7432_v42, %v7427_v35 }
 0x8da   :  { %v7442_v56 = vcombine.low %v7434_v32, %v7435_v62 }
 0x8db   :  { %v7443_v43 = vcombine.low %v7436_v19, %v7437_v3 }
 0x8dc   :  { %7446 = vst [vmem:[%s10386_s22] sm:$0xff] %v7442_v56 }
 0x8dd   :  { %7447 = vst [vmem:[%s10386_s22 + $0x8] sm:$0xff] %v7443_v43 }

</bundles_post_ra>
